<compile_context>
chip_gen: v7x
topology: tpu7x:2x2x1
jax: 0.10.0
libtpu: 0.0.40
codegen_flags: <defaults>
</compile_context>

<pallas_src>
import jax
import jax.numpy as jnp
from jax import lax
from jax.experimental import pallas as pl
from jax.experimental.pallas import tpu as pltpu


# Geometry implied by the PyTorch module (dense head expects 64*3*3 features,
# which pins the input spatial size to 24x24).
_IN_H = _IN_W = 24
_C_IN, _C1, _C2, _C3 = 3, 32, 64, 64
_FC_HIDDEN = 128

# Stage 1: conv output kept in UNPADDED (y, x) coords, width 24 (mult of 8).
_H1, _W1 = 24, 24
_R1 = _H1 * _W1                 # 576 rows / image in the conv1 scratch
_M1POST = 32                    # bottom margin for pooling shifts (>= W1+1)

# Stage 2: input 12x12 -> padded 14 rows, padded width aligned 14->16.
_H2, _W2 = 12, 12
_HP2, _WP2 = _H2 + 2, 16
_R2 = _HP2 * _WP2               # 224 rows / image
_M2 = 24                        # top/bottom margin of padded input (>= WP2+1, mult of 8)
_M2POST = 24                    # bottom margin of conv2 scratch (>= WP2+1)

# Stage 3: input 6x6 -> padded 8x8 (already sublane-aligned).
_H3, _W3 = 6, 6
_HP3, _WP3 = 8, 8
_R3 = _HP3 * _WP3               # 64 rows / image
_M3 = 16
_M3POST = 16

_HO1, _WO1 = 12, 12             # pooled sizes per stage
_HO2, _WO2 = 6, 6
_HO3, _WO3 = 3, 3
_NPOS = _HO3 * _WO3             # 9 pooled positions -> 9 K-blocks of fc1

# Images per grid step.  ~1.2 MiB VMEM/image persistent + <5 MiB transients
# => nc=8 peaks around 15 MiB: fits v6e/v7x's 32 MiB scoped default with wide
# margin and v5e once vmem_limit_bytes is raised; keeps matmul M >= 512 for
# every conv stage while always leaving >= 2 grid steps for v7x's 2 TCs.
_MAX_CHUNK = 8


def _pick_chunk(n):
    if n <= 1:
        return 1
    # ceil(n/2) capped: >= 2 grid steps whenever possible (v7x has 2 TCs).
    return min(_MAX_CHUNK, max(1, -(-n // 2)))


# --------------------------- fused Pallas kernel --------------------------- #

def _make_fused_kernel(nc, num_classes):
    r1c, r2c, r3c = nc * _R1, nc * _R2, nc * _R3

    def kernel(x_ref, w1_ref, b1_ref, w2_ref, b2_ref, w3_ref, b3_ref,
               fc1_ref, fb1_ref, fc2_ref, fb2_ref,
               o_ref,
               c1_ref, a2_ref, c2_ref, a3_ref, c3_ref, p3_ref):

        def conv_taps(src_ref, w_ref, b_ref, dst_ref, cin, wp, margin, r_core):
            """3x3 'same' conv + bias + ReLU over a padded, row-flattened
            activation (rows = (image, padded_y, padded_x), lanes = channels).
            The 9 taps are shifted matmuls accumulated in a VALUE (chained MXU
            accumulation); bias+ReLU fold into the single store.  Border rows
            of the result are garbage but pooling never reads them."""
            acc = None
            for o in range(9):
                dy, dx = divmod(o, 3)
                off = (dy - 1) * wp + (dx - 1)
                t = jnp.dot(src_ref[pl.ds(margin + off, r_core), :],
                            w_ref[pl.ds(o * cin, cin), :],
                            preferred_element_type=jnp.float32)
                acc = t if acc is None else acc + t
            dst_ref[pl.ds(0, r_core), :] = jnp.maximum(acc + b_ref[...], 0.0)

        def pool(src_ref, r_img, w, ho, wo, y0, x0, write_rows):
            """2x2 / stride-2 max-pool.  Per image: one full-slab 4-way max
            (full-vreg VPU work, offsets 0/+1/+w/+w+1, written back in place),
            then one stride-2 compaction read + one store per output row.
            Positions contaminated by the bottom margin / next image are odd
            (y, x) positions, which the compaction never reads."""
            for n in range(nc):
                base = n * r_img
                m = jnp.maximum(
                    jnp.maximum(src_ref[pl.ds(base, r_img), :],
                                src_ref[pl.ds(base + 1, r_img), :]),
                    jnp.maximum(src_ref[pl.ds(base + w, r_img), :],
                                src_ref[pl.ds(base + w + 1, r_img), :]))
                src_ref[pl.ds(base, r_img), :] = m
                for oy in range(ho):
                    start = base + (2 * oy + y0) * w + x0
                    write_rows(n, oy, src_ref[pl.ds(start, wo, stride=2), :])

        # Padded stage-2/3 inputs need a zero 1-pixel frame; scratch persists
        # across steps (and per-core), so zero every step.  Do NOT gate this
        # with program_id==0: unsafe under "parallel" on multi-core chips.
        a2_ref[...] = jnp.zeros(a2_ref.shape, a2_ref.dtype)
        a3_ref[...] = jnp.zeros(a3_ref.shape, a3_ref.dtype)

        # ---- stage 1: conv 3->32 as ONE K=27 matmul over im2col'd input ----
        v1 = jnp.dot(x_ref[...], w1_ref[...], preferred_element_type=jnp.float32)
        c1_ref[pl.ds(0, r1c), :] = jnp.maximum(v1 + b1_ref[...], 0.0)

        def to_a2(n, oy, rows):
            a2_ref[pl.ds(_M2 + n * _R2 + (oy + 1) * _WP2 + 1, _WO1), :] = rows
        pool(c1_ref, _R1, _W1, _HO1, _WO1, 0, 0, to_a2)

        # ---- stage 2: conv 32->64 (9 shifted taps), pool into stage-3 input -
        conv_taps(a2_ref, w2_ref, b2_ref, c2_ref, _C1, _WP2, _M2, r2c)

        def to_a3(n, oy, rows):
            a3_ref[pl.ds(_M3 + n * _R3 + (oy + 1) * _WP3 + 1, _WO2), :] = rows
        pool(c2_ref, _R2, _WP2, _HO2, _WO2, 1, 1, to_a3)

        # ---- stage 3: conv 64->64, pool into the (nc*9, 64) feature buffer --
        conv_taps(a3_ref, w3_ref, b3_ref, c3_ref, _C2, _WP3, _M3, r3c)

        def to_p3(n, oy, rows):
            p3_ref[pl.ds(n * _NPOS + oy * _WO3, _WO3), :] = rows
        pool(c3_ref, _R3, _WP3, _HO3, _WO3, 1, 1, to_p3)

        # ---- dense head: Linear(576,128) + ReLU + Linear(128, c) -----------
        # fc1 rows pre-permuted to (spatial p, channel c) order so the 576-wide
        # contraction is 9 accumulated (nc,64)x(64,128) matmuls (reproducing
        # PyTorch's NCHW flatten).
        h = None
        for p in range(_NPOS):
            if nc > 1:
                feat = p3_ref[pl.ds(p, nc, stride=_NPOS), :]
            else:
                feat = p3_ref[pl.ds(p, 1), :]
            t = jnp.dot(feat, fc1_ref[pl.ds(p * _C3, _C3), :],
                        preferred_element_type=jnp.float32)
            h = t if h is None else h + t
        h = jnp.maximum(h + fb1_ref[...], 0.0)
        o_ref[...] = (jnp.dot(h, fc2_ref[...], preferred_element_type=jnp.float32)
                      + fb2_ref[...]).astype(o_ref.dtype)

    return kernel


# ------------------------------ JAX wrapper -------------------------------- #

def _im2col_stage1(x_nhwc):
    """(N, 24, 24, 3) -> (N, 576, 27): 3x3 'same' patches, features ordered
    (dy, dx, ci) to match the (27, 32) packed conv1 weight."""
    n = x_nhwc.shape[0]
    xp = jnp.pad(x_nhwc, ((0, 0), (1, 1), (1, 1), (0, 0)))
    cols = [xp[:, dy:dy + _H1, dx:dx + _W1, :]
            for dy in range(3) for dx in range(3)]
    return jnp.concatenate(cols, axis=-1).reshape(n, _R1, 9 * _C_IN)


def _fused_forward(kparams, x_nhwc, nc):
    """x_nhwc: (G*nc, 24, 24, 3) float32 -> logits (G*nc, num_classes)."""
    n = x_nhwc.shape[0]
    g = n // nc
    num_classes = kparams["fc2"].shape[1]

    xi = _im2col_stage1(x_nhwc).reshape(g, nc * _R1, 9 * _C_IN)

    def const_spec(shape):                       # weights: resident block
        return pl.BlockSpec(shape, lambda gi: (0, 0))

    out = pl.pallas_call(
        _make_fused_kernel(nc, num_classes),
        out_shape=jax.ShapeDtypeStruct((g, nc, num_classes), jnp.float32),
        grid=(g,),
        in_specs=[
            pl.BlockSpec((None, nc * _R1, 9 * _C_IN), lambda gi: (gi, 0, 0)),
            const_spec((9 * _C_IN, _C1)), const_spec((1, _C1)),
            const_spec((9 * _C1, _C2)), const_spec((1, _C2)),
            const_spec((9 * _C2, _C3)), const_spec((1, _C3)),
            const_spec((_NPOS * _C3, _FC_HIDDEN)), const_spec((1, _FC_HIDDEN)),
            const_spec((_FC_HIDDEN, num_classes)), const_spec((1, num_classes)),
        ],
        out_specs=pl.BlockSpec((None, nc, num_classes), lambda gi: (gi, 0, 0)),
        scratch_shapes=[
            pltpu.VMEM((nc * _R1 + _M1POST, _C1), jnp.float32),   # conv1 out (+pool margin)
            pltpu.VMEM((nc * _R2 + 2 * _M2, _C1), jnp.float32),   # padded stage-2 input
            pltpu.VMEM((nc * _R2 + _M2POST, _C2), jnp.float32),   # conv2 out (+pool margin)
            pltpu.VMEM((nc * _R3 + 2 * _M3, _C2), jnp.float32),   # padded stage-3 input
            pltpu.VMEM((nc * _R3 + _M3POST, _C3), jnp.float32),   # conv3 out (+pool margin)
            pltpu.VMEM((nc * _NPOS, _C3), jnp.float32),           # pooled 3x3x64 features
        ],
        compiler_params=pltpu.CompilerParams(
            dimension_semantics=("parallel",),      # >=2 steps -> both v7x TCs busy
            vmem_limit_bytes=32 * 1024 * 1024,      # covers v5e's 16 MiB default
        ),
    )(xi, kparams["w1"], kparams["b1"], kparams["w2"], kparams["b2"],
      kparams["w3"], kparams["b3"], kparams["fc1"], kparams["fb1"],
      kparams["fc2"], kparams["fb2"])
    return out.reshape(g * nc, num_classes)


@jax.jit
def net_forward(kparams, x_nchw):
    """Forward pass matching Net.forward; input is NCHW float32 (N, 3, 24, 24)."""
    n = x_nchw.shape[0]
    x = jnp.transpose(x_nchw, (0, 2, 3, 1)).astype(jnp.float32)     # -> NHWC
    if x.shape[1:] != (_IN_H, _IN_W, _C_IN):
        raise ValueError(f"expected (N, 3, {_IN_H}, {_IN_W}), got {x_nchw.shape}")
    nc = _pick_chunk(n)
    g = -(-n // nc)
    if g * nc != n:                                # pad batch to full chunks
        x = jnp.pad(x, ((0, g * nc - n), (0, 0), (0, 0), (0, 0)))
    return _fused_forward(kparams, x, nc)[:n]


# ------------------------------- parameters -------------------------------- #

def init_params(key, num_classes):
    """Deterministic synthetic parameters in PyTorch layouts/shapes."""
    ks = jax.random.split(key, 10)

    def u(k, shape, fan_in):
        bound = 1.0 / jnp.sqrt(jnp.float32(fan_in))
        return jax.random.uniform(k, shape, jnp.float32, -bound, bound)

    return {
        "conv1_w": u(ks[0], (32, 3, 3, 3), 3 * 9),
        "conv1_b": u(ks[1], (32,), 3 * 9),
        "conv2_w": u(ks[2], (64, 32, 3, 3), 32 * 9),
        "conv2_b": u(ks[3], (64,), 32 * 9),
        "conv3_w": u(ks[4], (64, 64, 3, 3), 64 * 9),
        "conv3_b": u(ks[5], (64,), 64 * 9),
        "fc1_w": u(ks[6], (128, 64 * 3 * 3), 64 * 3 * 3),   # torch Linear (out, in)
        "fc1_b": u(ks[7], (128,), 64 * 3 * 3),
        "fc2_w": u(ks[8], (num_classes, 128), 128),
        "fc2_b": u(ks[9], (num_classes,), 128),
    }


def prepare_params(params):
    """One-time repack of PyTorch-layout weights into kernel layouts (called
    OUTSIDE the jitted forward so there are no per-step transposes)."""
    def conv_w(w):          # (Cout, Cin, 3, 3) -> (9*Cin, Cout), rows (dy, dx, ci)
        co, ci = w.shape[0], w.shape[1]
        return jnp.transpose(w, (2, 3, 1, 0)).reshape(9 * ci, co)

    fc1 = params["fc1_w"]                    # (128, 576), torch input index = c*9 + p
    out_f, in_f = fc1.shape
    p3 = in_f // _C3
    # -> rows ordered (p, c): matches the kernel's NHWC-ordered pooled features.
    fc1_k = jnp.transpose(fc1.reshape(out_f, _C3, p3), (2, 1, 0)).reshape(p3 * _C3, out_f)

    return {
        "w1": conv_w(params["conv1_w"]), "b1": params["conv1_b"].reshape(1, -1),
        "w2": conv_w(params["conv2_w"]), "b2": params["conv2_b"].reshape(1, -1),
        "w3": conv_w(params["conv3_w"]), "b3": params["conv3_b"].reshape(1, -1),
        "fc1": fc1_k, "fb1": params["fc1_b"].reshape(1, -1),
        "fc2": params["fc2_w"].T, "fb2": params["fc2_b"].reshape(1, -1),
    }


# ------------------------- pure-JAX reference check ------------------------ #

@jax.jit
def reference_forward(params, x_nchw):
    def block(x, w, b):
        y = lax.conv_general_dilated(
            x, w, window_strides=(1, 1), padding=((1, 1), (1, 1)),
            dimension_numbers=("NCHW", "OIHW", "NCHW"))
        y = jnp.maximum(y + b[None, :, None, None], 0.0)
        return lax.reduce_window(y, -jnp.inf, lax.max,
                                 (1, 1, 2, 2), (1, 1, 2, 2), "VALID")

    y = block(x_nchw, params["conv1_w"], params["conv1_b"])
    y = block(y, params["conv2_w"], params["conv2_b"])
    y = block(y, params["conv3_w"], params["conv3_b"])
    flat = y.reshape(y.shape[0], -1)                      # NCHW flatten, like torch
    h = jnp.maximum(flat @ params["fc1_w"].T + params["fc1_b"], 0.0)
    return h @ params["fc2_w"].T + params["fc2_b"]


if __name__ == "__main__":
    num_classes = 10
    key = jax.random.PRNGKey(0)
    pkey, xkey1, xkey2 = jax.random.split(key, 3)

    params = init_params(pkey, num_classes)
    kparams = prepare_params(params)

    # Input spatial must be 24x24 so three 2x2 pools give 3x3 (64*3*3 = 576).
    # batch=2 exercises nc=1; batch=10 exercises nc=5 with a 2-step parallel grid.
    for batch, xkey in ((2, xkey1), (10, xkey2)):
        x = jax.random.normal(xkey, (batch, 3, _IN_H, _IN_W), jnp.float32)
        out = net_forward(kparams, x)
        jax.block_until_ready(out)
        assert out.shape == (batch, num_classes), out.shape

        ref = reference_forward(params, x)
        err = float(jnp.max(jnp.abs(out - ref)))
        assert err < 1e-3, f"batch={batch}: max abs diff vs reference: {err}"

    print("KERNEL_OK")
</pallas_src>

<mosaic_0001>
module attributes {stable_mosaic.version = 11 : i64} {
  func.func @kernel(%arg0: i32, %arg1: memref<1x576x27xf32, #tpu.memory_space<vmem>>, %arg2: memref<27x32xf32, #tpu.memory_space<vmem>>, %arg3: memref<1x32xf32, #tpu.memory_space<vmem>>, %arg4: memref<288x64xf32, #tpu.memory_space<vmem>>, %arg5: memref<1x64xf32, #tpu.memory_space<vmem>>, %arg6: memref<576x64xf32, #tpu.memory_space<vmem>>, %arg7: memref<1x64xf32, #tpu.memory_space<vmem>>, %arg8: memref<576x128xf32, #tpu.memory_space<vmem>>, %arg9: memref<1x128xf32, #tpu.memory_space<vmem>>, %arg10: memref<128x10xf32, #tpu.memory_space<vmem>>, %arg11: memref<1x10xf32, #tpu.memory_space<vmem>>, %arg12: memref<1x1x10xf32, #tpu.memory_space<vmem>>, %arg13: memref<608x32xf32, #tpu.memory_space<vmem>>, %arg14: memref<272x32xf32, #tpu.memory_space<vmem>>, %arg15: memref<248x64xf32, #tpu.memory_space<vmem>>, %arg16: memref<96x64xf32, #tpu.memory_space<vmem>>, %arg17: memref<80x64xf32, #tpu.memory_space<vmem>>, %arg18: memref<9x64xf32, #tpu.memory_space<vmem>>) attributes {dimension_semantics = [#tpu.dimension_semantics<parallel>], iteration_bounds = array<i64: 2>, scalar_prefetch = 0 : i64, scratch_operands = 6 : i64, tpu.core_type = #tpu.core_type<tc>, window_params = [{transform_indices = @transform_0, window_bounds = array<i64: 1, 576, 27>}, {pipeline_mode = #tpu.pipeline_mode<synchronous>, transform_indices = @transform_1, window_bounds = array<i64: 27, 32>}, {pipeline_mode = #tpu.pipeline_mode<synchronous>, transform_indices = @transform_2, window_bounds = array<i64: 1, 32>}, {pipeline_mode = #tpu.pipeline_mode<synchronous>, transform_indices = @transform_3, window_bounds = array<i64: 288, 64>}, {pipeline_mode = #tpu.pipeline_mode<synchronous>, transform_indices = @transform_4, window_bounds = array<i64: 1, 64>}, {pipeline_mode = #tpu.pipeline_mode<synchronous>, transform_indices = @transform_5, window_bounds = array<i64: 576, 64>}, {pipeline_mode = #tpu.pipeline_mode<synchronous>, transform_indices = @transform_6, window_bounds = array<i64: 1, 64>}, {pipeline_mode = #tpu.pipeline_mode<synchronous>, transform_indices = @transform_7, window_bounds = array<i64: 576, 128>}, {pipeline_mode = #tpu.pipeline_mode<synchronous>, transform_indices = @transform_8, window_bounds = array<i64: 1, 128>}, {pipeline_mode = #tpu.pipeline_mode<synchronous>, transform_indices = @transform_9, window_bounds = array<i64: 128, 10>}, {pipeline_mode = #tpu.pipeline_mode<synchronous>, transform_indices = @transform_10, window_bounds = array<i64: 1, 10>}, {transform_indices = @transform_11, window_bounds = array<i64: 1, 1, 10>}]} {
    %cst = arith.constant 0.000000e+00 : f32
    %0 = vector.broadcast %cst : f32 to vector<272x32xf32>
    %c0 = arith.constant 0 : index
    %c0_0 = arith.constant 0 : index
    %1 = vector.load %arg14[%c0, %c0_0] : memref<272x32xf32, #tpu.memory_space<vmem>>, vector<272x32xf32>
    tpu.vector_store %arg14[%c0, %c0_0], %0 {strides = array<i32>} : memref<272x32xf32, #tpu.memory_space<vmem>>, vector<272x32xf32>,
    %cst_1 = arith.constant 0.000000e+00 : f32
    %2 = vector.broadcast %cst_1 : f32 to vector<96x64xf32>
    %c0_2 = arith.constant 0 : index
    %c0_3 = arith.constant 0 : index
    %3 = vector.load %arg16[%c0_2, %c0_3] : memref<96x64xf32, #tpu.memory_space<vmem>>, vector<96x64xf32>
    tpu.vector_store %arg16[%c0_2, %c0_3], %2 {strides = array<i32>} : memref<96x64xf32, #tpu.memory_space<vmem>>, vector<96x64xf32>,
    %c0_4 = arith.constant 0 : index
    %c0_5 = arith.constant 0 : index
    %c0_6 = arith.constant 0 : index
    %4 = vector.load %arg1[%c0_4, %c0_5, %c0_6] : memref<1x576x27xf32, #tpu.memory_space<vmem>>, vector<1x576x27xf32>
    %5 = vector.shape_cast %4 : vector<1x576x27xf32> to vector<576x27xf32>
    %c0_7 = arith.constant 0 : index
    %c0_8 = arith.constant 0 : index
    %6 = vector.load %arg2[%c0_7, %c0_8] : memref<27x32xf32, #tpu.memory_space<vmem>>, vector<27x32xf32>
    %cst_9 = arith.constant dense<0.000000e+00> : vector<576x32xf32>
    %7 = tpu.matmul %5, %6, %cst_9 {dimension_numbers = #tpu.dot_dimension_numbers<[1], [0], [0], [1], [0, 0, 1, 1], [], []>} : vector<576x27xf32>, vector<27x32xf32>, vector<576x32xf32> -> vector<576x32xf32>
    %c0_10 = arith.constant 0 : index
    %c0_11 = arith.constant 0 : index
    %8 = vector.load %arg3[%c0_10, %c0_11] : memref<1x32xf32, #tpu.memory_space<vmem>>, vector<1x32xf32>
    %9 = vector.broadcast %8 : vector<1x32xf32> to vector<576x32xf32>
    %10 = arith.addf %7, %9 : vector<576x32xf32>
    %cst_12 = arith.constant 0.000000e+00 : f32
    %11 = vector.broadcast %cst_12 : f32 to vector<576x32xf32>
    %12 = arith.maximumf %10, %11 : vector<576x32xf32>
    %c0_13 = arith.constant 0 : index
    %c0_14 = arith.constant 0 : index
    %13 = vector.load %arg13[%c0_13, %c0_14] : memref<608x32xf32, #tpu.memory_space<vmem>>, vector<576x32xf32>
    tpu.vector_store %arg13[%c0_13, %c0_14], %12 {strides = array<i32>} : memref<608x32xf32, #tpu.memory_space<vmem>>, vector<576x32xf32>,
    %c0_15 = arith.constant 0 : index
    %c0_16 = arith.constant 0 : index
    %14 = vector.load %arg13[%c0_15, %c0_16] : memref<608x32xf32, #tpu.memory_space<vmem>>, vector<576x32xf32>
    %c1 = arith.constant 1 : index
    %c0_17 = arith.constant 0 : index
    %15 = vector.load %arg13[%c1, %c0_17] : memref<608x32xf32, #tpu.memory_space<vmem>>, vector<576x32xf32>
    %16 = arith.maximumf %14, %15 : vector<576x32xf32>
    %c24 = arith.constant 24 : index
    %c0_18 = arith.constant 0 : index
    %17 = vector.load %arg13[%c24, %c0_18] : memref<608x32xf32, #tpu.memory_space<vmem>>, vector<576x32xf32>
    %c25 = arith.constant 25 : index
    %c0_19 = arith.constant 0 : index
    %18 = vector.load %arg13[%c25, %c0_19] : memref<608x32xf32, #tpu.memory_space<vmem>>, vector<576x32xf32>
    %19 = arith.maximumf %17, %18 : vector<576x32xf32>
    %20 = arith.maximumf %16, %19 : vector<576x32xf32>
    %c0_20 = arith.constant 0 : index
    %c0_21 = arith.constant 0 : index
    %21 = vector.load %arg13[%c0_20, %c0_21] : memref<608x32xf32, #tpu.memory_space<vmem>>, vector<576x32xf32>
    tpu.vector_store %arg13[%c0_20, %c0_21], %20 {strides = array<i32>} : memref<608x32xf32, #tpu.memory_space<vmem>>, vector<576x32xf32>,
    %c0_22 = arith.constant 0 : index
    %c0_23 = arith.constant 0 : index
    %22 = tpu.strided_load %arg13[%c0_22, %c0_23] {strides = array<i32: 2, 1>} : memref<608x32xf32, #tpu.memory_space<vmem>>, vector<12x32xf32>
    %c41 = arith.constant 41 : index
    %c0_24 = arith.constant 0 : index
    %23 = vector.load %arg14[%c41, %c0_24] : memref<272x32xf32, #tpu.memory_space<vmem>>, vector<12x32xf32>
    tpu.vector_store %arg14[%c41, %c0_24], %22 {strides = array<i32>} : memref<272x32xf32, #tpu.memory_space<vmem>>, vector<12x32xf32>,
    %c48 = arith.constant 48 : index
    %c0_25 = arith.constant 0 : index
    %24 = tpu.strided_load %arg13[%c48, %c0_25] {strides = array<i32: 2, 1>} : memref<608x32xf32, #tpu.memory_space<vmem>>, vector<12x32xf32>
    %c57 = arith.constant 57 : index
    %c0_26 = arith.constant 0 : index
    %25 = vector.load %arg14[%c57, %c0_26] : memref<272x32xf32, #tpu.memory_space<vmem>>, vector<12x32xf32>
    tpu.vector_store %arg14[%c57, %c0_26], %24 {strides = array<i32>} : memref<272x32xf32, #tpu.memory_space<vmem>>, vector<12x32xf32>,
    %c96 = arith.constant 96 : index
    %c0_27 = arith.constant 0 : index
    %26 = tpu.strided_load %arg13[%c96, %c0_27] {strides = array<i32: 2, 1>} : memref<608x32xf32, #tpu.memory_space<vmem>>, vector<12x32xf32>
    %c73 = arith.constant 73 : index
    %c0_28 = arith.constant 0 : index
    %27 = vector.load %arg14[%c73, %c0_28] : memref<272x32xf32, #tpu.memory_space<vmem>>, vector<12x32xf32>
    tpu.vector_store %arg14[%c73, %c0_28], %26 {strides = array<i32>} : memref<272x32xf32, #tpu.memory_space<vmem>>, vector<12x32xf32>,
    %c144 = arith.constant 144 : index
    %c0_29 = arith.constant 0 : index
    %28 = tpu.strided_load %arg13[%c144, %c0_29] {strides = array<i32: 2, 1>} : memref<608x32xf32, #tpu.memory_space<vmem>>, vector<12x32xf32>
    %c89 = arith.constant 89 : index
    %c0_30 = arith.constant 0 : index
    %29 = vector.load %arg14[%c89, %c0_30] : memref<272x32xf32, #tpu.memory_space<vmem>>, vector<12x32xf32>
    tpu.vector_store %arg14[%c89, %c0_30], %28 {strides = array<i32>} : memref<272x32xf32, #tpu.memory_space<vmem>>, vector<12x32xf32>,
    %c192 = arith.constant 192 : index
    %c0_31 = arith.constant 0 : index
    %30 = tpu.strided_load %arg13[%c192, %c0_31] {strides = array<i32: 2, 1>} : memref<608x32xf32, #tpu.memory_space<vmem>>, vector<12x32xf32>
    %c105 = arith.constant 105 : index
    %c0_32 = arith.constant 0 : index
    %31 = vector.load %arg14[%c105, %c0_32] : memref<272x32xf32, #tpu.memory_space<vmem>>, vector<12x32xf32>
    tpu.vector_store %arg14[%c105, %c0_32], %30 {strides = array<i32>} : memref<272x32xf32, #tpu.memory_space<vmem>>, vector<12x32xf32>,
    %c240 = arith.constant 240 : index
    %c0_33 = arith.constant 0 : index
    %32 = tpu.strided_load %arg13[%c240, %c0_33] {strides = array<i32: 2, 1>} : memref<608x32xf32, #tpu.memory_space<vmem>>, vector<12x32xf32>
    %c121 = arith.constant 121 : index
    %c0_34 = arith.constant 0 : index
    %33 = vector.load %arg14[%c121, %c0_34] : memref<272x32xf32, #tpu.memory_space<vmem>>, vector<12x32xf32>
    tpu.vector_store %arg14[%c121, %c0_34], %32 {strides = array<i32>} : memref<272x32xf32, #tpu.memory_space<vmem>>, vector<12x32xf32>,
    %c288 = arith.constant 288 : index
    %c0_35 = arith.constant 0 : index
    %34 = tpu.strided_load %arg13[%c288, %c0_35] {strides = array<i32: 2, 1>} : memref<608x32xf32, #tpu.memory_space<vmem>>, vector<12x32xf32>
    %c137 = arith.constant 137 : index
    %c0_36 = arith.constant 0 : index
    %35 = vector.load %arg14[%c137, %c0_36] : memref<272x32xf32, #tpu.memory_space<vmem>>, vector<12x32xf32>
    tpu.vector_store %arg14[%c137, %c0_36], %34 {strides = array<i32>} : memref<272x32xf32, #tpu.memory_space<vmem>>, vector<12x32xf32>,
    %c336 = arith.constant 336 : index
    %c0_37 = arith.constant 0 : index
    %36 = tpu.strided_load %arg13[%c336, %c0_37] {strides = array<i32: 2, 1>} : memref<608x32xf32, #tpu.memory_space<vmem>>, vector<12x32xf32>
    %c153 = arith.constant 153 : index
    %c0_38 = arith.constant 0 : index
    %37 = vector.load %arg14[%c153, %c0_38] : memref<272x32xf32, #tpu.memory_space<vmem>>, vector<12x32xf32>
    tpu.vector_store %arg14[%c153, %c0_38], %36 {strides = array<i32>} : memref<272x32xf32, #tpu.memory_space<vmem>>, vector<12x32xf32>,
    %c384 = arith.constant 384 : index
    %c0_39 = arith.constant 0 : index
    %38 = tpu.strided_load %arg13[%c384, %c0_39] {strides = array<i32: 2, 1>} : memref<608x32xf32, #tpu.memory_space<vmem>>, vector<12x32xf32>
    %c169 = arith.constant 169 : index
    %c0_40 = arith.constant 0 : index
    %39 = vector.load %arg14[%c169, %c0_40] : memref<272x32xf32, #tpu.memory_space<vmem>>, vector<12x32xf32>
    tpu.vector_store %arg14[%c169, %c0_40], %38 {strides = array<i32>} : memref<272x32xf32, #tpu.memory_space<vmem>>, vector<12x32xf32>,
    %c432 = arith.constant 432 : index
    %c0_41 = arith.constant 0 : index
    %40 = tpu.strided_load %arg13[%c432, %c0_41] {strides = array<i32: 2, 1>} : memref<608x32xf32, #tpu.memory_space<vmem>>, vector<12x32xf32>
    %c185 = arith.constant 185 : index
    %c0_42 = arith.constant 0 : index
    %41 = vector.load %arg14[%c185, %c0_42] : memref<272x32xf32, #tpu.memory_space<vmem>>, vector<12x32xf32>
    tpu.vector_store %arg14[%c185, %c0_42], %40 {strides = array<i32>} : memref<272x32xf32, #tpu.memory_space<vmem>>, vector<12x32xf32>,
    %c480 = arith.constant 480 : index
    %c0_43 = arith.constant 0 : index
    %42 = tpu.strided_load %arg13[%c480, %c0_43] {strides = array<i32: 2, 1>} : memref<608x32xf32, #tpu.memory_space<vmem>>, vector<12x32xf32>
    %c201 = arith.constant 201 : index
    %c0_44 = arith.constant 0 : index
    %43 = vector.load %arg14[%c201, %c0_44] : memref<272x32xf32, #tpu.memory_space<vmem>>, vector<12x32xf32>
    tpu.vector_store %arg14[%c201, %c0_44], %42 {strides = array<i32>} : memref<272x32xf32, #tpu.memory_space<vmem>>, vector<12x32xf32>,
    %c528 = arith.constant 528 : index
    %c0_45 = arith.constant 0 : index
    %44 = tpu.strided_load %arg13[%c528, %c0_45] {strides = array<i32: 2, 1>} : memref<608x32xf32, #tpu.memory_space<vmem>>, vector<12x32xf32>
    %c217 = arith.constant 217 : index
    %c0_46 = arith.constant 0 : index
    %45 = vector.load %arg14[%c217, %c0_46] : memref<272x32xf32, #tpu.memory_space<vmem>>, vector<12x32xf32>
    tpu.vector_store %arg14[%c217, %c0_46], %44 {strides = array<i32>} : memref<272x32xf32, #tpu.memory_space<vmem>>, vector<12x32xf32>,
    %c7 = arith.constant 7 : index
    %c0_47 = arith.constant 0 : index
    %46 = vector.load %arg14[%c7, %c0_47] : memref<272x32xf32, #tpu.memory_space<vmem>>, vector<224x32xf32>
    %c0_48 = arith.constant 0 : index
    %c0_49 = arith.constant 0 : index
    %47 = vector.load %arg4[%c0_48, %c0_49] : memref<288x64xf32, #tpu.memory_space<vmem>>, vector<32x64xf32>
    %cst_50 = arith.constant dense<0.000000e+00> : vector<224x64xf32>
    %48 = tpu.matmul %46, %47, %cst_50 {dimension_numbers = #tpu.dot_dimension_numbers<[1], [0], [0], [1], [0, 0, 1, 1], [], []>} : vector<224x32xf32>, vector<32x64xf32>, vector<224x64xf32> -> vector<224x64xf32>
    %c8 = arith.constant 8 : index
    %c0_51 = arith.constant 0 : index
    %49 = vector.load %arg14[%c8, %c0_51] : memref<272x32xf32, #tpu.memory_space<vmem>>, vector<224x32xf32>
    %c32 = arith.constant 32 : index
    %c0_52 = arith.constant 0 : index
    %50 = vector.load %arg4[%c32, %c0_52] : memref<288x64xf32, #tpu.memory_space<vmem>>, vector<32x64xf32>
    %cst_53 = arith.constant dense<0.000000e+00> : vector<224x64xf32>
    %51 = tpu.matmul %49, %50, %cst_53 {dimension_numbers = #tpu.dot_dimension_numbers<[1], [0], [0], [1], [0, 0, 1, 1], [], []>} : vector<224x32xf32>, vector<32x64xf32>, vector<224x64xf32> -> vector<224x64xf32>
    %52 = arith.addf %48, %51 : vector<224x64xf32>
    %c9 = arith.constant 9 : index
    %c0_54 = arith.constant 0 : index
    %53 = vector.load %arg14[%c9, %c0_54] : memref<272x32xf32, #tpu.memory_space<vmem>>, vector<224x32xf32>
    %c64 = arith.constant 64 : index
    %c0_55 = arith.constant 0 : index
    %54 = vector.load %arg4[%c64, %c0_55] : memref<288x64xf32, #tpu.memory_space<vmem>>, vector<32x64xf32>
    %cst_56 = arith.constant dense<0.000000e+00> : vector<224x64xf32>
    %55 = tpu.matmul %53, %54, %cst_56 {dimension_numbers = #tpu.dot_dimension_numbers<[1], [0], [0], [1], [0, 0, 1, 1], [], []>} : vector<224x32xf32>, vector<32x64xf32>, vector<224x64xf32> -> vector<224x64xf32>
    %56 = arith.addf %52, %55 : vector<224x64xf32>
    %c23 = arith.constant 23 : index
    %c0_57 = arith.constant 0 : index
    %57 = vector.load %arg14[%c23, %c0_57] : memref<272x32xf32, #tpu.memory_space<vmem>>, vector<224x32xf32>
    %c96_58 = arith.constant 96 : index
    %c0_59 = arith.constant 0 : index
    %58 = vector.load %arg4[%c96_58, %c0_59] : memref<288x64xf32, #tpu.memory_space<vmem>>, vector<32x64xf32>
    %cst_60 = arith.constant dense<0.000000e+00> : vector<224x64xf32>
    %59 = tpu.matmul %57, %58, %cst_60 {dimension_numbers = #tpu.dot_dimension_numbers<[1], [0], [0], [1], [0, 0, 1, 1], [], []>} : vector<224x32xf32>, vector<32x64xf32>, vector<224x64xf32> -> vector<224x64xf32>
    %60 = arith.addf %56, %59 : vector<224x64xf32>
    %c24_61 = arith.constant 24 : index
    %c0_62 = arith.constant 0 : index
    %61 = vector.load %arg14[%c24_61, %c0_62] : memref<272x32xf32, #tpu.memory_space<vmem>>, vector<224x32xf32>
    %c128 = arith.constant 128 : index
    %c0_63 = arith.constant 0 : index
    %62 = vector.load %arg4[%c128, %c0_63] : memref<288x64xf32, #tpu.memory_space<vmem>>, vector<32x64xf32>
    %cst_64 = arith.constant dense<0.000000e+00> : vector<224x64xf32>
    %63 = tpu.matmul %61, %62, %cst_64 {dimension_numbers = #tpu.dot_dimension_numbers<[1], [0], [0], [1], [0, 0, 1, 1], [], []>} : vector<224x32xf32>, vector<32x64xf32>, vector<224x64xf32> -> vector<224x64xf32>
    %64 = arith.addf %60, %63 : vector<224x64xf32>
    %c25_65 = arith.constant 25 : index
    %c0_66 = arith.constant 0 : index
    %65 = vector.load %arg14[%c25_65, %c0_66] : memref<272x32xf32, #tpu.memory_space<vmem>>, vector<224x32xf32>
    %c160 = arith.constant 160 : index
    %c0_67 = arith.constant 0 : index
    %66 = vector.load %arg4[%c160, %c0_67] : memref<288x64xf32, #tpu.memory_space<vmem>>, vector<32x64xf32>
    %cst_68 = arith.constant dense<0.000000e+00> : vector<224x64xf32>
    %67 = tpu.matmul %65, %66, %cst_68 {dimension_numbers = #tpu.dot_dimension_numbers<[1], [0], [0], [1], [0, 0, 1, 1], [], []>} : vector<224x32xf32>, vector<32x64xf32>, vector<224x64xf32> -> vector<224x64xf32>
    %68 = arith.addf %64, %67 : vector<224x64xf32>
    %c39 = arith.constant 39 : index
    %c0_69 = arith.constant 0 : index
    %69 = vector.load %arg14[%c39, %c0_69] : memref<272x32xf32, #tpu.memory_space<vmem>>, vector<224x32xf32>
    %c192_70 = arith.constant 192 : index
    %c0_71 = arith.constant 0 : index
    %70 = vector.load %arg4[%c192_70, %c0_71] : memref<288x64xf32, #tpu.memory_space<vmem>>, vector<32x64xf32>
    %cst_72 = arith.constant dense<0.000000e+00> : vector<224x64xf32>
    %71 = tpu.matmul %69, %70, %cst_72 {dimension_numbers = #tpu.dot_dimension_numbers<[1], [0], [0], [1], [0, 0, 1, 1], [], []>} : vector<224x32xf32>, vector<32x64xf32>, vector<224x64xf32> -> vector<224x64xf32>
    %72 = arith.addf %68, %71 : vector<224x64xf32>
    %c40 = arith.constant 40 : index
    %c0_73 = arith.constant 0 : index
    %73 = vector.load %arg14[%c40, %c0_73] : memref<272x32xf32, #tpu.memory_space<vmem>>, vector<224x32xf32>
    %c224 = arith.constant 224 : index
    %c0_74 = arith.constant 0 : index
    %74 = vector.load %arg4[%c224, %c0_74] : memref<288x64xf32, #tpu.memory_space<vmem>>, vector<32x64xf32>
    %cst_75 = arith.constant dense<0.000000e+00> : vector<224x64xf32>
    %75 = tpu.matmul %73, %74, %cst_75 {dimension_numbers = #tpu.dot_dimension_numbers<[1], [0], [0], [1], [0, 0, 1, 1], [], []>} : vector<224x32xf32>, vector<32x64xf32>, vector<224x64xf32> -> vector<224x64xf32>
    %76 = arith.addf %72, %75 : vector<224x64xf32>
    %c41_76 = arith.constant 41 : index
    %c0_77 = arith.constant 0 : index
    %77 = vector.load %arg14[%c41_76, %c0_77] : memref<272x32xf32, #tpu.memory_space<vmem>>, vector<224x32xf32>
    %c256 = arith.constant 256 : index
    %c0_78 = arith.constant 0 : index
    %78 = vector.load %arg4[%c256, %c0_78] : memref<288x64xf32, #tpu.memory_space<vmem>>, vector<32x64xf32>
    %cst_79 = arith.constant dense<0.000000e+00> : vector<224x64xf32>
    %79 = tpu.matmul %77, %78, %cst_79 {dimension_numbers = #tpu.dot_dimension_numbers<[1], [0], [0], [1], [0, 0, 1, 1], [], []>} : vector<224x32xf32>, vector<32x64xf32>, vector<224x64xf32> -> vector<224x64xf32>
    %80 = arith.addf %76, %79 : vector<224x64xf32>
    %c0_80 = arith.constant 0 : index
    %c0_81 = arith.constant 0 : index
    %81 = vector.load %arg5[%c0_80, %c0_81] : memref<1x64xf32, #tpu.memory_space<vmem>>, vector<1x64xf32>
    %82 = vector.broadcast %81 : vector<1x64xf32> to vector<224x64xf32>
    %83 = arith.addf %80, %82 : vector<224x64xf32>
    %cst_82 = arith.constant 0.000000e+00 : f32
    %84 = vector.broadcast %cst_82 : f32 to vector<224x64xf32>
    %85 = arith.maximumf %83, %84 : vector<224x64xf32>
    %c0_83 = arith.constant 0 : index
    %c0_84 = arith.constant 0 : index
    %86 = vector.load %arg15[%c0_83, %c0_84] : memref<248x64xf32, #tpu.memory_space<vmem>>, vector<224x64xf32>
    tpu.vector_store %arg15[%c0_83, %c0_84], %85 {strides = array<i32>} : memref<248x64xf32, #tpu.memory_space<vmem>>, vector<224x64xf32>,
    %c0_85 = arith.constant 0 : index
    %c0_86 = arith.constant 0 : index
    %87 = vector.load %arg15[%c0_85, %c0_86] : memref<248x64xf32, #tpu.memory_space<vmem>>, vector<224x64xf32>
    %c1_87 = arith.constant 1 : index
    %c0_88 = arith.constant 0 : index
    %88 = vector.load %arg15[%c1_87, %c0_88] : memref<248x64xf32, #tpu.memory_space<vmem>>, vector<224x64xf32>
    %89 = arith.maximumf %87, %88 : vector<224x64xf32>
    %c16 = arith.constant 16 : index
    %c0_89 = arith.constant 0 : index
    %90 = vector.load %arg15[%c16, %c0_89] : memref<248x64xf32, #tpu.memory_space<vmem>>, vector<224x64xf32>
    %c17 = arith.constant 17 : index
    %c0_90 = arith.constant 0 : index
    %91 = vector.load %arg15[%c17, %c0_90] : memref<248x64xf32, #tpu.memory_space<vmem>>, vector<224x64xf32>
    %92 = arith.maximumf %90, %91 : vector<224x64xf32>
    %93 = arith.maximumf %89, %92 : vector<224x64xf32>
    %c0_91 = arith.constant 0 : index
    %c0_92 = arith.constant 0 : index
    %94 = vector.load %arg15[%c0_91, %c0_92] : memref<248x64xf32, #tpu.memory_space<vmem>>, vector<224x64xf32>
    tpu.vector_store %arg15[%c0_91, %c0_92], %93 {strides = array<i32>} : memref<248x64xf32, #tpu.memory_space<vmem>>, vector<224x64xf32>,
    %c17_93 = arith.constant 17 : index
    %c0_94 = arith.constant 0 : index
    %95 = tpu.strided_load %arg15[%c17_93, %c0_94] {strides = array<i32: 2, 1>} : memref<248x64xf32, #tpu.memory_space<vmem>>, vector<6x64xf32>
    %c25_95 = arith.constant 25 : index
    %c0_96 = arith.constant 0 : index
    %96 = vector.load %arg16[%c25_95, %c0_96] : memref<96x64xf32, #tpu.memory_space<vmem>>, vector<6x64xf32>
    tpu.vector_store %arg16[%c25_95, %c0_96], %95 {strides = array<i32>} : memref<96x64xf32, #tpu.memory_space<vmem>>, vector<6x64xf32>,
    %c49 = arith.constant 49 : index
    %c0_97 = arith.constant 0 : index
    %97 = tpu.strided_load %arg15[%c49, %c0_97] {strides = array<i32: 2, 1>} : memref<248x64xf32, #tpu.memory_space<vmem>>, vector<6x64xf32>
    %c33 = arith.constant 33 : index
    %c0_98 = arith.constant 0 : index
    %98 = vector.load %arg16[%c33, %c0_98] : memref<96x64xf32, #tpu.memory_space<vmem>>, vector<6x64xf32>
    tpu.vector_store %arg16[%c33, %c0_98], %97 {strides = array<i32>} : memref<96x64xf32, #tpu.memory_space<vmem>>, vector<6x64xf32>,
    %c81 = arith.constant 81 : index
    %c0_99 = arith.constant 0 : index
    %99 = tpu.strided_load %arg15[%c81, %c0_99] {strides = array<i32: 2, 1>} : memref<248x64xf32, #tpu.memory_space<vmem>>, vector<6x64xf32>
    %c41_100 = arith.constant 41 : index
    %c0_101 = arith.constant 0 : index
    %100 = vector.load %arg16[%c41_100, %c0_101] : memref<96x64xf32, #tpu.memory_space<vmem>>, vector<6x64xf32>
    tpu.vector_store %arg16[%c41_100, %c0_101], %99 {strides = array<i32>} : memref<96x64xf32, #tpu.memory_space<vmem>>, vector<6x64xf32>,
    %c113 = arith.constant 113 : index
    %c0_102 = arith.constant 0 : index
    %101 = tpu.strided_load %arg15[%c113, %c0_102] {strides = array<i32: 2, 1>} : memref<248x64xf32, #tpu.memory_space<vmem>>, vector<6x64xf32>
    %c49_103 = arith.constant 49 : index
    %c0_104 = arith.constant 0 : index
    %102 = vector.load %arg16[%c49_103, %c0_104] : memref<96x64xf32, #tpu.memory_space<vmem>>, vector<6x64xf32>
    tpu.vector_store %arg16[%c49_103, %c0_104], %101 {strides = array<i32>} : memref<96x64xf32, #tpu.memory_space<vmem>>, vector<6x64xf32>,
    %c145 = arith.constant 145 : index
    %c0_105 = arith.constant 0 : index
    %103 = tpu.strided_load %arg15[%c145, %c0_105] {strides = array<i32: 2, 1>} : memref<248x64xf32, #tpu.memory_space<vmem>>, vector<6x64xf32>
    %c57_106 = arith.constant 57 : index
    %c0_107 = arith.constant 0 : index
    %104 = vector.load %arg16[%c57_106, %c0_107] : memref<96x64xf32, #tpu.memory_space<vmem>>, vector<6x64xf32>
    tpu.vector_store %arg16[%c57_106, %c0_107], %103 {strides = array<i32>} : memref<96x64xf32, #tpu.memory_space<vmem>>, vector<6x64xf32>,
    %c177 = arith.constant 177 : index
    %c0_108 = arith.constant 0 : index
    %105 = tpu.strided_load %arg15[%c177, %c0_108] {strides = array<i32: 2, 1>} : memref<248x64xf32, #tpu.memory_space<vmem>>, vector<6x64xf32>
    %c65 = arith.constant 65 : index
    %c0_109 = arith.constant 0 : index
    %106 = vector.load %arg16[%c65, %c0_109] : memref<96x64xf32, #tpu.memory_space<vmem>>, vector<6x64xf32>
    tpu.vector_store %arg16[%c65, %c0_109], %105 {strides = array<i32>} : memref<96x64xf32, #tpu.memory_space<vmem>>, vector<6x64xf32>,
    %c7_110 = arith.constant 7 : index
    %c0_111 = arith.constant 0 : index
    %107 = vector.load %arg16[%c7_110, %c0_111] : memref<96x64xf32, #tpu.memory_space<vmem>>, vector<64x64xf32>
    %c0_112 = arith.constant 0 : index
    %c0_113 = arith.constant 0 : index
    %108 = vector.load %arg6[%c0_112, %c0_113] : memref<576x64xf32, #tpu.memory_space<vmem>>, vector<64x64xf32>
    %cst_114 = arith.constant dense<0.000000e+00> : vector<64x64xf32>
    %109 = tpu.matmul %107, %108, %cst_114 {dimension_numbers = #tpu.dot_dimension_numbers<[1], [0], [0], [1], [0, 0, 1, 1], [], []>} : vector<64x64xf32>, vector<64x64xf32>, vector<64x64xf32> -> vector<64x64xf32>
    %c8_115 = arith.constant 8 : index
    %c0_116 = arith.constant 0 : index
    %110 = vector.load %arg16[%c8_115, %c0_116] : memref<96x64xf32, #tpu.memory_space<vmem>>, vector<64x64xf32>
    %c64_117 = arith.constant 64 : index
    %c0_118 = arith.constant 0 : index
    %111 = vector.load %arg6[%c64_117, %c0_118] : memref<576x64xf32, #tpu.memory_space<vmem>>, vector<64x64xf32>
    %cst_119 = arith.constant dense<0.000000e+00> : vector<64x64xf32>
    %112 = tpu.matmul %110, %111, %cst_119 {dimension_numbers = #tpu.dot_dimension_numbers<[1], [0], [0], [1], [0, 0, 1, 1], [], []>} : vector<64x64xf32>, vector<64x64xf32>, vector<64x64xf32> -> vector<64x64xf32>
    %113 = arith.addf %109, %112 : vector<64x64xf32>
    %c9_120 = arith.constant 9 : index
    %c0_121 = arith.constant 0 : index
    %114 = vector.load %arg16[%c9_120, %c0_121] : memref<96x64xf32, #tpu.memory_space<vmem>>, vector<64x64xf32>
    %c128_122 = arith.constant 128 : index
    %c0_123 = arith.constant 0 : index
    %115 = vector.load %arg6[%c128_122, %c0_123] : memref<576x64xf32, #tpu.memory_space<vmem>>, vector<64x64xf32>
    %cst_124 = arith.constant dense<0.000000e+00> : vector<64x64xf32>
    %116 = tpu.matmul %114, %115, %cst_124 {dimension_numbers = #tpu.dot_dimension_numbers<[1], [0], [0], [1], [0, 0, 1, 1], [], []>} : vector<64x64xf32>, vector<64x64xf32>, vector<64x64xf32> -> vector<64x64xf32>
    %117 = arith.addf %113, %116 : vector<64x64xf32>
    %c15 = arith.constant 15 : index
    %c0_125 = arith.constant 0 : index
    %118 = vector.load %arg16[%c15, %c0_125] : memref<96x64xf32, #tpu.memory_space<vmem>>, vector<64x64xf32>
    %c192_126 = arith.constant 192 : index
    %c0_127 = arith.constant 0 : index
    %119 = vector.load %arg6[%c192_126, %c0_127] : memref<576x64xf32, #tpu.memory_space<vmem>>, vector<64x64xf32>
    %cst_128 = arith.constant dense<0.000000e+00> : vector<64x64xf32>
    %120 = tpu.matmul %118, %119, %cst_128 {dimension_numbers = #tpu.dot_dimension_numbers<[1], [0], [0], [1], [0, 0, 1, 1], [], []>} : vector<64x64xf32>, vector<64x64xf32>, vector<64x64xf32> -> vector<64x64xf32>
    %121 = arith.addf %117, %120 : vector<64x64xf32>
    %c16_129 = arith.constant 16 : index
    %c0_130 = arith.constant 0 : index
    %122 = vector.load %arg16[%c16_129, %c0_130] : memref<96x64xf32, #tpu.memory_space<vmem>>, vector<64x64xf32>
    %c256_131 = arith.constant 256 : index
    %c0_132 = arith.constant 0 : index
    %123 = vector.load %arg6[%c256_131, %c0_132] : memref<576x64xf32, #tpu.memory_space<vmem>>, vector<64x64xf32>
    %cst_133 = arith.constant dense<0.000000e+00> : vector<64x64xf32>
    %124 = tpu.matmul %122, %123, %cst_133 {dimension_numbers = #tpu.dot_dimension_numbers<[1], [0], [0], [1], [0, 0, 1, 1], [], []>} : vector<64x64xf32>, vector<64x64xf32>, vector<64x64xf32> -> vector<64x64xf32>
    %125 = arith.addf %121, %124 : vector<64x64xf32>
    %c17_134 = arith.constant 17 : index
    %c0_135 = arith.constant 0 : index
    %126 = vector.load %arg16[%c17_134, %c0_135] : memref<96x64xf32, #tpu.memory_space<vmem>>, vector<64x64xf32>
    %c320 = arith.constant 320 : index
    %c0_136 = arith.constant 0 : index
    %127 = vector.load %arg6[%c320, %c0_136] : memref<576x64xf32, #tpu.memory_space<vmem>>, vector<64x64xf32>
    %cst_137 = arith.constant dense<0.000000e+00> : vector<64x64xf32>
    %128 = tpu.matmul %126, %127, %cst_137 {dimension_numbers = #tpu.dot_dimension_numbers<[1], [0], [0], [1], [0, 0, 1, 1], [], []>} : vector<64x64xf32>, vector<64x64xf32>, vector<64x64xf32> -> vector<64x64xf32>
    %129 = arith.addf %125, %128 : vector<64x64xf32>
    %c23_138 = arith.constant 23 : index
    %c0_139 = arith.constant 0 : index
    %130 = vector.load %arg16[%c23_138, %c0_139] : memref<96x64xf32, #tpu.memory_space<vmem>>, vector<64x64xf32>
    %c384_140 = arith.constant 384 : index
    %c0_141 = arith.constant 0 : index
    %131 = vector.load %arg6[%c384_140, %c0_141] : memref<576x64xf32, #tpu.memory_space<vmem>>, vector<64x64xf32>
    %cst_142 = arith.constant dense<0.000000e+00> : vector<64x64xf32>
    %132 = tpu.matmul %130, %131, %cst_142 {dimension_numbers = #tpu.dot_dimension_numbers<[1], [0], [0], [1], [0, 0, 1, 1], [], []>} : vector<64x64xf32>, vector<64x64xf32>, vector<64x64xf32> -> vector<64x64xf32>
    %133 = arith.addf %129, %132 : vector<64x64xf32>
    %c24_143 = arith.constant 24 : index
    %c0_144 = arith.constant 0 : index
    %134 = vector.load %arg16[%c24_143, %c0_144] : memref<96x64xf32, #tpu.memory_space<vmem>>, vector<64x64xf32>
    %c448 = arith.constant 448 : index
    %c0_145 = arith.constant 0 : index
    %135 = vector.load %arg6[%c448, %c0_145] : memref<576x64xf32, #tpu.memory_space<vmem>>, vector<64x64xf32>
    %cst_146 = arith.constant dense<0.000000e+00> : vector<64x64xf32>
    %136 = tpu.matmul %134, %135, %cst_146 {dimension_numbers = #tpu.dot_dimension_numbers<[1], [0], [0], [1], [0, 0, 1, 1], [], []>} : vector<64x64xf32>, vector<64x64xf32>, vector<64x64xf32> -> vector<64x64xf32>
    %137 = arith.addf %133, %136 : vector<64x64xf32>
    %c25_147 = arith.constant 25 : index
    %c0_148 = arith.constant 0 : index
    %138 = vector.load %arg16[%c25_147, %c0_148] : memref<96x64xf32, #tpu.memory_space<vmem>>, vector<64x64xf32>
    %c512 = arith.constant 512 : index
    %c0_149 = arith.constant 0 : index
    %139 = vector.load %arg6[%c512, %c0_149] : memref<576x64xf32, #tpu.memory_space<vmem>>, vector<64x64xf32>
    %cst_150 = arith.constant dense<0.000000e+00> : vector<64x64xf32>
    %140 = tpu.matmul %138, %139, %cst_150 {dimension_numbers = #tpu.dot_dimension_numbers<[1], [0], [0], [1], [0, 0, 1, 1], [], []>} : vector<64x64xf32>, vector<64x64xf32>, vector<64x64xf32> -> vector<64x64xf32>
    %141 = arith.addf %137, %140 : vector<64x64xf32>
    %c0_151 = arith.constant 0 : index
    %c0_152 = arith.constant 0 : index
    %142 = vector.load %arg7[%c0_151, %c0_152] : memref<1x64xf32, #tpu.memory_space<vmem>>, vector<1x64xf32>
    %143 = vector.broadcast %142 : vector<1x64xf32> to vector<64x64xf32>
    %144 = arith.addf %141, %143 : vector<64x64xf32>
    %cst_153 = arith.constant 0.000000e+00 : f32
    %145 = vector.broadcast %cst_153 : f32 to vector<64x64xf32>
    %146 = arith.maximumf %144, %145 : vector<64x64xf32>
    %c0_154 = arith.constant 0 : index
    %c0_155 = arith.constant 0 : index
    %147 = vector.load %arg17[%c0_154, %c0_155] : memref<80x64xf32, #tpu.memory_space<vmem>>, vector<64x64xf32>
    tpu.vector_store %arg17[%c0_154, %c0_155], %146 {strides = array<i32>} : memref<80x64xf32, #tpu.memory_space<vmem>>, vector<64x64xf32>,
    %c0_156 = arith.constant 0 : index
    %c0_157 = arith.constant 0 : index
    %148 = vector.load %arg17[%c0_156, %c0_157] : memref<80x64xf32, #tpu.memory_space<vmem>>, vector<64x64xf32>
    %c1_158 = arith.constant 1 : index
    %c0_159 = arith.constant 0 : index
    %149 = vector.load %arg17[%c1_158, %c0_159] : memref<80x64xf32, #tpu.memory_space<vmem>>, vector<64x64xf32>
    %150 = arith.maximumf %148, %149 : vector<64x64xf32>
    %c8_160 = arith.constant 8 : index
    %c0_161 = arith.constant 0 : index
    %151 = vector.load %arg17[%c8_160, %c0_161] : memref<80x64xf32, #tpu.memory_space<vmem>>, vector<64x64xf32>
    %c9_162 = arith.constant 9 : index
    %c0_163 = arith.constant 0 : index
    %152 = vector.load %arg17[%c9_162, %c0_163] : memref<80x64xf32, #tpu.memory_space<vmem>>, vector<64x64xf32>
    %153 = arith.maximumf %151, %152 : vector<64x64xf32>
    %154 = arith.maximumf %150, %153 : vector<64x64xf32>
    %c0_164 = arith.constant 0 : index
    %c0_165 = arith.constant 0 : index
    %155 = vector.load %arg17[%c0_164, %c0_165] : memref<80x64xf32, #tpu.memory_space<vmem>>, vector<64x64xf32>
    tpu.vector_store %arg17[%c0_164, %c0_165], %154 {strides = array<i32>} : memref<80x64xf32, #tpu.memory_space<vmem>>, vector<64x64xf32>,
    %c9_166 = arith.constant 9 : index
    %c0_167 = arith.constant 0 : index
    %156 = tpu.strided_load %arg17[%c9_166, %c0_167] {strides = array<i32: 2, 1>} : memref<80x64xf32, #tpu.memory_space<vmem>>, vector<3x64xf32>
    %c0_168 = arith.constant 0 : index
    %c0_169 = arith.constant 0 : index
    %157 = vector.load %arg18[%c0_168, %c0_169] : memref<9x64xf32, #tpu.memory_space<vmem>>, vector<3x64xf32>
    tpu.vector_store %arg18[%c0_168, %c0_169], %156 {strides = array<i32>} : memref<9x64xf32, #tpu.memory_space<vmem>>, vector<3x64xf32>,
    %c25_170 = arith.constant 25 : index
    %c0_171 = arith.constant 0 : index
    %158 = tpu.strided_load %arg17[%c25_170, %c0_171] {strides = array<i32: 2, 1>} : memref<80x64xf32, #tpu.memory_space<vmem>>, vector<3x64xf32>
    %c3 = arith.constant 3 : index
    %c0_172 = arith.constant 0 : index
    %159 = vector.load %arg18[%c3, %c0_172] : memref<9x64xf32, #tpu.memory_space<vmem>>, vector<3x64xf32>
    tpu.vector_store %arg18[%c3, %c0_172], %158 {strides = array<i32>} : memref<9x64xf32, #tpu.memory_space<vmem>>, vector<3x64xf32>,
    %c41_173 = arith.constant 41 : index
    %c0_174 = arith.constant 0 : index
    %160 = tpu.strided_load %arg17[%c41_173, %c0_174] {strides = array<i32: 2, 1>} : memref<80x64xf32, #tpu.memory_space<vmem>>, vector<3x64xf32>
    %c6 = arith.constant 6 : index
    %c0_175 = arith.constant 0 : index
    %161 = vector.load %arg18[%c6, %c0_175] : memref<9x64xf32, #tpu.memory_space<vmem>>, vector<3x64xf32>
    tpu.vector_store %arg18[%c6, %c0_175], %160 {strides = array<i32>} : memref<9x64xf32, #tpu.memory_space<vmem>>, vector<3x64xf32>,
    %c0_176 = arith.constant 0 : index
    %c0_177 = arith.constant 0 : index
    %162 = vector.load %arg18[%c0_176, %c0_177] : memref<9x64xf32, #tpu.memory_space<vmem>>, vector<1x64xf32>
    %c0_178 = arith.constant 0 : index
    %c0_179 = arith.constant 0 : index
    %163 = vector.load %arg8[%c0_178, %c0_179] : memref<576x128xf32, #tpu.memory_space<vmem>>, vector<64x128xf32>
    %cst_180 = arith.constant dense<0.000000e+00> : vector<1x128xf32>
    %164 = tpu.matmul %162, %163, %cst_180 {dimension_numbers = #tpu.dot_dimension_numbers<[1], [0], [0], [1], [0, 0, 1, 1], [], []>} : vector<1x64xf32>, vector<64x128xf32>, vector<1x128xf32> -> vector<1x128xf32>
    %c1_181 = arith.constant 1 : index
    %c0_182 = arith.constant 0 : index
    %165 = vector.load %arg18[%c1_181, %c0_182] : memref<9x64xf32, #tpu.memory_space<vmem>>, vector<1x64xf32>
    %c64_183 = arith.constant 64 : index
    %c0_184 = arith.constant 0 : index
    %166 = vector.load %arg8[%c64_183, %c0_184] : memref<576x128xf32, #tpu.memory_space<vmem>>, vector<64x128xf32>
    %cst_185 = arith.constant dense<0.000000e+00> : vector<1x128xf32>
    %167 = tpu.matmul %165, %166, %cst_185 {dimension_numbers = #tpu.dot_dimension_numbers<[1], [0], [0], [1], [0, 0, 1, 1], [], []>} : vector<1x64xf32>, vector<64x128xf32>, vector<1x128xf32> -> vector<1x128xf32>
    %168 = arith.addf %164, %167 : vector<1x128xf32>
    %c2 = arith.constant 2 : index
    %c0_186 = arith.constant 0 : index
    %169 = vector.load %arg18[%c2, %c0_186] : memref<9x64xf32, #tpu.memory_space<vmem>>, vector<1x64xf32>
    %c128_187 = arith.constant 128 : index
    %c0_188 = arith.constant 0 : index
    %170 = vector.load %arg8[%c128_187, %c0_188] : memref<576x128xf32, #tpu.memory_space<vmem>>, vector<64x128xf32>
    %cst_189 = arith.constant dense<0.000000e+00> : vector<1x128xf32>
    %171 = tpu.matmul %169, %170, %cst_189 {dimension_numbers = #tpu.dot_dimension_numbers<[1], [0], [0], [1], [0, 0, 1, 1], [], []>} : vector<1x64xf32>, vector<64x128xf32>, vector<1x128xf32> -> vector<1x128xf32>
    %172 = arith.addf %168, %171 : vector<1x128xf32>
    %c3_190 = arith.constant 3 : index
    %c0_191 = arith.constant 0 : index
    %173 = vector.load %arg18[%c3_190, %c0_191] : memref<9x64xf32, #tpu.memory_space<vmem>>, vector<1x64xf32>
    %c192_192 = arith.constant 192 : index
    %c0_193 = arith.constant 0 : index
    %174 = vector.load %arg8[%c192_192, %c0_193] : memref<576x128xf32, #tpu.memory_space<vmem>>, vector<64x128xf32>
    %cst_194 = arith.constant dense<0.000000e+00> : vector<1x128xf32>
    %175 = tpu.matmul %173, %174, %cst_194 {dimension_numbers = #tpu.dot_dimension_numbers<[1], [0], [0], [1], [0, 0, 1, 1], [], []>} : vector<1x64xf32>, vector<64x128xf32>, vector<1x128xf32> -> vector<1x128xf32>
    %176 = arith.addf %172, %175 : vector<1x128xf32>
    %c4 = arith.constant 4 : index
    %c0_195 = arith.constant 0 : index
    %177 = vector.load %arg18[%c4, %c0_195] : memref<9x64xf32, #tpu.memory_space<vmem>>, vector<1x64xf32>
    %c256_196 = arith.constant 256 : index
    %c0_197 = arith.constant 0 : index
    %178 = vector.load %arg8[%c256_196, %c0_197] : memref<576x128xf32, #tpu.memory_space<vmem>>, vector<64x128xf32>
    %cst_198 = arith.constant dense<0.000000e+00> : vector<1x128xf32>
    %179 = tpu.matmul %177, %178, %cst_198 {dimension_numbers = #tpu.dot_dimension_numbers<[1], [0], [0], [1], [0, 0, 1, 1], [], []>} : vector<1x64xf32>, vector<64x128xf32>, vector<1x128xf32> -> vector<1x128xf32>
    %180 = arith.addf %176, %179 : vector<1x128xf32>
    %c5 = arith.constant 5 : index
    %c0_199 = arith.constant 0 : index
    %181 = vector.load %arg18[%c5, %c0_199] : memref<9x64xf32, #tpu.memory_space<vmem>>, vector<1x64xf32>
    %c320_200 = arith.constant 320 : index
    %c0_201 = arith.constant 0 : index
    %182 = vector.load %arg8[%c320_200, %c0_201] : memref<576x128xf32, #tpu.memory_space<vmem>>, vector<64x128xf32>
    %cst_202 = arith.constant dense<0.000000e+00> : vector<1x128xf32>
    %183 = tpu.matmul %181, %182, %cst_202 {dimension_numbers = #tpu.dot_dimension_numbers<[1], [0], [0], [1], [0, 0, 1, 1], [], []>} : vector<1x64xf32>, vector<64x128xf32>, vector<1x128xf32> -> vector<1x128xf32>
    %184 = arith.addf %180, %183 : vector<1x128xf32>
    %c6_203 = arith.constant 6 : index
    %c0_204 = arith.constant 0 : index
    %185 = vector.load %arg18[%c6_203, %c0_204] : memref<9x64xf32, #tpu.memory_space<vmem>>, vector<1x64xf32>
    %c384_205 = arith.constant 384 : index
    %c0_206 = arith.constant 0 : index
    %186 = vector.load %arg8[%c384_205, %c0_206] : memref<576x128xf32, #tpu.memory_space<vmem>>, vector<64x128xf32>
    %cst_207 = arith.constant dense<0.000000e+00> : vector<1x128xf32>
    %187 = tpu.matmul %185, %186, %cst_207 {dimension_numbers = #tpu.dot_dimension_numbers<[1], [0], [0], [1], [0, 0, 1, 1], [], []>} : vector<1x64xf32>, vector<64x128xf32>, vector<1x128xf32> -> vector<1x128xf32>
    %188 = arith.addf %184, %187 : vector<1x128xf32>
    %c7_208 = arith.constant 7 : index
    %c0_209 = arith.constant 0 : index
    %189 = vector.load %arg18[%c7_208, %c0_209] : memref<9x64xf32, #tpu.memory_space<vmem>>, vector<1x64xf32>
    %c448_210 = arith.constant 448 : index
    %c0_211 = arith.constant 0 : index
    %190 = vector.load %arg8[%c448_210, %c0_211] : memref<576x128xf32, #tpu.memory_space<vmem>>, vector<64x128xf32>
    %cst_212 = arith.constant dense<0.000000e+00> : vector<1x128xf32>
    %191 = tpu.matmul %189, %190, %cst_212 {dimension_numbers = #tpu.dot_dimension_numbers<[1], [0], [0], [1], [0, 0, 1, 1], [], []>} : vector<1x64xf32>, vector<64x128xf32>, vector<1x128xf32> -> vector<1x128xf32>
    %192 = arith.addf %188, %191 : vector<1x128xf32>
    %c8_213 = arith.constant 8 : index
    %c0_214 = arith.constant 0 : index
    %193 = vector.load %arg18[%c8_213, %c0_214] : memref<9x64xf32, #tpu.memory_space<vmem>>, vector<1x64xf32>
    %c512_215 = arith.constant 512 : index
    %c0_216 = arith.constant 0 : index
    %194 = vector.load %arg8[%c512_215, %c0_216] : memref<576x128xf32, #tpu.memory_space<vmem>>, vector<64x128xf32>
    %cst_217 = arith.constant dense<0.000000e+00> : vector<1x128xf32>
    %195 = tpu.matmul %193, %194, %cst_217 {dimension_numbers = #tpu.dot_dimension_numbers<[1], [0], [0], [1], [0, 0, 1, 1], [], []>} : vector<1x64xf32>, vector<64x128xf32>, vector<1x128xf32> -> vector<1x128xf32>
    %196 = arith.addf %192, %195 : vector<1x128xf32>
    %c0_218 = arith.constant 0 : index
    %c0_219 = arith.constant 0 : index
    %197 = vector.load %arg9[%c0_218, %c0_219] : memref<1x128xf32, #tpu.memory_space<vmem>>, vector<1x128xf32>
    %198 = arith.addf %196, %197 : vector<1x128xf32>
    %cst_220 = arith.constant 0.000000e+00 : f32
    %199 = vector.broadcast %cst_220 : f32 to vector<1x128xf32>
    %200 = arith.maximumf %198, %199 : vector<1x128xf32>
    %c0_221 = arith.constant 0 : index
    %c0_222 = arith.constant 0 : index
    %201 = vector.load %arg10[%c0_221, %c0_222] : memref<128x10xf32, #tpu.memory_space<vmem>>, vector<128x10xf32>
    %cst_223 = arith.constant dense<0.000000e+00> : vector<1x10xf32>
    %202 = tpu.matmul %200, %201, %cst_223 {dimension_numbers = #tpu.dot_dimension_numbers<[1], [0], [0], [1], [0, 0, 1, 1], [], []>} : vector<1x128xf32>, vector<128x10xf32>, vector<1x10xf32> -> vector<1x10xf32>
    %c0_224 = arith.constant 0 : index
    %c0_225 = arith.constant 0 : index
    %203 = vector.load %arg11[%c0_224, %c0_225] : memref<1x10xf32, #tpu.memory_space<vmem>>, vector<1x10xf32>
    %204 = arith.addf %202, %203 : vector<1x10xf32>
    %c0_226 = arith.constant 0 : index
    %c0_227 = arith.constant 0 : index
    %c0_228 = arith.constant 0 : index
    %205 = vector.load %arg12[%c0_226, %c0_227, %c0_228] : memref<1x1x10xf32, #tpu.memory_space<vmem>>, vector<1x1x10xf32>
    %206 = vector.shape_cast %205 : vector<1x1x10xf32> to vector<1x10xf32>
    %207 = vector.shape_cast %204 : vector<1x10xf32> to vector<1x1x10xf32>
    tpu.vector_store %arg12[%c0_226, %c0_227, %c0_228], %207 {strides = array<i32>} : memref<1x1x10xf32, #tpu.memory_space<vmem>>, vector<1x1x10xf32>,
    return
  }
  func.func @transform_0(%arg0: i32) -> (i32, i32, i32) {
    %c0_i32 = arith.constant 0 : i32
    %c0_i32_0 = arith.constant 0 : i32
    %c0_i32_1 = arith.constant 0 : i32
    return %arg0, %c0_i32, %c0_i32_0 : i32, i32, i32
  }
  func.func @transform_1(%arg0: i32) -> (i32, i32) {
    %c0_i32 = arith.constant 0 : i32
    %c0_i32_0 = arith.constant 0 : i32
    %c0_i32_1 = arith.constant 0 : i32
    return %c0_i32, %c0_i32_0 : i32, i32
  }
  func.func @transform_2(%arg0: i32) -> (i32, i32) {
    %c0_i32 = arith.constant 0 : i32
    %c0_i32_0 = arith.constant 0 : i32
    %c0_i32_1 = arith.constant 0 : i32
    return %c0_i32, %c0_i32_0 : i32, i32
  }
  func.func @transform_3(%arg0: i32) -> (i32, i32) {
    %c0_i32 = arith.constant 0 : i32
    %c0_i32_0 = arith.constant 0 : i32
    %c0_i32_1 = arith.constant 0 : i32
    return %c0_i32, %c0_i32_0 : i32, i32
  }
  func.func @transform_4(%arg0: i32) -> (i32, i32) {
    %c0_i32 = arith.constant 0 : i32
    %c0_i32_0 = arith.constant 0 : i32
    %c0_i32_1 = arith.constant 0 : i32
    return %c0_i32, %c0_i32_0 : i32, i32
  }
  func.func @transform_5(%arg0: i32) -> (i32, i32) {
    %c0_i32 = arith.constant 0 : i32
    %c0_i32_0 = arith.constant 0 : i32
    %c0_i32_1 = arith.constant 0 : i32
    return %c0_i32, %c0_i32_0 : i32, i32
  }
  func.func @transform_6(%arg0: i32) -> (i32, i32) {
    %c0_i32 = arith.constant 0 : i32
    %c0_i32_0 = arith.constant 0 : i32
    %c0_i32_1 = arith.constant 0 : i32
    return %c0_i32, %c0_i32_0 : i32, i32
  }
  func.func @transform_7(%arg0: i32) -> (i32, i32) {
    %c0_i32 = arith.constant 0 : i32
    %c0_i32_0 = arith.constant 0 : i32
    %c0_i32_1 = arith.constant 0 : i32
    return %c0_i32, %c0_i32_0 : i32, i32
  }
  func.func @transform_8(%arg0: i32) -> (i32, i32) {
    %c0_i32 = arith.constant 0 : i32
    %c0_i32_0 = arith.constant 0 : i32
    %c0_i32_1 = arith.constant 0 : i32
    return %c0_i32, %c0_i32_0 : i32, i32
  }
  func.func @transform_9(%arg0: i32) -> (i32, i32) {
    %c0_i32 = arith.constant 0 : i32
    %c0_i32_0 = arith.constant 0 : i32
    %c0_i32_1 = arith.constant 0 : i32
    return %c0_i32, %c0_i32_0 : i32, i32
  }
  func.func @transform_10(%arg0: i32) -> (i32, i32) {
    %c0_i32 = arith.constant 0 : i32
    %c0_i32_0 = arith.constant 0 : i32
    %c0_i32_1 = arith.constant 0 : i32
    return %c0_i32, %c0_i32_0 : i32, i32
  }
  func.func @transform_11(%arg0: i32) -> (i32, i32, i32) {
    %c0_i32 = arith.constant 0 : i32
    %c0_i32_0 = arith.constant 0 : i32
    %c0_i32_1 = arith.constant 0 : i32
    return %arg0, %c0_i32, %c0_i32_0 : i32, i32, i32
  }
}

</mosaic_0001>

<bundles_post_ra>
// kernel: net_forward.1
= control target key start
LH: loop header
LB: loop body
LE: loop exit
PB: predicated region body
PF: predicated region fallthrough
CT: control target
= control target key end

     0   :  { %s12589_s0 = inlined_call_operand.vmem [shape: f32[2,576,27], index: 0, kind: input, shape index: {}]   ;;  %s12590_s1 = inlined_call_operand.vmem [shape: f32[27,32], index: 1, kind: input, shape index: {}]   ;;  %s12591_s2 = inlined_call_operand.vmem [shape: f32[1,32], index: 2, kind: input, shape index: {}]   ;;  %s12592_s3 = inlined_call_operand.vmem [shape: f32[288,64], index: 3, kind: input, shape index: {}]   ;;  %s12593_s4 = inlined_call_operand.vmem [shape: f32[1,64], index: 4, kind: input, shape index: {}]   ;;  %s12594_s5 = inlined_call_operand.vmem [shape: f32[576,64], index: 5, kind: input, shape index: {}]   ;;  %s12595_s6 = inlined_call_operand.vmem [shape: f32[1,64], index: 6, kind: input, shape index: {}]   ;;  %s12596_s7 = inlined_call_operand.vmem [shape: f32[576,128], index: 7, kind: input, shape index: {}]   ;;  %s12597_s8 = inlined_call_operand.vmem [shape: f32[1,128], index: 8, kind: input, shape index: {}]   ;;  %s12598_s9 = inlined_call_operand.vmem [shape: f32[128,10], index: 9, kind: input, shape index: {}]   ;;  %s12599_s10 = inlined_call_operand.vmem [shape: f32[1,10], index: 10, kind: input, shape index: {}]   ;;  %s12600_s11 = inlined_call_operand.hbm [shape: f32[2,1,10], index: 11, kind: output, shape index: {}]  }
   0x1   :  { %12628 = sst [smem:[#allocation37_spill]] %s12589_s0 }
   0x2   :  { %16 = vsyncpa [#allocation9], 0 }
   0x3   :  { %18 = vsyncpa [#allocation9 + $0x1], 0  ;;  %s10308_s17 = smov 0   ;;  %s10310_s18 = smov 0  }
   0x4   :  { %s10312_s19 = smov 0   ;;  %s10314_s20 = smov 0  }
   0x5 LB: > { %s10329_s21 = sadd.s32 4294967295, %s10241_s20   ;;  %s7437_s22 = sadd.s32 4294967294, %s10241_s20   ;;  %s10241_s20 = sphi %s10314_s20, %s12699_s20   ;;  %s10237_s19 = sphi %s10312_s19, %s12698_s19   ;;  %s10233_s18 = sphi %s10310_s18, %s12697_s18   ;;  %s10229_s17 = sphi %s10308_s17, %s12696_s17  }
   0x6   : > { %s10333_s23 = sadd.s32 1, %s10241_s20   ;;  %s267_s24 = sadd.s32 1, %s10237_s19 }
   0x7   : > { %s264_s25 = ssub.s32 %s10241_s20, %s10333_s23  ;;  %p277_p0 = scmp.ne.s32.totalorder %s10237_s19, %s10233_s18 }
   0x8   : > { %p265_p1 = scmp.eq.s32.totalorder %s264_s25, 0  ;;  %p278_p2 = scmp.eq.s32.totalorder %s10329_s21, 1 }
   0x9   : > { %p283_p3 = scmp.ne.s32.totalorder %s10233_s18, %s10229_s17  ;;  %p284_p4 = scmp.eq.s32.totalorder %s7437_s22, 1 }
   0xa   : > { %s10344_s26 = scalar_select %p265_p1, %s10237_s19, %s267_s24  }
   0xb   : > { %p10346_p5 = por %p278_p2, %p277_p0  ;;  %p10350_p6 = por %p284_p4, %p283_p3 }
   0xc   : > { %p7440_p7 = scmp.ge.s32.totalorder %s10241_s20, 1  ;;  %p340_p8 = scmp.lt.s32.totalorder %s10241_s20, 3 }
   0xe   : > { %p341_p9 = pnand %p7440_p7, %p340_p8 }
  0x10   : > { %344 = sbr.rel (%p341_p9) target bundleno = 2058 (0x80a), region = 64 }
  0x17   : > { %v504_v0 = vld [vmem:[%s12590_s1] sm:$0xff]  ;;  %v505_v1 = vld [vmem:[%s12590_s1 + $0x8] sm:$0xff]  ;;  %v506_v2 = vld [vmem:[%s12590_s1 + $0x10] sm:$0xff]  ;;  %vm732_vm0 = vcmask 1042432   ;;  %p379_p10 = scmp.lt.s32.totalorder %s10329_s21, 1  ;;  %vm10243_vm1 = vmmov 1  }
  0x18   : > { %v9484_v3 = vpack.c.bf16 %v505_v1, %v504_v0  ;;  %v507_v4 = vld [vmem:[%s12590_s1 + $0x18] sm:$0x7]  ;;  %vm9489_vm2 = vmpackc.low %vm732_vm0, %vm10243_vm1  ;;  %vm515_vm3 = vcmask 220160   ;;  %s12631_s0 = sld [smem:[#allocation37_spill]]  ;;  %v1806_v0 = vld [vmem:[%s12592_s3 + $0x20] sm:$0xff]  ;;  %vm384_vm4 = vcmask 261120  }
  0x19   : > { %v9488_v5 = vpack.c.bf16 %v507_v4, %v506_v2  ;;  %s380_s24 = scalar_select %p379_p10, %s10329_s21, 1  ;;  %v1807_v1 = vld [vmem:[%s12592_s3 + $0x28] sm:$0xff]  ;;  %v12601_v4 = vmov 0.0   ;;  %vm1678_vm5 = vcmask 257024   ;;  %vm419_vm6 = vcmask 523264  }
  0x1a   : > { %9485 = vmatprep.subr.bf16.mxu0 %v9484_v3  ;;  %386 = vst.msk [vmem:[#allocation3 + $0x8] sm:$0xff] %vm384_vm4, %v12601_v4  ;;  %385 = vst.msk [vmem:[#allocation3] sm:$0xff] %vm384_vm4, %v12601_v4  ;;  %vm5070_vm7 = vcmask 521216   ;;  %vm10246_vm8 = vmmov 0   ;;  %vm6524_vm9 = vcmask 518144   ;;  %s377_s15 = sand.u32 1, %s10233_s18  }
  0x1b   : > { %9487 = vmatpush3.bf16.msra.mxu0 %v9484_v3  ;;  %s10134_s25 = smul.u32 576, %s380_s24  ;;  %v9494_v3 = vpack.c.bf16 %v1807_v1, %v1806_v0  ;;  %387 = vst.msk [vmem:[#allocation3 + $0x10] sm:$0xff] %vm384_vm4, %v12601_v4  ;;  %388 = vst.msk [vmem:[#allocation3 + $0x18] sm:$0xff] %vm384_vm4, %v12601_v4  ;;  %s7851_s24 = sshll.u32 %s10329_s21, 4  ;;  %vm7367_vm10 = vcmask 73728  }
  0x1c   : > { %9490 = vmatprep.subr.msk.bf16.mxu0 %vm9489_vm2, %v9488_v5  ;;  %389 = vst.msk [vmem:[#allocation3 + $0x20] sm:$0xff] %vm384_vm4, %v12601_v4  ;;  %390 = vst.msk [vmem:[#allocation3 + $0x28] sm:$0xff] %vm384_vm4, %v12601_v4  ;;  %s7370_s14 = scalar_lea.sflag [#allocation9], %s377_s15  ;;  %s10247_s21 = smov [#allocation8]  }
  0x1d   : > { %391 = vst.msk [vmem:[#allocation3 + $0x30] sm:$0xff] %vm384_vm4, %v12601_v4  ;;  %392 = vst.msk [vmem:[#allocation3 + $0x38] sm:$0xff] %vm384_vm4, %v12601_v4  ;;  %9842 = vmatprep.subr.bf16.mxu1 %v9494_v3  ;;  %s10183_s22 = sshll.u32 %s10247_s21, 4  ;;  %s10184_s22 = int_to_ptr.vmem [resolvable:$false] %s10183_s22 }
  0x1e   : > { %s10373_s12 = scalar_lea.vmem %s12631_s0, %s10134_s25  ;;  %393 = vst.msk [vmem:[#allocation3 + $0x40] sm:$0xff] %vm384_vm4, %v12601_v4  ;;  %394 = vst.msk [vmem:[#allocation3 + $0x48] sm:$0xff] %vm384_vm4, %v12601_v4  ;;  %9844 = vmatpush3.bf16.msra.mxu1 %v9494_v3  ;;  %s378_s25 = scalar_lea.vmem [#allocation8], %s377_s15 }
  0x1f   : > { %v432_v6 = vld [vmem:[%s10373_s12] sm:$0xff]  ;;  %9493 = vmatpush3.bf16.msk.msra.mxu0 %vm9489_vm2, %v9488_v5  ;;  %v433_v7 = vld [vmem:[%s10373_s12 + $0x8] sm:$0xff]  ;;  %v434_v8 = vld [vmem:[%s10373_s12 + $0x10] sm:$0xff]  ;;  %395 = vst.msk [vmem:[#allocation3 + $0x50] sm:$0xff] %vm384_vm4, %v12601_v4  ;;  %s7382_s29 = sshll.u32 %s378_s25, 4  ;;  %s10185_s0 = scalar_lea.vmem %s10184_s22, 32  ;;  %s12549_s29 = int_to_ptr.vmem [resolvable:$true] %s7382_s29 }
  0x20   : > { %8468 = vmatprep.mubr.msk.f32.mxu0 %vm515_vm3, %v432_v6  ;;  %v435_v9 = vld [vmem:[%s10373_s12 + $0x18] sm:$0xff]  ;;  %v436_v10 = vld [vmem:[%s10373_s12 + $0x20] sm:$0xff]  ;;  %v437_v11 = vld [vmem:[%s10373_s12 + $0x28] sm:$0xff]  ;;  %396 = vst.msk [vmem:[#allocation3 + $0x58] sm:$0xff] %vm384_vm4, %v12601_v4  ;;  %9495 = vmatprep.subr.bf16.mxu0 %v9494_v3  ;;  %s10179_s16 = scalar_lea.vmem %s12549_s29, 16  ;;  %p10186_p0 = scmp.lt.s32.totalorder %s12549_s29, %s10184_s22 }
  0x21   : > { %v438_v12 = vld [vmem:[%s10373_s12 + $0x30] sm:$0xff]  ;;  %v439_v13 = vld [vmem:[%s10373_s12 + $0x38] sm:$0xff]  ;;  %v440_v14 = vld [vmem:[%s10373_s12 + $0x40] sm:$0xff]  ;;  %397 = vst.msk [vmem:[#allocation3 + $0x60] sm:$0xff] %vm384_vm4, %v12601_v4  ;;  %p10180_p11 = scmp.ne.s32.totalorder %s12549_s29, %s10179_s16  ;;  %p10187_p1 = scmp.lt.s32.totalorder %s10185_s0, %s10179_s16 }
  0x22   : > { %8469 = vmatmul.mubr.msk.f32.vlgmr.msra.gmra.mrb[0].mxu0 %vm515_vm3, %v433_v7  ;;  %v441_v15 = vld [vmem:[%s10373_s12 + $0x48] sm:$0xff]  ;;  %v442_v16 = vld [vmem:[%s10373_s12 + $0x50] sm:$0xff]  ;;  %v443_v17 = vld [vmem:[%s10373_s12 + $0x58] sm:$0xff]  ;;  %398 = vst.msk [vmem:[#allocation3 + $0x68] sm:$0xff] %vm384_vm4, %v12601_v4 }
  0x23   : > { %8471 = vmatprep.mubr.msk.f32.mxu0 %vm515_vm3, %v434_v8  ;;  %v444_v18 = vld [vmem:[%s10373_s12 + $0x60] sm:$0xff]  ;;  %v445_v19 = vld [vmem:[%s10373_s12 + $0x68] sm:$0xff]  ;;  %v446_v20 = vld [vmem:[%s10373_s12 + $0x70] sm:$0xff]  ;;  %399 = vst.msk [vmem:[#allocation3 + $0x70] sm:$0xff] %vm384_vm4, %v12601_v4  ;;  %9497 = vmatpush3.bf16.msra.mxu0 %v9494_v3  ;;  %p10181_p12 = pnand %p10180_p11, %p10346_p5  ;;  %p10188_p2 = por %p10187_p1, %p10186_p0 }
  0x24   : > { %v447_v21 = vld [vmem:[%s10373_s12 + $0x78] sm:$0xff]  ;;  %v448_v22 = vld [vmem:[%s10373_s12 + $0x80] sm:$0xff]  ;;  %v449_v23 = vld [vmem:[%s10373_s12 + $0x88] sm:$0xff]  ;;  %400 = vst.msk [vmem:[#allocation3 + $0x78] sm:$0xff] %vm384_vm4, %v12601_v4 }
  0x25   : > { %v450_v24 = vld [vmem:[%s10373_s12 + $0x90] sm:$0xff]  ;;  %v451_v25 = vld [vmem:[%s10373_s12 + $0x98] sm:$0xff]  ;;  %v452_v26 = vld [vmem:[%s10373_s12 + $0xa0] sm:$0xff]  ;;  %401 = vst.msk [vmem:[#allocation3 + $0x80] sm:$0xff] %vm384_vm4, %v12601_v4  ;;  %p10182_p13 = pneg %p10181_p12 }
  0x26   : > { %8472 = vmatmul.mubr.msk.f32.gmra.mrb[2].mxu0 %vm515_vm3, %v435_v9  ;;  %v453_v27 = vld [vmem:[%s10373_s12 + $0xa8] sm:$0xff]  ;;  %v454_v28 = vld [vmem:[%s10373_s12 + $0xb0] sm:$0xff]  ;;  %v455_v29 = vld [vmem:[%s10373_s12 + $0xb8] sm:$0xff]  ;;  %402 = vst.msk [vmem:[#allocation3 + $0x88] sm:$0xff] %vm384_vm4, %v12601_v4 }
  0x27   : > { %8474 = vmatprep.mubr.msk.f32.mxu0 %vm515_vm3, %v436_v10  ;;  %v456_v30 = vld [vmem:[%s10373_s12 + $0xc0] sm:$0xff]  ;;  %v457_v31 = vld [vmem:[%s10373_s12 + $0xc8] sm:$0xff]  ;;  %v458_v32 = vld [vmem:[%s10373_s12 + $0xd0] sm:$0xff]  ;;  %403 = vst.msk [vmem:[#allocation3 + $0x90] sm:$0xff] %vm384_vm4, %v12601_v4  ;;  %p10189_p3 = pnand %p10188_p2, %p10182_p13 }
  0x28   : > { %v459_v33 = vld [vmem:[%s10373_s12 + $0xd8] sm:$0xff]  ;;  %v460_v34 = vld [vmem:[%s10373_s12 + $0xe0] sm:$0xff]  ;;  %v461_v35 = vld [vmem:[%s10373_s12 + $0xe8] sm:$0xff]  ;;  %404 = vst.msk [vmem:[#allocation3 + $0x98] sm:$0xff] %vm384_vm4, %v12601_v4 }
  0x29   : > { %v462_v36 = vld [vmem:[%s10373_s12 + $0xf0] sm:$0xff]  ;;  %v463_v37 = vld [vmem:[%s10373_s12 + $0xf8] sm:$0xff]  ;;  %v464_v38 = vld [vmem:[%s10373_s12 + $0x100] sm:$0xff]  ;;  %405 = vst.msk [vmem:[#allocation3 + $0xa0] sm:$0xff] %vm384_vm4, %v12601_v4 }
  0x2a   : > { %8475 = vmatmul.mubr.msk.f32.gmra.mrb[4].mxu0 %vm515_vm3, %v437_v11  ;;  %v465_v39 = vld [vmem:[%s10373_s12 + $0x108] sm:$0xff]  ;;  %v466_v40 = vld [vmem:[%s10373_s12 + $0x110] sm:$0xff]  ;;  %v467_v41 = vld [vmem:[%s10373_s12 + $0x118] sm:$0xff]  ;;  %406 = vst.msk [vmem:[#allocation3 + $0xa8] sm:$0xff] %vm384_vm4, %v12601_v4 }
  0x2b   : > { %8477 = vmatprep.mubr.msk.f32.mxu0 %vm515_vm3, %v438_v12  ;;  %v468_v42 = vld [vmem:[%s10373_s12 + $0x120] sm:$0xff]  ;;  %v469_v43 = vld [vmem:[%s10373_s12 + $0x128] sm:$0xff]  ;;  %v470_v44 = vld [vmem:[%s10373_s12 + $0x130] sm:$0xff]  ;;  %407 = vst.msk [vmem:[#allocation3 + $0xb0] sm:$0xff] %vm384_vm4, %v12601_v4 }
  0x2c   : > { %v471_v45 = vld [vmem:[%s10373_s12 + $0x138] sm:$0xff]  ;;  %v472_v46 = vld [vmem:[%s10373_s12 + $0x140] sm:$0xff]  ;;  %v473_v47 = vld [vmem:[%s10373_s12 + $0x148] sm:$0xff]  ;;  %408 = vst.msk [vmem:[#allocation3 + $0xb8] sm:$0xff] %vm384_vm4, %v12601_v4 }
  0x2d   : > { %v474_v48 = vld [vmem:[%s10373_s12 + $0x150] sm:$0xff]  ;;  %v475_v49 = vld [vmem:[%s10373_s12 + $0x158] sm:$0xff]  ;;  %v476_v50 = vld [vmem:[%s10373_s12 + $0x160] sm:$0xff]  ;;  %409 = vst.msk [vmem:[#allocation3 + $0xc0] sm:$0xff] %vm384_vm4, %v12601_v4 }
  0x2e   : > { %8478 = vmatmul.mubr.msk.f32.gmra.mrb[6].mxu0 %vm515_vm3, %v439_v13  ;;  %v477_v51 = vld [vmem:[%s10373_s12 + $0x168] sm:$0xff]  ;;  %v478_v52 = vld [vmem:[%s10373_s12 + $0x170] sm:$0xff]  ;;  %v479_v53 = vld [vmem:[%s10373_s12 + $0x178] sm:$0xff]  ;;  %410 = vst.msk [vmem:[#allocation3 + $0xc8] sm:$0xff] %vm384_vm4, %v12601_v4 }
  0x2f   : > { %8480 = vmatprep.mubr.msk.f32.mxu0 %vm515_vm3, %v440_v14  ;;  %v480_v54 = vld [vmem:[%s10373_s12 + $0x180] sm:$0xff]  ;;  %v481_v55 = vld [vmem:[%s10373_s12 + $0x188] sm:$0xff]  ;;  %v482_v56 = vld [vmem:[%s10373_s12 + $0x190] sm:$0xff]  ;;  %411 = vst.msk [vmem:[#allocation3 + $0xd0] sm:$0xff] %vm384_vm4, %v12601_v4 }
  0x30   : > { %v483_v57 = vld [vmem:[%s10373_s12 + $0x198] sm:$0xff]  ;;  %v484_v58 = vld [vmem:[%s10373_s12 + $0x1a0] sm:$0xff]  ;;  %v485_v59 = vld [vmem:[%s10373_s12 + $0x1a8] sm:$0xff]  ;;  %412 = vst.msk [vmem:[#allocation3 + $0xd8] sm:$0xff] %vm384_vm4, %v12601_v4 }
  0x31   : > { %v486_v60 = vld [vmem:[%s10373_s12 + $0x1b0] sm:$0xff]  ;;  %v487_v61 = vld [vmem:[%s10373_s12 + $0x1b8] sm:$0xff]  ;;  %v488_v62 = vld [vmem:[%s10373_s12 + $0x1c0] sm:$0xff]  ;;  %413 = vst.msk [vmem:[#allocation3 + $0xe0] sm:$0xff] %vm384_vm4, %v12601_v4 }
  0x32   : > { %8481 = vmatmul.mubr.msk.f32.gmra.mrb[8].mxu0 %vm515_vm3, %v441_v15  ;;  %v489_v63 = vld [vmem:[%s10373_s12 + $0x1c8] sm:$0xff]  ;;  %v490_v2 = vld [vmem:[%s10373_s12 + $0x1d0] sm:$0xff]  ;;  %414 = vst.msk [vmem:[#allocation3 + $0xe8] sm:$0xff] %vm384_vm4, %v12601_v4  ;;  %415 = vst.msk [vmem:[#allocation3 + $0xf0] sm:$0xff] %vm384_vm4, %v12601_v4 }
  0x33   : > { %8483 = vmatprep.mubr.msk.f32.mxu0 %vm515_vm3, %v442_v16  ;;  %416 = vst.msk [vmem:[#allocation3 + $0xf8] sm:$0xff] %vm384_vm4, %v12601_v4  ;;  %417 = vst.msk [vmem:[#allocation3 + $0x100] sm:$0xff] %vm384_vm4, %v12601_v4  ;;  %v491_v5 = vld [vmem:[%s10373_s12 + $0x1d8] sm:$0xff]  ;;  %v1808_v6 = vld [vmem:[%s12592_s3 + $0x30] sm:$0xff] }
  0x34   : > { %418 = vst.msk [vmem:[#allocation3 + $0x108] sm:$0xff] %vm384_vm4, %v12601_v4  ;;  %v1809_v7 = vld [vmem:[%s12592_s3 + $0x38] sm:$0xff]  ;;  %v492_v8 = vld [vmem:[%s10373_s12 + $0x1e0] sm:$0xff]  ;;  %v493_v10 = vld [vmem:[%s10373_s12 + $0x1e8] sm:$0xff] }
  0x35   : > { %v9498_v9 = vpack.c.bf16 %v1809_v7, %v1808_v6  ;;  %v494_v11 = vld [vmem:[%s10373_s12 + $0x1f0] sm:$0xff]  ;;  %v495_v12 = vld [vmem:[%s10373_s12 + $0x1f8] sm:$0xff]  ;;  %v496_v13 = vld [vmem:[%s10373_s12 + $0x200] sm:$0xff] }
  0x36   : > { %8484 = vmatmul.mubr.msk.f32.gmra.mrb[10].mxu0 %vm515_vm3, %v443_v17  ;;  %v497_v14 = vld [vmem:[%s10373_s12 + $0x208] sm:$0xff]  ;;  %v498_v15 = vld [vmem:[%s10373_s12 + $0x210] sm:$0xff]  ;;  %v499_v16 = vld [vmem:[%s10373_s12 + $0x218] sm:$0xff] }
  0x37   : > { %8486 = vmatprep.mubr.msk.f32.mxu0 %vm515_vm3, %v444_v18  ;;  %9499 = vmatprep.subr.bf16.mxu0 %v9498_v9  ;;  %v500_v17 = vld [vmem:[%s10373_s12 + $0x220] sm:$0xff]  ;;  %v501_v18 = vld [vmem:[%s10373_s12 + $0x228] sm:$0xff] }
  0x38   : > { %9501 = vmatpush3.bf16.msra.mxu0 %v9498_v9  ;;  %9843 = vmatprep.subr.bf16.mxu1 %v9498_v9 }
  0x39   : > { %9845 = vmatpush3.bf16.msra.mxu1 %v9498_v9 }
  0x3a   : > { %8487 = vmatmul.mubr.msk.f32.gmra.mrb[12].mxu0 %vm515_vm3, %v445_v19  ;;  %v502_v19 = vld [vmem:[%s10373_s12 + $0x230] sm:$0xff] }
  0x3b   : > { %8489 = vmatprep.mubr.msk.f32.mxu0 %vm515_vm3, %v446_v20  ;;  %v503_v20 = vld [vmem:[%s10373_s12 + $0x238] sm:$0xff]  ;;  %s12547_s12 = scalar_lea.hbm %s12600_s11, %s7851_s24 }
  0x3e   : > { %8490 = vmatmul.mubr.msk.f32.gmra.mrb[14].mxu0 %vm515_vm3, %v447_v21  ;;  %v1778_v21 = vld [vmem:[#allocation3 + $0x8] sm:$0xff] }
  0x3f   : > { %8492 = vmatprep.mubr.msk.f32.mxu0 %vm515_vm3, %v448_v22  ;;  %v1779_v22 = vld [vmem:[#allocation3 + $0x10] sm:$0xff] }
  0x42   : > { %8493 = vmatmul.mubr.msk.f32.gmra.mrb[16].mxu0 %vm515_vm3, %v449_v23  ;;  %v1780_v23 = vld [vmem:[#allocation3 + $0x18] sm:$0xff] }
  0x43   : > { %8495 = vmatprep.mubr.msk.f32.mxu0 %vm515_vm3, %v450_v24  ;;  %v1781_v24 = vld [vmem:[#allocation3 + $0x20] sm:$0xff] }
  0x46   : > { %8496 = vmatmul.mubr.msk.f32.gmra.mrb[18].mxu0 %vm515_vm3, %v451_v25  ;;  %v10606_v25 = vld [vmem:[%s12591_s2] ss:$0 sm:$0xff] }
  0x47   : > { %8498 = vmatprep.mubr.msk.f32.mxu0 %vm515_vm3, %v452_v26 }
  0x4a   : > { %8499 = vmatmul.mubr.msk.f32.gmra.mrb[20].mxu0 %vm515_vm3, %v453_v27 }
  0x4b   : > { %8501 = vmatprep.mubr.msk.f32.mxu0 %vm515_vm3, %v454_v28 }
  0x4e   : > { %8502 = vmatmul.mubr.msk.f32.gmra.mrb[22].mxu0 %vm515_vm3, %v455_v29 }
  0x4f   : > { %8504 = vmatprep.mubr.msk.f32.mxu0 %vm515_vm3, %v456_v30 }
  0x52   : > { %8505 = vmatmul.mubr.msk.f32.gmra.mrb[24].mxu0 %vm515_vm3, %v457_v31 }
  0x53   : > { %8507 = vmatprep.mubr.msk.f32.mxu0 %vm515_vm3, %v458_v32 }
  0x56   : > { %8508 = vmatmul.mubr.msk.f32.gmra.mrb[26].mxu0 %vm515_vm3, %v459_v33 }
  0x57   : > { %8510 = vmatprep.mubr.msk.f32.mxu0 %vm515_vm3, %v460_v34 }
  0x5a   : > { %8511 = vmatmul.mubr.msk.f32.gmra.mrb[28].mxu0 %vm515_vm3, %v461_v35 }
  0x5b   : > { %8513 = vmatprep.mubr.msk.f32.mxu0 %vm515_vm3, %v462_v36 }
  0x5e   : > { %8514 = vmatmul.mubr.msk.f32.gmra.mrb[30].mxu0 %vm515_vm3, %v463_v37 }
  0x5f   : > { %8516 = vmatprep.mubr.msk.f32.mxu0 %vm515_vm3, %v464_v38 }
  0x62   : > { %8517 = vmatmul.mubr.msk.f32.gmra.mrb[32].mxu0 %vm515_vm3, %v465_v39 }
  0x63   : > { %8519 = vmatprep.mubr.msk.f32.mxu0 %vm515_vm3, %v466_v40 }
  0x66   : > { %8520 = vmatmul.mubr.msk.f32.gmra.mrb[34].mxu0 %vm515_vm3, %v467_v41 }
  0x67   : > { %8522 = vmatprep.mubr.msk.f32.mxu0 %vm515_vm3, %v468_v42 }
  0x6a   : > { %8523 = vmatmul.mubr.msk.f32.gmra.mrb[36].mxu0 %vm515_vm3, %v469_v43 }
  0x6b   : > { %8525 = vmatprep.mubr.msk.f32.mxu0 %vm515_vm3, %v470_v44 }
  0x6e   : > { %8526 = vmatmul.mubr.msk.f32.gmra.mrb[38].mxu0 %vm515_vm3, %v471_v45 }
  0x6f   : > { %8528 = vmatprep.mubr.msk.f32.mxu0 %vm515_vm3, %v472_v46 }
  0x72   : > { %8529 = vmatmul.mubr.msk.f32.gmra.mrb[40].mxu0 %vm515_vm3, %v473_v47 }
  0x73   : > { %8531 = vmatprep.mubr.msk.f32.mxu0 %vm515_vm3, %v474_v48 }
  0x76   : > { %8532 = vmatmul.mubr.msk.f32.gmra.mrb[42].mxu0 %vm515_vm3, %v475_v49 }
  0x77   : > { %8534 = vmatprep.mubr.msk.f32.mxu0 %vm515_vm3, %v476_v50 }
  0x7a   : > { %8535 = vmatmul.mubr.msk.f32.gmra.mrb[44].mxu0 %vm515_vm3, %v477_v51 }
  0x7b   : > { %8537 = vmatprep.mubr.msk.f32.mxu0 %vm515_vm3, %v478_v52 }
  0x7e   : > { %8538 = vmatmul.mubr.msk.f32.gmra.mrb[46].mxu0 %vm515_vm3, %v479_v53 }
  0x7f   : > { %8540 = vmatprep.mubr.msk.f32.mxu0 %vm515_vm3, %v480_v54 }
  0x82   : > { %8541 = vmatmul.mubr.msk.f32.gmra.mrb[48].mxu0 %vm515_vm3, %v481_v55 }
  0x83   : > { %8543 = vmatprep.mubr.msk.f32.mxu0 %vm515_vm3, %v482_v56 }
  0x86   : > { %8544 = vmatmul.mubr.msk.f32.gmra.mrb[50].mxu0 %vm515_vm3, %v483_v57 }
  0x87   : > { %8546 = vmatprep.mubr.msk.f32.mxu0 %vm515_vm3, %v484_v58 }
  0x8a   : > { %8547 = vmatmul.mubr.msk.f32.gmra.mrb[52].mxu0 %vm515_vm3, %v485_v59 }
  0x8b   : > { %8549 = vmatprep.mubr.msk.f32.mxu0 %vm515_vm3, %v486_v60 }
  0x8e   : > { %8550 = vmatmul.mubr.msk.f32.gmra.mrb[54].mxu0 %vm515_vm3, %v487_v61 }
  0x8f   : > { %8552 = vmatprep.mubr.msk.f32.mxu0 %vm515_vm3, %v488_v62 }
  0x92   : > { %8553 = vmatmul.mubr.msk.f32.gmra.mrb[56].mxu0 %vm515_vm3, %v489_v63 }
  0x93   : > { %8555 = vmatprep.mubr.msk.f32.mxu0 %vm515_vm3, %v490_v2 }
  0x96   : > { %8556 = vmatmul.mubr.msk.f32.gmra.mrb[58].mxu0 %vm515_vm3, %v491_v5 }
  0x97   : > { %8558 = vmatprep.mubr.msk.f32.mxu0 %vm515_vm3, %v492_v8 }
  0x9a   : > { %8559 = vmatmul.mubr.msk.f32.gmra.mrb[60].mxu0 %vm515_vm3, %v493_v10 }
  0x9b   : > { %8561 = vmatprep.mubr.msk.f32.mxu0 %vm515_vm3, %v494_v11 }
  0x9e   : > { %8562 = vmatmul.mubr.msk.f32.gmra.mrb[62].mxu0 %vm515_vm3, %v495_v12 }
  0x9f   : > { %8564 = vmatprep.mubr.msk.f32.mxu0 %vm515_vm3, %v496_v13 }
  0xa2   : > { %8565 = vmatmul.mubr.msk.f32.gmra.mrb[64].mxu0 %vm515_vm3, %v497_v14 }
  0xa3   : > { %8567 = vmatprep.mubr.msk.f32.mxu0 %vm515_vm3, %v498_v15 }
  0xa6   : > { %8568 = vmatmul.mubr.msk.f32.gmra.mrb[66].mxu0 %vm515_vm3, %v499_v16 }
  0xa7   : > { %8570 = vmatprep.mubr.msk.f32.mxu0 %vm515_vm3, %v500_v17 }
  0xaa   : > { %8571 = vmatmul.mubr.msk.f32.gmra.mrb[68].mxu0 %vm515_vm3, %v501_v18 }
  0xab   : > { %8573 = vmatprep.mubr.msk.f32.mxu0 %vm515_vm3, %v502_v19 }
  0xae   : > { %8574 = vmatmul.mubr.msk.f32.gmra.mrb[70].mxu0 %vm515_vm3, %v503_v20 }
  0xaf   : > { %8584 = vmatprep.mubr.msk.f32.mxu0 %vm384_vm4, %v1778_v21 }
  0xb2   : > { %8585 = vmatmul.mubr.msk.f32.vlgmr.msra.gmra.mrb[72].mxu0 %vm384_vm4, %v1779_v22 }
  0xb3   : > { %8587 = vmatprep.mubr.msk.f32.mxu0 %vm384_vm4, %v1780_v23 }
  0xb6   : > { %8588 = vmatmul.mubr.msk.f32.gmra.mrb[74].mxu0 %vm384_vm4, %v1781_v24 }
  0xf5   : > { %v8470_v26 = vpop.f32.mrb[0].mxu0 }
  0xf6   : > { %v808_v27 = vadd.f32 %v8470_v26, %v10606_v25  ;;  %v802_v28 = vpop.f32.mrb[1].mxu0 }
  0xf7   : > { %v803_v29 = vadd.f32 %v10606_v25, %v802_v28 }
  0xf8   : > { %v1162_v30 = vmax.f32 %v808_v27, 0.0 }
  0xf9   : > { %v1161_v31 = vmax.f32 %v803_v29, 0.0  ;;  %v8473_v32 = vpop.f32.mrb[2].mxu0 }
  0xfa   : > { %1234 = vst.msk [vmem:[#allocation2 + $0x8] sm:$0xff] %vm384_vm4, %v1162_v30  ;;  %v818_v33 = vadd.f32 %v8473_v32, %v10606_v25  ;;  %v812_v34 = vpop.f32.mrb[3].mxu0 }
  0xfb   : > { %1233 = vst.msk [vmem:[#allocation2] sm:$0xff] %vm384_vm4, %v1161_v31  ;;  %v813_v35 = vadd.f32 %v10606_v25, %v812_v34 }
  0xfc   : > { %v1164_v36 = vmax.f32 %v818_v33, 0.0 }
  0xfd   : > { %v1163_v37 = vmax.f32 %v813_v35, 0.0  ;;  %v8476_v38 = vpop.f32.mrb[4].mxu0 }
  0xfe   : > { %1236 = vst.msk [vmem:[#allocation2 + $0x18] sm:$0xff] %vm384_vm4, %v1164_v36  ;;  %v828_v39 = vadd.f32 %v8476_v38, %v10606_v25  ;;  %v822_v40 = vpop.f32.mrb[5].mxu0 }
  0xff   : > { %1235 = vst.msk [vmem:[#allocation2 + $0x10] sm:$0xff] %vm384_vm4, %v1163_v37  ;;  %v823_v41 = vadd.f32 %v10606_v25, %v822_v40 }
 0x100   : > { %v1166_v42 = vmax.f32 %v828_v39, 0.0 }
 0x101   : > { %v1165_v43 = vmax.f32 %v823_v41, 0.0  ;;  %v8479_v44 = vpop.f32.mrb[6].mxu0  ;;  %v1306_v58 = vld [vmem:[#allocation2 + $0x8] sm:$0xff]  ;;  %v1774_v41 = vld [vmem:[%s12592_s3] sm:$0xff] }
 0x102   : > { %1238 = vst.msk [vmem:[#allocation2 + $0x28] sm:$0xff] %vm384_vm4, %v1166_v42  ;;  %v838_v45 = vadd.f32 %v8479_v44, %v10606_v25  ;;  %v832_v46 = vpop.f32.mrb[7].mxu0  ;;  %v1305_v53 = vld [vmem:[#allocation2] sm:$0xff]  ;;  %v1775_v42 = vld [vmem:[%s12592_s3 + $0x8] sm:$0xff] }
 0x103   : > { %1237 = vst.msk [vmem:[#allocation2 + $0x20] sm:$0xff] %vm384_vm4, %v1165_v43  ;;  %v833_v47 = vadd.f32 %v10606_v25, %v832_v46  ;;  %v1377_v54 = vld [vmem:[#allocation2 + $0x1] sm:$0xff]  ;;  %v10648_v44 = vpack.c.bf16 %v1775_v42, %v1774_v41 }
 0x104   : > { %v1168_v48 = vmax.f32 %v838_v45, 0.0  ;;  %v1449_v62 = vmax.f32 %v1305_v53, %v1377_v54 }
 0x105   : > { %v1167_v49 = vmax.f32 %v833_v47, 0.0  ;;  %v8482_v50 = vpop.f32.mrb[8].mxu0  ;;  %v1308_v59 = vld [vmem:[#allocation2 + $0x18] sm:$0xff]  ;;  %9503 = vmatprep.subr.bf16.mxu1 %v10648_v44 }
 0x106   : > { %1240 = vst.msk [vmem:[#allocation2 + $0x38] sm:$0xff] %vm384_vm4, %v1168_v48  ;;  %v848_v51 = vadd.f32 %v8482_v50, %v10606_v25  ;;  %v842_v52 = vpop.f32.mrb[9].mxu0  ;;  %v1378_v56 = vld [vmem:[#allocation2 + $0x9] sm:$0xff]  ;;  %v1379_v10 = vld [vmem:[#allocation2 + $0x11] sm:$0xff] }
 0x107   : > { %1239 = vst.msk [vmem:[#allocation2 + $0x30] sm:$0xff] %vm384_vm4, %v1167_v49  ;;  %v843_v55 = vadd.f32 %v10606_v25, %v842_v52  ;;  %v1450_v5 = vmax.f32 %v1306_v58, %v1378_v56  ;;  %v1307_v9 = vld [vmem:[#allocation2 + $0x10] sm:$0xff] }
 0x108   : > { %v1170_v57 = vmax.f32 %v848_v51, 0.0  ;;  %v1451_v22 = vmax.f32 %v1307_v9, %v1379_v10 }
 0x109   : > { %v1169_v60 = vmax.f32 %v843_v55, 0.0  ;;  %v8485_v61 = vpop.f32.mrb[10].mxu0  ;;  %v1310_v12 = vld [vmem:[#allocation2 + $0x28] sm:$0xff] }
 0x10a   : > { %v1309_v63 = vld [vmem:[#allocation2 + $0x20] sm:$0xff]  ;;  %1242 = vst.msk [vmem:[#allocation2 + $0x48] sm:$0xff] %vm384_vm4, %v1170_v57  ;;  %v858_v2 = vadd.f32 %v8485_v61, %v10606_v25  ;;  %v852_v3 = vpop.f32.mrb[11].mxu0 }
 0x10b   : > { %v1380_v0 = vld [vmem:[#allocation2 + $0x19] sm:$0xff]  ;;  %v1381_v1 = vld [vmem:[#allocation2 + $0x21] sm:$0xff]  ;;  %1241 = vst.msk [vmem:[#allocation2 + $0x40] sm:$0xff] %vm384_vm4, %v1169_v60  ;;  %v853_v8 = vadd.f32 %v10606_v25, %v852_v3 }
 0x10c   : > { %v1452_v6 = vmax.f32 %v1308_v59, %v1380_v0  ;;  %v1453_v7 = vmax.f32 %v1309_v63, %v1381_v1  ;;  %v1172_v11 = vmax.f32 %v858_v2, 0.0 }
 0x10d   : > { %v1171_v15 = vmax.f32 %v853_v8, 0.0  ;;  %v8488_v16 = vpop.f32.mrb[12].mxu0  ;;  %v1312_v28 = vld [vmem:[#allocation2 + $0x38] sm:$0xff] }
 0x10e   : > { %v1530_v13 = vmax.f32 %v1449_v62, %v1452_v6  ;;  %v1531_v14 = vmax.f32 %v1450_v5, %v1453_v7  ;;  %v1311_v17 = vld [vmem:[#allocation2 + $0x30] sm:$0xff]  ;;  %1244 = vst.msk [vmem:[#allocation2 + $0x58] sm:$0xff] %vm384_vm4, %v1172_v11  ;;  %v868_v20 = vadd.f32 %v8488_v16, %v10606_v25  ;;  %v862_v21 = vpop.f32.mrb[13].mxu0 }
 0x10f   : > { %v1382_v18 = vld [vmem:[#allocation2 + $0x29] sm:$0xff]  ;;  %v1383_v19 = vld [vmem:[#allocation2 + $0x31] sm:$0xff]  ;;  %1243 = vst.msk [vmem:[#allocation2 + $0x50] sm:$0xff] %vm384_vm4, %v1171_v15  ;;  %v863_v26 = vadd.f32 %v10606_v25, %v862_v21 }
 0x110   : > { %1602 = vst.msk [vmem:[#allocation2] sm:$0xff] %vm384_vm4, %v1530_v13  ;;  %1603 = vst.msk [vmem:[#allocation2 + $0x8] sm:$0xff] %vm384_vm4, %v1531_v14  ;;  %v1454_v23 = vmax.f32 %v1310_v12, %v1382_v18  ;;  %v1455_v24 = vmax.f32 %v1311_v17, %v1383_v19  ;;  %v1174_v27 = vmax.f32 %v868_v20, 0.0 }
 0x111   : > { %v1173_v31 = vmax.f32 %v863_v26, 0.0  ;;  %v8491_v32 = vpop.f32.mrb[14].mxu0  ;;  %v1314_v45 = vld [vmem:[#allocation2 + $0x48] sm:$0xff] }
 0x112   : > { %v1532_v29 = vmax.f32 %v1451_v22, %v1454_v23  ;;  %v1533_v30 = vmax.f32 %v1452_v6, %v1455_v24  ;;  %v1313_v33 = vld [vmem:[#allocation2 + $0x40] sm:$0xff]  ;;  %1246 = vst.msk [vmem:[#allocation2 + $0x68] sm:$0xff] %vm384_vm4, %v1174_v27  ;;  %v878_v36 = vadd.f32 %v8491_v32, %v10606_v25  ;;  %v872_v37 = vpop.f32.mrb[15].mxu0 }
 0x113   : > { %v1384_v34 = vld [vmem:[#allocation2 + $0x39] sm:$0xff]  ;;  %v1385_v35 = vld [vmem:[#allocation2 + $0x41] sm:$0xff]  ;;  %1245 = vst.msk [vmem:[#allocation2 + $0x60] sm:$0xff] %vm384_vm4, %v1173_v31  ;;  %v873_v40 = vadd.f32 %v10606_v25, %v872_v37 }
 0x114   : > { %1604 = vst.msk [vmem:[#allocation2 + $0x10] sm:$0xff] %vm384_vm4, %v1532_v29  ;;  %1605 = vst.msk [vmem:[#allocation2 + $0x18] sm:$0xff] %vm384_vm4, %v1533_v30  ;;  %v1456_v38 = vmax.f32 %v1312_v28, %v1384_v34  ;;  %v1457_v39 = vmax.f32 %v1313_v33, %v1385_v35  ;;  %v1176_v43 = vmax.f32 %v878_v36, 0.0 }
 0x115   : > { %v1175_v48 = vmax.f32 %v873_v40, 0.0  ;;  %v8494_v49 = vpop.f32.mrb[16].mxu0  ;;  %v1316_v60 = vld [vmem:[#allocation2 + $0x58] sm:$0xff] }
 0x116   : > { %v1534_v46 = vmax.f32 %v1453_v7, %v1456_v38  ;;  %v1535_v47 = vmax.f32 %v1454_v23, %v1457_v39  ;;  %v1315_v50 = vld [vmem:[#allocation2 + $0x50] sm:$0xff]  ;;  %1248 = vst.msk [vmem:[#allocation2 + $0x78] sm:$0xff] %vm384_vm4, %v1176_v43  ;;  %v888_v53 = vadd.f32 %v8494_v49, %v10606_v25  ;;  %v882_v54 = vpop.f32.mrb[17].mxu0 }
 0x117   : > { %v1386_v51 = vld [vmem:[#allocation2 + $0x49] sm:$0xff]  ;;  %v1387_v52 = vld [vmem:[#allocation2 + $0x51] sm:$0xff]  ;;  %1247 = vst.msk [vmem:[#allocation2 + $0x70] sm:$0xff] %vm384_vm4, %v1175_v48  ;;  %v883_v57 = vadd.f32 %v10606_v25, %v882_v54 }
 0x118   : > { %1606 = vst.msk [vmem:[#allocation2 + $0x20] sm:$0xff] %vm384_vm4, %v1534_v46  ;;  %1607 = vst.msk [vmem:[#allocation2 + $0x28] sm:$0xff] %vm384_vm4, %v1535_v47  ;;  %v1458_v55 = vmax.f32 %v1314_v45, %v1386_v51  ;;  %v1459_v56 = vmax.f32 %v1315_v50, %v1387_v52  ;;  %v1674_v58 = vld [vmem:[#allocation2] ss:$2 sm:$0xff]  ;;  %v1178_v59 = vmax.f32 %v888_v53, 0.0 }
 0x119   : > { %1677 = vst.msk [vmem:[#allocation3 + $0x29] sm:$0xff] %vm384_vm4, %v1674_v58  ;;  %v1177_v63 = vmax.f32 %v883_v57, 0.0  ;;  %v8497_v0 = vpop.f32.mrb[18].mxu0  ;;  %v1318_v12 = vld [vmem:[#allocation2 + $0x68] sm:$0xff] }
 0x11a   : > { %v1536_v61 = vmax.f32 %v1455_v24, %v1458_v55  ;;  %v1537_v62 = vmax.f32 %v1456_v38, %v1459_v56  ;;  %v1317_v1 = vld [vmem:[#allocation2 + $0x60] sm:$0xff]  ;;  %1250 = vst.msk [vmem:[#allocation2 + $0x88] sm:$0xff] %vm384_vm4, %v1178_v59  ;;  %v898_v5 = vadd.f32 %v8497_v0, %v10606_v25  ;;  %v892_v6 = vpop.f32.mrb[19].mxu0 }
 0x11b   : > { %v1388_v2 = vld [vmem:[#allocation2 + $0x59] sm:$0xff]  ;;  %v1389_v3 = vld [vmem:[#allocation2 + $0x61] sm:$0xff]  ;;  %1249 = vst.msk [vmem:[#allocation2 + $0x80] sm:$0xff] %vm384_vm4, %v1177_v63  ;;  %v893_v9 = vadd.f32 %v10606_v25, %v892_v6  ;;  %v1676_v10 = vld [vmem:[#allocation2 + $0x10] ss:$2 sm:$0xf] }
 0x11c   : > { %1608 = vst.msk [vmem:[#allocation2 + $0x30] sm:$0xff] %vm384_vm4, %v1536_v61  ;;  %1609 = vst.msk [vmem:[#allocation2 + $0x38] sm:$0xff] %vm384_vm4, %v1537_v62  ;;  %v1460_v7 = vmax.f32 %v1316_v60, %v1388_v2  ;;  %v1461_v8 = vmax.f32 %v1317_v1, %v1389_v3  ;;  %v1180_v11 = vmax.f32 %v898_v5, 0.0 }
 0x11d   : > { %1679 = vst.msk [vmem:[#allocation3 + $0x31] sm:$0xf] %vm1678_vm5, %v1676_v10  ;;  %v1179_v15 = vmax.f32 %v893_v9, 0.0  ;;  %v8500_v16 = vpop.f32.mrb[20].mxu0  ;;  %v1320_v28 = vld [vmem:[#allocation2 + $0x78] sm:$0xff] }
 0x11e   : > { %v1538_v13 = vmax.f32 %v1457_v39, %v1460_v7  ;;  %v1539_v14 = vmax.f32 %v1458_v55, %v1461_v8  ;;  %v1319_v17 = vld [vmem:[#allocation2 + $0x70] sm:$0xff]  ;;  %1252 = vst.msk [vmem:[#allocation2 + $0x98] sm:$0xff] %vm384_vm4, %v1180_v11  ;;  %v908_v20 = vadd.f32 %v8500_v16, %v10606_v25  ;;  %v902_v21 = vpop.f32.mrb[21].mxu0 }
 0x11f   : > { %v1390_v18 = vld [vmem:[#allocation2 + $0x69] sm:$0xff]  ;;  %v1391_v19 = vld [vmem:[#allocation2 + $0x71] sm:$0xff]  ;;  %1251 = vst.msk [vmem:[#allocation2 + $0x90] sm:$0xff] %vm384_vm4, %v1179_v15  ;;  %v903_v24 = vadd.f32 %v10606_v25, %v902_v21 }
 0x120   : > { %1610 = vst.msk [vmem:[#allocation2 + $0x40] sm:$0xff] %vm384_vm4, %v1538_v13  ;;  %1611 = vst.msk [vmem:[#allocation2 + $0x48] sm:$0xff] %vm384_vm4, %v1539_v14  ;;  %v1462_v22 = vmax.f32 %v1318_v12, %v1390_v18  ;;  %v1463_v23 = vmax.f32 %v1319_v17, %v1391_v19  ;;  %v1782_v26 = vld [vmem:[#allocation3 + $0x28] sm:$0xff]  ;;  %v1182_v27 = vmax.f32 %v908_v20, 0.0 }
 0x121   : > { %8590 = vmatprep.mubr.msk.f32.mxu0 %vm384_vm4, %v1782_v26  ;;  %v1181_v31 = vmax.f32 %v903_v24, 0.0  ;;  %v8503_v32 = vpop.f32.mrb[22].mxu0  ;;  %v1322_v45 = vld [vmem:[#allocation2 + $0x88] sm:$0xff] }
 0x122   : > { %v1540_v29 = vmax.f32 %v1459_v56, %v1462_v22  ;;  %v1541_v30 = vmax.f32 %v1460_v7, %v1463_v23  ;;  %v1321_v33 = vld [vmem:[#allocation2 + $0x80] sm:$0xff]  ;;  %1254 = vst.msk [vmem:[#allocation2 + $0xa8] sm:$0xff] %vm384_vm4, %v1182_v27  ;;  %v918_v36 = vadd.f32 %v8503_v32, %v10606_v25  ;;  %v912_v37 = vpop.f32.mrb[23].mxu0 }
 0x123   : > { %v1392_v34 = vld [vmem:[#allocation2 + $0x79] sm:$0xff]  ;;  %v1393_v35 = vld [vmem:[#allocation2 + $0x81] sm:$0xff]  ;;  %1253 = vst.msk [vmem:[#allocation2 + $0xa0] sm:$0xff] %vm384_vm4, %v1181_v31  ;;  %v913_v40 = vadd.f32 %v10606_v25, %v912_v37 }
 0x124   : > { %1612 = vst.msk [vmem:[#allocation2 + $0x50] sm:$0xff] %vm384_vm4, %v1540_v29  ;;  %1613 = vst.msk [vmem:[#allocation2 + $0x58] sm:$0xff] %vm384_vm4, %v1541_v30  ;;  %v1464_v38 = vmax.f32 %v1320_v28, %v1392_v34  ;;  %v1465_v39 = vmax.f32 %v1321_v33, %v1393_v35  ;;  %v1783_v41 = vld [vmem:[#allocation3 + $0x30] sm:$0xff]  ;;  %v1184_v43 = vmax.f32 %v918_v36, 0.0 }
 0x125   : > { %v1681_v42 = vld [vmem:[#allocation2 + $0x30] ss:$2 sm:$0xff]  ;;  %8591 = vmatmul.mubr.msk.f32.gmra.mrb[76].mxu0 %vm384_vm4, %v1783_v41  ;;  %v1183_v48 = vmax.f32 %v913_v40, 0.0  ;;  %v8506_v49 = vpop.f32.mrb[24].mxu0 }
 0x126   : > { %1684 = vst.msk [vmem:[#allocation3 + $0x39] sm:$0xff] %vm384_vm4, %v1681_v42  ;;  %v1542_v46 = vmax.f32 %v1461_v8, %v1464_v38  ;;  %v1543_v47 = vmax.f32 %v1462_v22, %v1465_v39  ;;  %v1323_v50 = vld [vmem:[#allocation2 + $0x90] sm:$0xff]  ;;  %1256 = vst.msk [vmem:[#allocation2 + $0xb8] sm:$0xff] %vm384_vm4, %v1184_v43  ;;  %v928_v53 = vadd.f32 %v8506_v49, %v10606_v25  ;;  %v922_v54 = vpop.f32.mrb[25].mxu0  ;;  %v1324_v60 = vld [vmem:[#allocation2 + $0x98] sm:$0xff] }
 0x127   : > { %v1394_v51 = vld [vmem:[#allocation2 + $0x89] sm:$0xff]  ;;  %v1395_v52 = vld [vmem:[#allocation2 + $0x91] sm:$0xff]  ;;  %1255 = vst.msk [vmem:[#allocation2 + $0xb0] sm:$0xff] %vm384_vm4, %v1183_v48  ;;  %v923_v57 = vadd.f32 %v10606_v25, %v922_v54  ;;  %v1683_v58 = vld [vmem:[#allocation2 + $0x40] ss:$2 sm:$0xf] }
 0x128   : > { %1614 = vst.msk [vmem:[#allocation2 + $0x60] sm:$0xff] %vm384_vm4, %v1542_v46  ;;  %1615 = vst.msk [vmem:[#allocation2 + $0x68] sm:$0xff] %vm384_vm4, %v1543_v47  ;;  %v1466_v55 = vmax.f32 %v1322_v45, %v1394_v51  ;;  %v1467_v56 = vmax.f32 %v1323_v50, %v1395_v52  ;;  %v1186_v59 = vmax.f32 %v928_v53, 0.0 }
 0x129   : > { %1685 = vst.msk [vmem:[#allocation3 + $0x41] sm:$0xf] %vm1678_vm5, %v1683_v58  ;;  %v1185_v63 = vmax.f32 %v923_v57, 0.0  ;;  %v8509_v0 = vpop.f32.mrb[26].mxu0  ;;  %v1326_v12 = vld [vmem:[#allocation2 + $0xa8] sm:$0xff] }
 0x12a   : > { %v1544_v61 = vmax.f32 %v1463_v23, %v1466_v55  ;;  %v1545_v62 = vmax.f32 %v1464_v38, %v1467_v56  ;;  %v1325_v1 = vld [vmem:[#allocation2 + $0xa0] sm:$0xff]  ;;  %1258 = vst.msk [vmem:[#allocation2 + $0xc8] sm:$0xff] %vm384_vm4, %v1186_v59  ;;  %v938_v5 = vadd.f32 %v8509_v0, %v10606_v25  ;;  %v932_v6 = vpop.f32.mrb[27].mxu0 }
 0x12b   : > { %v1396_v2 = vld [vmem:[#allocation2 + $0x99] sm:$0xff]  ;;  %v1397_v3 = vld [vmem:[#allocation2 + $0xa1] sm:$0xff]  ;;  %1257 = vst.msk [vmem:[#allocation2 + $0xc0] sm:$0xff] %vm384_vm4, %v1185_v63  ;;  %v933_v9 = vadd.f32 %v10606_v25, %v932_v6 }
 0x12c   : > { %1616 = vst.msk [vmem:[#allocation2 + $0x70] sm:$0xff] %vm384_vm4, %v1544_v61  ;;  %1617 = vst.msk [vmem:[#allocation2 + $0x78] sm:$0xff] %vm384_vm4, %v1545_v62  ;;  %v1468_v7 = vmax.f32 %v1324_v60, %v1396_v2  ;;  %v1469_v8 = vmax.f32 %v1325_v1, %v1397_v3  ;;  %v1188_v11 = vmax.f32 %v938_v5, 0.0 }
 0x12d   : > { %v1784_v10 = vld [vmem:[#allocation3 + $0x38] sm:$0xff]  ;;  %v1187_v15 = vmax.f32 %v933_v9, 0.0  ;;  %v8512_v16 = vpop.f32.mrb[28].mxu0 }
 0x12e   : > { %8593 = vmatprep.mubr.msk.f32.mxu0 %vm384_vm4, %v1784_v10  ;;  %v1546_v13 = vmax.f32 %v1465_v39, %v1468_v7  ;;  %v1547_v14 = vmax.f32 %v1466_v55, %v1469_v8  ;;  %v1327_v17 = vld [vmem:[#allocation2 + $0xb0] sm:$0xff]  ;;  %1260 = vst.msk [vmem:[#allocation2 + $0xd8] sm:$0xff] %vm384_vm4, %v1188_v11  ;;  %v948_v20 = vadd.f32 %v8512_v16, %v10606_v25  ;;  %v942_v21 = vpop.f32.mrb[29].mxu0  ;;  %v1328_v29 = vld [vmem:[#allocation2 + $0xb8] sm:$0xff] }
 0x12f   : > { %v1398_v18 = vld [vmem:[#allocation2 + $0xa9] sm:$0xff]  ;;  %v1399_v19 = vld [vmem:[#allocation2 + $0xb1] sm:$0xff]  ;;  %1259 = vst.msk [vmem:[#allocation2 + $0xd0] sm:$0xff] %vm384_vm4, %v1187_v15  ;;  %v943_v24 = vadd.f32 %v10606_v25, %v942_v21 }
 0x130   : > { %1618 = vst.msk [vmem:[#allocation2 + $0x80] sm:$0xff] %vm384_vm4, %v1546_v13  ;;  %1619 = vst.msk [vmem:[#allocation2 + $0x88] sm:$0xff] %vm384_vm4, %v1547_v14  ;;  %v1470_v22 = vmax.f32 %v1326_v12, %v1398_v18  ;;  %v1471_v23 = vmax.f32 %v1327_v17, %v1399_v19  ;;  %v1785_v26 = vld [vmem:[#allocation3 + $0x40] sm:$0xff]  ;;  %v1190_v28 = vmax.f32 %v948_v20, 0.0 }
 0x131   : > { %v1687_v27 = vld [vmem:[#allocation2 + $0x60] ss:$2 sm:$0xff]  ;;  %8594 = vmatmul.mubr.msk.f32.gmra.mrb[78].mxu0 %vm384_vm4, %v1785_v26  ;;  %v1189_v32 = vmax.f32 %v943_v24, 0.0  ;;  %v8515_v33 = vpop.f32.mrb[30].mxu0 }
 0x132   : > { %1690 = vst.msk [vmem:[#allocation3 + $0x49] sm:$0xff] %vm384_vm4, %v1687_v27  ;;  %v1548_v30 = vmax.f32 %v1467_v56, %v1470_v22  ;;  %v1549_v31 = vmax.f32 %v1468_v7, %v1471_v23  ;;  %v1329_v34 = vld [vmem:[#allocation2 + $0xc0] sm:$0xff]  ;;  %1262 = vst.msk [vmem:[#allocation2 + $0xe8] sm:$0xff] %vm384_vm4, %v1190_v28  ;;  %v958_v37 = vadd.f32 %v8515_v33, %v10606_v25  ;;  %v952_v38 = vpop.f32.mrb[31].mxu0  ;;  %v1330_v45 = vld [vmem:[#allocation2 + $0xc8] sm:$0xff] }
 0x133   : > { %v1400_v35 = vld [vmem:[#allocation2 + $0xb9] sm:$0xff]  ;;  %v1401_v36 = vld [vmem:[#allocation2 + $0xc1] sm:$0xff]  ;;  %1261 = vst.msk [vmem:[#allocation2 + $0xe0] sm:$0xff] %vm384_vm4, %v1189_v32  ;;  %v953_v41 = vadd.f32 %v10606_v25, %v952_v38  ;;  %v1689_v42 = vld [vmem:[#allocation2 + $0x70] ss:$2 sm:$0xf] }
 0x134   : > { %1620 = vst.msk [vmem:[#allocation2 + $0x90] sm:$0xff] %vm384_vm4, %v1548_v30  ;;  %1621 = vst.msk [vmem:[#allocation2 + $0x98] sm:$0xff] %vm384_vm4, %v1549_v31  ;;  %v1472_v39 = vmax.f32 %v1328_v29, %v1400_v35  ;;  %v1473_v40 = vmax.f32 %v1329_v34, %v1401_v36  ;;  %v1192_v43 = vmax.f32 %v958_v37, 0.0 }
 0x135   : > { %1691 = vst.msk [vmem:[#allocation3 + $0x51] sm:$0xf] %vm1678_vm5, %v1689_v42  ;;  %v1191_v48 = vmax.f32 %v953_v41, 0.0  ;;  %v8518_v49 = vpop.f32.mrb[32].mxu0  ;;  %v1332_v60 = vld [vmem:[#allocation2 + $0xd8] sm:$0xff] }
 0x136   : > { %v1550_v46 = vmax.f32 %v1469_v8, %v1472_v39  ;;  %v1551_v47 = vmax.f32 %v1470_v22, %v1473_v40  ;;  %v1331_v50 = vld [vmem:[#allocation2 + $0xd0] sm:$0xff]  ;;  %1264 = vst.msk [vmem:[#allocation2 + $0xf8] sm:$0xff] %vm384_vm4, %v1192_v43  ;;  %v968_v53 = vadd.f32 %v8518_v49, %v10606_v25  ;;  %v962_v54 = vpop.f32.mrb[33].mxu0 }
 0x137   : > { %v1402_v51 = vld [vmem:[#allocation2 + $0xc9] sm:$0xff]  ;;  %v1403_v52 = vld [vmem:[#allocation2 + $0xd1] sm:$0xff]  ;;  %1263 = vst.msk [vmem:[#allocation2 + $0xf0] sm:$0xff] %vm384_vm4, %v1191_v48  ;;  %v963_v57 = vadd.f32 %v10606_v25, %v962_v54 }
 0x138   : > { %1622 = vst.msk [vmem:[#allocation2 + $0xa0] sm:$0xff] %vm384_vm4, %v1550_v46  ;;  %1623 = vst.msk [vmem:[#allocation2 + $0xa8] sm:$0xff] %vm384_vm4, %v1551_v47  ;;  %v1474_v55 = vmax.f32 %v1330_v45, %v1402_v51  ;;  %v1475_v56 = vmax.f32 %v1331_v50, %v1403_v52  ;;  %v1194_v59 = vmax.f32 %v968_v53, 0.0 }
 0x139   : > { %v1786_v58 = vld [vmem:[#allocation3 + $0x48] sm:$0xff]  ;;  %v1193_v63 = vmax.f32 %v963_v57, 0.0  ;;  %v8521_v0 = vpop.f32.mrb[34].mxu0 }
 0x13a   : > { %8596 = vmatprep.mubr.msk.f32.mxu0 %vm384_vm4, %v1786_v58  ;;  %v1552_v61 = vmax.f32 %v1471_v23, %v1474_v55  ;;  %v1553_v62 = vmax.f32 %v1472_v39, %v1475_v56  ;;  %v1333_v1 = vld [vmem:[#allocation2 + $0xe0] sm:$0xff]  ;;  %1266 = vst.msk [vmem:[#allocation2 + $0x108] sm:$0xff] %vm384_vm4, %v1194_v59  ;;  %v978_v5 = vadd.f32 %v8521_v0, %v10606_v25  ;;  %v972_v6 = vpop.f32.mrb[35].mxu0  ;;  %v1334_v13 = vld [vmem:[#allocation2 + $0xe8] sm:$0xff] }
 0x13b   : > { %v1404_v2 = vld [vmem:[#allocation2 + $0xd9] sm:$0xff]  ;;  %v1405_v3 = vld [vmem:[#allocation2 + $0xe1] sm:$0xff]  ;;  %1265 = vst.msk [vmem:[#allocation2 + $0x100] sm:$0xff] %vm384_vm4, %v1193_v63  ;;  %v973_v9 = vadd.f32 %v10606_v25, %v972_v6 }
 0x13c   : > { %1624 = vst.msk [vmem:[#allocation2 + $0xb0] sm:$0xff] %vm384_vm4, %v1552_v61  ;;  %1625 = vst.msk [vmem:[#allocation2 + $0xb8] sm:$0xff] %vm384_vm4, %v1553_v62  ;;  %v1476_v7 = vmax.f32 %v1332_v60, %v1404_v2  ;;  %v1477_v8 = vmax.f32 %v1333_v1, %v1405_v3  ;;  %v1787_v10 = vld [vmem:[#allocation3 + $0x50] sm:$0xff]  ;;  %v1196_v12 = vmax.f32 %v978_v5, 0.0 }
 0x13d   : > { %v1693_v11 = vld [vmem:[#allocation2 + $0x90] ss:$2 sm:$0xff]  ;;  %8597 = vmatmul.mubr.msk.f32.gmra.mrb[80].mxu0 %vm384_vm4, %v1787_v10  ;;  %v1195_v16 = vmax.f32 %v973_v9, 0.0  ;;  %v8524_v17 = vpop.f32.mrb[36].mxu0 }
 0x13e   : > { %1696 = vst.msk [vmem:[#allocation3 + $0x59] sm:$0xff] %vm384_vm4, %v1693_v11  ;;  %v1554_v14 = vmax.f32 %v1473_v40, %v1476_v7  ;;  %v1555_v15 = vmax.f32 %v1474_v55, %v1477_v8  ;;  %v1335_v18 = vld [vmem:[#allocation2 + $0xf0] sm:$0xff]  ;;  %1268 = vst.msk [vmem:[#allocation2 + $0x118] sm:$0xff] %vm384_vm4, %v1196_v12  ;;  %v988_v21 = vadd.f32 %v8524_v17, %v10606_v25  ;;  %v982_v22 = vpop.f32.mrb[37].mxu0  ;;  %v1336_v29 = vld [vmem:[#allocation2 + $0xf8] sm:$0xff] }
 0x13f   : > { %v1406_v19 = vld [vmem:[#allocation2 + $0xe9] sm:$0xff]  ;;  %v1407_v20 = vld [vmem:[#allocation2 + $0xf1] sm:$0xff]  ;;  %1267 = vst.msk [vmem:[#allocation2 + $0x110] sm:$0xff] %vm384_vm4, %v1195_v16  ;;  %v983_v26 = vadd.f32 %v10606_v25, %v982_v22  ;;  %v1695_v27 = vld [vmem:[#allocation2 + $0xa0] ss:$2 sm:$0xf] }
 0x140   : > { %1626 = vst.msk [vmem:[#allocation2 + $0xc0] sm:$0xff] %vm384_vm4, %v1554_v14  ;;  %1627 = vst.msk [vmem:[#allocation2 + $0xc8] sm:$0xff] %vm384_vm4, %v1555_v15  ;;  %v1478_v23 = vmax.f32 %v1334_v13, %v1406_v19  ;;  %v1479_v24 = vmax.f32 %v1335_v18, %v1407_v20  ;;  %v1198_v28 = vmax.f32 %v988_v21, 0.0 }
 0x141   : > { %1697 = vst.msk [vmem:[#allocation3 + $0x61] sm:$0xf] %vm1678_vm5, %v1695_v27  ;;  %v1197_v32 = vmax.f32 %v983_v26, 0.0  ;;  %v8527_v33 = vpop.f32.mrb[38].mxu0  ;;  %v1338_v45 = vld [vmem:[#allocation2 + $0x108] sm:$0xff] }
 0x142   : > { %v1556_v30 = vmax.f32 %v1475_v56, %v1478_v23  ;;  %v1557_v31 = vmax.f32 %v1476_v7, %v1479_v24  ;;  %v1337_v34 = vld [vmem:[#allocation2 + $0x100] sm:$0xff]  ;;  %1270 = vst.msk [vmem:[#allocation2 + $0x128] sm:$0xff] %vm384_vm4, %v1198_v28  ;;  %v998_v37 = vadd.f32 %v8527_v33, %v10606_v25  ;;  %v992_v38 = vpop.f32.mrb[39].mxu0  ;;  %v1776_v28 = vld [vmem:[%s12592_s3 + $0x10] sm:$0xff] }
 0x143   : > { %v1408_v35 = vld [vmem:[#allocation2 + $0xf9] sm:$0xff]  ;;  %v1409_v36 = vld [vmem:[#allocation2 + $0x101] sm:$0xff]  ;;  %1269 = vst.msk [vmem:[#allocation2 + $0x120] sm:$0xff] %vm384_vm4, %v1197_v32  ;;  %v993_v41 = vadd.f32 %v10606_v25, %v992_v38 }
 0x144   : > { %1628 = vst.msk [vmem:[#allocation2 + $0xd0] sm:$0xff] %vm384_vm4, %v1556_v30  ;;  %1629 = vst.msk [vmem:[#allocation2 + $0xd8] sm:$0xff] %vm384_vm4, %v1557_v31  ;;  %v1480_v39 = vmax.f32 %v1336_v29, %v1408_v35  ;;  %v1481_v40 = vmax.f32 %v1337_v34, %v1409_v36  ;;  %v1200_v43 = vmax.f32 %v998_v37, 0.0  ;;  %v1777_v29 = vld [vmem:[%s12592_s3 + $0x18] sm:$0xff]  ;;  %v2416_v36 = vld [vmem:[%s12592_s3 + $0x40] sm:$0xff] }
 0x145   : > { %v1788_v42 = vld [vmem:[#allocation3 + $0x58] sm:$0xff]  ;;  %v1199_v48 = vmax.f32 %v993_v41, 0.0  ;;  %v8530_v49 = vpop.f32.mrb[40].mxu0 }
 0x146   : > { %8599 = vmatprep.mubr.msk.f32.mxu0 %vm384_vm4, %v1788_v42  ;;  %v1558_v46 = vmax.f32 %v1477_v8, %v1480_v39  ;;  %v1559_v47 = vmax.f32 %v1478_v23, %v1481_v40  ;;  %v1339_v50 = vld [vmem:[#allocation2 + $0x110] sm:$0xff]  ;;  %1272 = vst.msk [vmem:[#allocation2 + $0x138] sm:$0xff] %vm384_vm4, %v1200_v43  ;;  %v1008_v53 = vadd.f32 %v8530_v49, %v10606_v25  ;;  %v1002_v54 = vpop.f32.mrb[41].mxu0  ;;  %v1340_v61 = vld [vmem:[#allocation2 + $0x118] sm:$0xff]  ;;  %v2417_v49 = vld [vmem:[%s12592_s3 + $0x48] sm:$0xff] }
 0x147   : > { %v1410_v51 = vld [vmem:[#allocation2 + $0x109] sm:$0xff]  ;;  %v1411_v52 = vld [vmem:[#allocation2 + $0x111] sm:$0xff]  ;;  %1271 = vst.msk [vmem:[#allocation2 + $0x130] sm:$0xff] %vm384_vm4, %v1199_v48  ;;  %v1003_v57 = vadd.f32 %v10606_v25, %v1002_v54  ;;  %v9506_v42 = vpack.c.bf16 %v1777_v29, %v1776_v28 }
 0x148   : > { %1630 = vst.msk [vmem:[#allocation2 + $0xe0] sm:$0xff] %vm384_vm4, %v1558_v46  ;;  %1631 = vst.msk [vmem:[#allocation2 + $0xe8] sm:$0xff] %vm384_vm4, %v1559_v47  ;;  %v1482_v55 = vmax.f32 %v1338_v45, %v1410_v51  ;;  %v10742_v56 = vmax.f32 %v1339_v50, %v1411_v52  ;;  %v1789_v58 = vld [vmem:[#allocation3 + $0x60] sm:$0xff]  ;;  %v1202_v60 = vmax.f32 %v1008_v53, 0.0 }
 0x149   : > { %v1699_v59 = vld [vmem:[#allocation2 + $0xc0] ss:$2 sm:$0xff]  ;;  %8600 = vmatmul.mubr.msk.f32.gmra.mrb[82].mxu0 %vm384_vm4, %v1789_v58  ;;  %v1201_v0 = vmax.f32 %v1003_v57, 0.0  ;;  %v8533_v1 = vpop.f32.mrb[42].mxu0 }
 0x14a   : > { %1702 = vst.msk [vmem:[#allocation3 + $0x69] sm:$0xff] %vm384_vm4, %v1699_v59  ;;  %v1560_v62 = vmax.f32 %v1479_v24, %v1482_v55  ;;  %v1561_v63 = vmax.f32 %v1480_v39, %v10742_v56  ;;  %v1341_v2 = vld [vmem:[#allocation2 + $0x120] sm:$0xff]  ;;  %1274 = vst.msk [vmem:[#allocation2 + $0x148] sm:$0xff] %vm384_vm4, %v1202_v60  ;;  %v1018_v6 = vadd.f32 %v8533_v1, %v10606_v25  ;;  %v1012_v7 = vpop.f32.mrb[43].mxu0  ;;  %v1342_v13 = vld [vmem:[#allocation2 + $0x128] sm:$0xff] }
 0x14b   : > { %v1412_v3 = vld [vmem:[#allocation2 + $0x119] sm:$0xff]  ;;  %v1413_v5 = vld [vmem:[#allocation2 + $0x121] sm:$0xff]  ;;  %1273 = vst.msk [vmem:[#allocation2 + $0x140] sm:$0xff] %vm384_vm4, %v1201_v0  ;;  %v1013_v10 = vadd.f32 %v10606_v25, %v1012_v7  ;;  %v1701_v11 = vld [vmem:[#allocation2 + $0xd0] ss:$2 sm:$0xf] }
 0x14c   : > { %1632 = vst.msk [vmem:[#allocation2 + $0xf0] sm:$0xff] %vm384_vm4, %v1560_v62  ;;  %1633 = vst.msk [vmem:[#allocation2 + $0xf8] sm:$0xff] %vm384_vm4, %v1561_v63  ;;  %v1484_v8 = vmax.f32 %v1340_v61, %v1412_v3  ;;  %v10753_v9 = vmax.f32 %v1341_v2, %v1413_v5  ;;  %v1204_v12 = vmax.f32 %v1018_v6, 0.0  ;;  %v10797_v61 = vpack.c.bf16 %v2417_v49, %v2416_v36 }
 0x14d   : > { %1703 = vst.msk [vmem:[#allocation3 + $0x71] sm:$0xf] %vm1678_vm5, %v1701_v11  ;;  %v1203_v16 = vmax.f32 %v1013_v10, 0.0  ;;  %v8536_v17 = vpop.f32.mrb[44].mxu0  ;;  %v1344_v31 = vld [vmem:[#allocation2 + $0x138] sm:$0xff] }
 0x14e   : > { %v1562_v14 = vmax.f32 %v1481_v40, %v1484_v8  ;;  %v1563_v15 = vmax.f32 %v1482_v55, %v10753_v9  ;;  %v1343_v18 = vld [vmem:[#allocation2 + $0x130] sm:$0xff]  ;;  %1276 = vst.msk [vmem:[#allocation2 + $0x158] sm:$0xff] %vm384_vm4, %v1204_v12  ;;  %v1028_v21 = vadd.f32 %v8536_v17, %v10606_v25  ;;  %v1022_v22 = vpop.f32.mrb[45].mxu0 }
 0x14f   : > { %v1414_v19 = vld [vmem:[#allocation2 + $0x129] sm:$0xff]  ;;  %v1415_v20 = vld [vmem:[#allocation2 + $0x131] sm:$0xff]  ;;  %1275 = vst.msk [vmem:[#allocation2 + $0x150] sm:$0xff] %vm384_vm4, %v1203_v16  ;;  %v1023_v26 = vadd.f32 %v10606_v25, %v1022_v22 }
 0x150   : > { %1634 = vst.msk [vmem:[#allocation2 + $0x100] sm:$0xff] %vm384_vm4, %v1562_v14  ;;  %1635 = vst.msk [vmem:[#allocation2 + $0x108] sm:$0xff] %vm384_vm4, %v1563_v15  ;;  %v1486_v23 = vmax.f32 %v1342_v13, %v1414_v19  ;;  %v10763_v24 = vmax.f32 %v1343_v18, %v1415_v20  ;;  %v1206_v30 = vmax.f32 %v1028_v21, 0.0 }
 0x151   : > { %v1790_v27 = vld [vmem:[#allocation3 + $0x68] sm:$0xff]  ;;  %v1205_v34 = vmax.f32 %v1023_v26, 0.0  ;;  %v8539_v35 = vpop.f32.mrb[46].mxu0 }
 0x152   : > { %8602 = vmatprep.mubr.msk.f32.mxu1 %vm384_vm4, %v1790_v27  ;;  %v1564_v32 = vmax.f32 %v10742_v56, %v1486_v23  ;;  %v1565_v33 = vmax.f32 %v1484_v8, %v10763_v24  ;;  %v1345_v37 = vld [vmem:[#allocation2 + $0x140] sm:$0xff]  ;;  %1278 = vst.msk [vmem:[#allocation2 + $0x168] sm:$0xff] %vm384_vm4, %v1206_v30  ;;  %v1038_v40 = vadd.f32 %v8539_v35, %v10606_v25  ;;  %v1032_v41 = vpop.f32.mrb[47].mxu0  ;;  %v1346_v51 = vld [vmem:[#allocation2 + $0x148] sm:$0xff] }
 0x153   : > { %v1416_v38 = vld [vmem:[#allocation2 + $0x139] sm:$0xff]  ;;  %v1417_v39 = vld [vmem:[#allocation2 + $0x141] sm:$0xff]  ;;  %1277 = vst.msk [vmem:[#allocation2 + $0x160] sm:$0xff] %vm384_vm4, %v1205_v34  ;;  %v1033_v46 = vadd.f32 %v10606_v25, %v1032_v41 }
 0x154   : > { %1636 = vst.msk [vmem:[#allocation2 + $0x110] sm:$0xff] %vm384_vm4, %v1564_v32  ;;  %1637 = vst.msk [vmem:[#allocation2 + $0x118] sm:$0xff] %vm384_vm4, %v1565_v33  ;;  %v1488_v43 = vmax.f32 %v1344_v31, %v1416_v38  ;;  %v10783_v45 = vmax.f32 %v1345_v37, %v1417_v39  ;;  %v1791_v47 = vld [vmem:[#allocation3 + $0x70] sm:$0xff]  ;;  %v1208_v50 = vmax.f32 %v1038_v40, 0.0 }
 0x155   : > { %v1705_v48 = vld [vmem:[#allocation2 + $0xf0] ss:$2 sm:$0xff]  ;;  %8603 = vmatmul.mubr.msk.f32.vlgmr.msra.gmra.mrb[0].mxu1 %vm384_vm4, %v1791_v47  ;;  %v1207_v54 = vmax.f32 %v1033_v46, 0.0  ;;  %v8542_v55 = vpop.f32.mrb[48].mxu0 }
 0x156   : > { %1708 = vst.msk [vmem:[#allocation3 + $0x79] sm:$0xff] %vm384_vm4, %v1705_v48  ;;  %v1566_v52 = vmax.f32 %v10753_v9, %v1488_v43  ;;  %v1567_v53 = vmax.f32 %v1486_v23, %v10783_v45  ;;  %9505 = vmatpush3.bf16.msra.mxu1 %v10648_v44  ;;  %v1347_v56 = vld [vmem:[#allocation2 + $0x150] sm:$0xff]  ;;  %1280 = vst.msk [vmem:[#allocation2 + $0x178] sm:$0xff] %vm384_vm4, %v1208_v50  ;;  %v1048_v59 = vadd.f32 %v8542_v55, %v10606_v25  ;;  %v1042_v60 = vpop.f32.mrb[49].mxu0  ;;  %v1348_v2 = vld [vmem:[#allocation2 + $0x158] sm:$0xff] }
 0x157   : > { %v1418_v57 = vld [vmem:[#allocation2 + $0x149] sm:$0xff]  ;;  %v1419_v58 = vld [vmem:[#allocation2 + $0x151] sm:$0xff]  ;;  %9507 = vmatprep.subr.bf16.mxu1 %v9506_v42  ;;  %1279 = vst.msk [vmem:[#allocation2 + $0x170] sm:$0xff] %vm384_vm4, %v1207_v54  ;;  %v1043_v44 = vadd.f32 %v10606_v25, %v1042_v60  ;;  %v1707_v0 = vld [vmem:[#allocation2 + $0x100] ss:$2 sm:$0xf] }
 0x158   : > { %1638 = vst.msk [vmem:[#allocation2 + $0x120] sm:$0xff] %vm384_vm4, %v1566_v52  ;;  %1639 = vst.msk [vmem:[#allocation2 + $0x128] sm:$0xff] %vm384_vm4, %v1567_v53  ;;  %v1490_v62 = vmax.f32 %v1346_v51, %v1418_v57  ;;  %v10801_v63 = vmax.f32 %v1347_v56, %v1419_v58  ;;  %v1210_v1 = vmax.f32 %v1048_v59, 0.0 }
 0x159   : > { %1709 = vst.msk [vmem:[#allocation3 + $0x81] sm:$0xf] %vm1678_vm5, %v1707_v0  ;;  %v1209_v6 = vmax.f32 %v1043_v44, 0.0  ;;  %v8545_v7 = vpop.f32.mrb[50].mxu0  ;;  %v1350_v18 = vld [vmem:[#allocation2 + $0x168] sm:$0xff] }
 0x15a   : > { %v1568_v3 = vmax.f32 %v10763_v24, %v1490_v62  ;;  %v1569_v5 = vmax.f32 %v1488_v43, %v10801_v63  ;;  %9509 = vmatpush3.bf16.msra.mxu1 %v9506_v42  ;;  %v1349_v8 = vld [vmem:[#allocation2 + $0x160] sm:$0xff]  ;;  %1282 = vst.msk [vmem:[#allocation2 + $0x188] sm:$0xff] %vm384_vm4, %v1210_v1  ;;  %v1058_v11 = vadd.f32 %v8545_v7, %v10606_v25  ;;  %v1052_v12 = vpop.f32.mrb[51].mxu0 }
 0x15b   : > { %v1420_v9 = vld [vmem:[#allocation2 + $0x159] sm:$0xff]  ;;  %v1421_v10 = vld [vmem:[#allocation2 + $0x161] sm:$0xff]  ;;  %9511 = vmatprep.subr.bf16.mxu1 %v10797_v61  ;;  %1281 = vst.msk [vmem:[#allocation2 + $0x180] sm:$0xff] %vm384_vm4, %v1209_v6  ;;  %v1053_v15 = vadd.f32 %v10606_v25, %v1052_v12 }
 0x15c   : > { %1640 = vst.msk [vmem:[#allocation2 + $0x130] sm:$0xff] %vm384_vm4, %v1568_v3  ;;  %1641 = vst.msk [vmem:[#allocation2 + $0x138] sm:$0xff] %vm384_vm4, %v1569_v5  ;;  %v1492_v13 = vmax.f32 %v1348_v2, %v1420_v9  ;;  %v1493_v14 = vmax.f32 %v1349_v8, %v1421_v10  ;;  %v1212_v17 = vmax.f32 %v1058_v11, 0.0 }
 0x15d   : > { %v10815_v16 = vld [vmem:[#allocation3 + $0x78] sm:$0xff]  ;;  %v1211_v21 = vmax.f32 %v1053_v15, 0.0  ;;  %v8548_v22 = vpop.f32.mrb[52].mxu0 }
 0x15e   : > { %8605 = vmatprep.mubr.msk.f32.mxu1 %vm384_vm4, %v10815_v16  ;;  %v1570_v19 = vmax.f32 %v10783_v45, %v1492_v13  ;;  %v1571_v20 = vmax.f32 %v1490_v62, %v1493_v14  ;;  %v1351_v23 = vld [vmem:[#allocation2 + $0x170] sm:$0xff]  ;;  %1284 = vst.msk [vmem:[#allocation2 + $0x198] sm:$0xff] %vm384_vm4, %v1212_v17  ;;  %v1068_v27 = vadd.f32 %v8548_v22, %v10606_v25  ;;  %v1062_v28 = vpop.f32.mrb[53].mxu0  ;;  %v1352_v35 = vld [vmem:[#allocation2 + $0x178] sm:$0xff] }
 0x15f   : > { %v1422_v24 = vld [vmem:[#allocation2 + $0x169] sm:$0xff]  ;;  %v1423_v26 = vld [vmem:[#allocation2 + $0x171] sm:$0xff]  ;;  %1283 = vst.msk [vmem:[#allocation2 + $0x190] sm:$0xff] %vm384_vm4, %v1211_v21  ;;  %v1063_v31 = vadd.f32 %v10606_v25, %v1062_v28  ;;  %v10836_v25 = vld [vmem:[%s12591_s2] ss:$0 sm:$0xff] }
 0x160   : > { %1642 = vst.msk [vmem:[#allocation2 + $0x140] sm:$0xff] %vm384_vm4, %v1570_v19  ;;  %1643 = vst.msk [vmem:[#allocation2 + $0x148] sm:$0xff] %vm384_vm4, %v1571_v20  ;;  %v1494_v29 = vmax.f32 %v1350_v18, %v1422_v24  ;;  %v1495_v30 = vmax.f32 %v1351_v23, %v1423_v26  ;;  %v10826_v32 = vld [vmem:[#allocation3 + $0x80] sm:$0xff]  ;;  %v1214_v34 = vmax.f32 %v1068_v27, 0.0 }
 0x161   : > { %v1711_v33 = vld [vmem:[#allocation2 + $0x120] ss:$2 sm:$0xff]  ;;  %8606 = vmatmul.mubr.msk.f32.gmra.mrb[2].mxu1 %vm384_vm4, %v10826_v32  ;;  %v1213_v38 = vmax.f32 %v1063_v31, 0.0  ;;  %v8551_v39 = vpop.f32.mrb[54].mxu0 }
 0x162   : > { %1714 = vst.msk [vmem:[#allocation3 + $0x89] sm:$0xff] %vm384_vm4, %v1711_v33  ;;  %v1572_v36 = vmax.f32 %v10801_v63, %v1494_v29  ;;  %v1573_v37 = vmax.f32 %v1492_v13, %v1495_v30  ;;  %v1353_v40 = vld [vmem:[#allocation2 + $0x180] sm:$0xff]  ;;  %1286 = vst.msk [vmem:[#allocation2 + $0x1a8] sm:$0xff] %vm384_vm4, %v1214_v34  ;;  %v1078_v43 = vadd.f32 %v10836_v25, %v8551_v39  ;;  %v1072_v45 = vpop.f32.mrb[55].mxu0  ;;  %v1354_v51 = vld [vmem:[#allocation2 + $0x188] sm:$0xff] }
 0x163   : > { %v1424_v41 = vld [vmem:[#allocation2 + $0x179] sm:$0xff]  ;;  %v1425_v42 = vld [vmem:[#allocation2 + $0x181] sm:$0xff]  ;;  %1285 = vst.msk [vmem:[#allocation2 + $0x1a0] sm:$0xff] %vm384_vm4, %v1213_v38  ;;  %v1073_v48 = vadd.f32 %v10836_v25, %v1072_v45  ;;  %v1713_v49 = vld [vmem:[#allocation2 + $0x130] ss:$2 sm:$0xf] }
 0x164   : > { %1644 = vst.msk [vmem:[#allocation2 + $0x150] sm:$0xff] %vm384_vm4, %v1572_v36  ;;  %1645 = vst.msk [vmem:[#allocation2 + $0x158] sm:$0xff] %vm384_vm4, %v1573_v37  ;;  %v1496_v46 = vmax.f32 %v1352_v35, %v1424_v41  ;;  %v1497_v47 = vmax.f32 %v1353_v40, %v1425_v42  ;;  %v1216_v50 = vmax.f32 %v1078_v43, 0.0 }
 0x165   : > { %1715 = vst.msk [vmem:[#allocation3 + $0x91] sm:$0xf] %vm1678_vm5, %v1713_v49  ;;  %v1215_v54 = vmax.f32 %v1073_v48, 0.0  ;;  %v8554_v55 = vpop.f32.mrb[56].mxu0  ;;  %v1356_v2 = vld [vmem:[#allocation2 + $0x198] sm:$0xff] }
 0x166   : > { %v1574_v52 = vmax.f32 %v1493_v14, %v1496_v46  ;;  %v1575_v53 = vmax.f32 %v1494_v29, %v1497_v47  ;;  %v1355_v56 = vld [vmem:[#allocation2 + $0x190] sm:$0xff]  ;;  %1288 = vst.msk [vmem:[#allocation2 + $0x1b8] sm:$0xff] %vm384_vm4, %v1216_v50  ;;  %v1088_v59 = vadd.f32 %v10836_v25, %v8554_v55  ;;  %v1082_v60 = vpop.f32.mrb[57].mxu0 }
 0x167   : > { %v1426_v57 = vld [vmem:[#allocation2 + $0x189] sm:$0xff]  ;;  %v1427_v58 = vld [vmem:[#allocation2 + $0x191] sm:$0xff]  ;;  %1287 = vst.msk [vmem:[#allocation2 + $0x1b0] sm:$0xff] %vm384_vm4, %v1215_v54  ;;  %v1083_v44 = vadd.f32 %v10836_v25, %v1082_v60 }
 0x168   : > { %1646 = vst.msk [vmem:[#allocation2 + $0x160] sm:$0xff] %vm384_vm4, %v1574_v52  ;;  %1647 = vst.msk [vmem:[#allocation2 + $0x168] sm:$0xff] %vm384_vm4, %v1575_v53  ;;  %v1498_v62 = vmax.f32 %v1354_v51, %v1426_v57  ;;  %v1499_v63 = vmax.f32 %v1355_v56, %v1427_v58  ;;  %v1218_v1 = vmax.f32 %v1088_v59, 0.0 }
 0x169   : > { %v10850_v0 = vld [vmem:[#allocation3 + $0x88] sm:$0xff]  ;;  %v1217_v6 = vmax.f32 %v1083_v44, 0.0  ;;  %v8557_v7 = vpop.f32.mrb[58].mxu0 }
 0x16a   : > { %8608 = vmatprep.mubr.msk.f32.mxu1 %vm384_vm4, %v10850_v0  ;;  %v1576_v3 = vmax.f32 %v1495_v30, %v1498_v62  ;;  %v1577_v5 = vmax.f32 %v1496_v46, %v1499_v63  ;;  %v1357_v8 = vld [vmem:[#allocation2 + $0x1a0] sm:$0xff]  ;;  %1290 = vst.msk [vmem:[#allocation2 + $0x1c8] sm:$0xff] %vm384_vm4, %v1218_v1  ;;  %v1098_v11 = vadd.f32 %v10836_v25, %v8557_v7  ;;  %v1092_v12 = vpop.f32.mrb[59].mxu0  ;;  %v1358_v20 = vld [vmem:[#allocation2 + $0x1a8] sm:$0xff] }
 0x16b   : > { %v1428_v9 = vld [vmem:[#allocation2 + $0x199] sm:$0xff]  ;;  %v1429_v10 = vld [vmem:[#allocation2 + $0x1a1] sm:$0xff]  ;;  %1289 = vst.msk [vmem:[#allocation2 + $0x1c0] sm:$0xff] %vm384_vm4, %v1217_v6  ;;  %v1093_v15 = vadd.f32 %v10836_v25, %v1092_v12 }
 0x16c   : > { %1648 = vst.msk [vmem:[#allocation2 + $0x170] sm:$0xff] %vm384_vm4, %v1576_v3  ;;  %1649 = vst.msk [vmem:[#allocation2 + $0x178] sm:$0xff] %vm384_vm4, %v1577_v5  ;;  %v1500_v13 = vmax.f32 %v1356_v2, %v1428_v9  ;;  %v1501_v14 = vmax.f32 %v1357_v8, %v1429_v10  ;;  %v10860_v17 = vld [vmem:[#allocation3 + $0x90] sm:$0xff]  ;;  %v1220_v19 = vmax.f32 %v1098_v11, 0.0 }
 0x16d   : > { %v1717_v18 = vld [vmem:[#allocation2 + $0x150] ss:$2 sm:$0xff]  ;;  %8609 = vmatmul.mubr.msk.f32.gmra.mrb[4].mxu1 %vm384_vm4, %v10860_v17  ;;  %v1219_v23 = vmax.f32 %v1093_v15, 0.0  ;;  %v8560_v24 = vpop.f32.mrb[60].mxu0 }
 0x16e   : > { %1720 = vst.msk [vmem:[#allocation3 + $0x99] sm:$0xff] %vm384_vm4, %v1717_v18  ;;  %v1578_v21 = vmax.f32 %v1497_v47, %v1500_v13  ;;  %v1579_v22 = vmax.f32 %v1498_v62, %v1501_v14  ;;  %v1359_v26 = vld [vmem:[#allocation2 + $0x1b0] sm:$0xff]  ;;  %1292 = vst.msk [vmem:[#allocation2 + $0x1d8] sm:$0xff] %vm384_vm4, %v1220_v19  ;;  %v1108_v29 = vadd.f32 %v10836_v25, %v8560_v24  ;;  %v1102_v30 = vpop.f32.mrb[61].mxu0  ;;  %v1360_v37 = vld [vmem:[#allocation2 + $0x1b8] sm:$0xff] }
 0x16f   : > { %v1430_v27 = vld [vmem:[#allocation2 + $0x1a9] sm:$0xff]  ;;  %v1431_v28 = vld [vmem:[#allocation2 + $0x1b1] sm:$0xff]  ;;  %1291 = vst.msk [vmem:[#allocation2 + $0x1d0] sm:$0xff] %vm384_vm4, %v1219_v23  ;;  %v1103_v34 = vadd.f32 %v10836_v25, %v1102_v30  ;;  %v1719_v35 = vld [vmem:[#allocation2 + $0x160] ss:$2 sm:$0xf] }
 0x170   : > { %1650 = vst.msk [vmem:[#allocation2 + $0x180] sm:$0xff] %vm384_vm4, %v1578_v21  ;;  %1651 = vst.msk [vmem:[#allocation2 + $0x188] sm:$0xff] %vm384_vm4, %v1579_v22  ;;  %v1502_v31 = vmax.f32 %v1358_v20, %v1430_v27  ;;  %v1503_v33 = vmax.f32 %v1359_v26, %v1431_v28  ;;  %v1222_v36 = vmax.f32 %v1108_v29, 0.0 }
 0x171   : > { %1721 = vst.msk [vmem:[#allocation3 + $0xa1] sm:$0xf] %vm1678_vm5, %v1719_v35  ;;  %v1221_v40 = vmax.f32 %v1103_v34, 0.0  ;;  %v8563_v41 = vpop.f32.mrb[62].mxu0  ;;  %v1362_v53 = vld [vmem:[#allocation2 + $0x1c8] sm:$0xff] }
 0x172   : > { %v1580_v38 = vmax.f32 %v1499_v63, %v1502_v31  ;;  %v1581_v39 = vmax.f32 %v1500_v13, %v1503_v33  ;;  %v1361_v42 = vld [vmem:[#allocation2 + $0x1c0] sm:$0xff]  ;;  %1294 = vst.msk [vmem:[#allocation2 + $0x1e8] sm:$0xff] %vm384_vm4, %v1222_v36  ;;  %v1118_v46 = vadd.f32 %v10836_v25, %v8563_v41  ;;  %v1112_v47 = vpop.f32.mrb[63].mxu0 }
 0x173   : > { %v1432_v43 = vld [vmem:[#allocation2 + $0x1b9] sm:$0xff]  ;;  %v1433_v45 = vld [vmem:[#allocation2 + $0x1c1] sm:$0xff]  ;;  %1293 = vst.msk [vmem:[#allocation2 + $0x1e0] sm:$0xff] %vm384_vm4, %v1221_v40  ;;  %v1113_v50 = vadd.f32 %v10836_v25, %v1112_v47 }
 0x174   : > { %1652 = vst.msk [vmem:[#allocation2 + $0x190] sm:$0xff] %vm384_vm4, %v1580_v38  ;;  %1653 = vst.msk [vmem:[#allocation2 + $0x198] sm:$0xff] %vm384_vm4, %v1581_v39  ;;  %v1504_v48 = vmax.f32 %v1360_v37, %v1432_v43  ;;  %v1505_v49 = vmax.f32 %v1361_v42, %v1433_v45  ;;  %v1224_v52 = vmax.f32 %v1118_v46, 0.0 }
 0x175   : > { %v10878_v51 = vld [vmem:[#allocation3 + $0x98] sm:$0xff]  ;;  %v1223_v56 = vmax.f32 %v1113_v50, 0.0  ;;  %v8566_v57 = vpop.f32.mrb[64].mxu0 }
 0x176   : > { %8611 = vmatprep.mubr.msk.f32.mxu1 %vm384_vm4, %v10878_v51  ;;  %v1582_v54 = vmax.f32 %v1501_v14, %v1504_v48  ;;  %v1583_v55 = vmax.f32 %v1502_v31, %v1505_v49  ;;  %v1363_v58 = vld [vmem:[#allocation2 + $0x1d0] sm:$0xff]  ;;  %1296 = vst.msk [vmem:[#allocation2 + $0x1f8] sm:$0xff] %vm384_vm4, %v1224_v52  ;;  %v1128_v62 = vadd.f32 %v10836_v25, %v8566_v57  ;;  %v1122_v63 = vpop.f32.mrb[65].mxu0  ;;  %v1364_v7 = vld [vmem:[#allocation2 + $0x1d8] sm:$0xff] }
 0x177   : > { %v1434_v59 = vld [vmem:[#allocation2 + $0x1c9] sm:$0xff]  ;;  %v1435_v60 = vld [vmem:[#allocation2 + $0x1d1] sm:$0xff]  ;;  %1295 = vst.msk [vmem:[#allocation2 + $0x1f0] sm:$0xff] %vm384_vm4, %v1223_v56  ;;  %v1123_v2 = vadd.f32 %v10836_v25, %v1122_v63  ;;  %v11180_v4 = vld [vmem:[#allocation3 + $0x99] sm:$0xff] }
 0x178   : > { %1654 = vst.msk [vmem:[#allocation2 + $0x1a0] sm:$0xff] %vm384_vm4, %v1582_v54  ;;  %1655 = vst.msk [vmem:[#allocation2 + $0x1a8] sm:$0xff] %vm384_vm4, %v1583_v55  ;;  %v1506_v44 = vmax.f32 %v1362_v53, %v1434_v59  ;;  %v10886_v1 = vmax.f32 %v1363_v58, %v1435_v60  ;;  %v10890_v3 = vld [vmem:[#allocation3 + $0xa0] sm:$0xff]  ;;  %v1226_v6 = vmax.f32 %v1128_v62, 0.0 }
 0x179   : > { %v1723_v5 = vld [vmem:[#allocation2 + $0x180] ss:$2 sm:$0xff]  ;;  %8612 = vmatmul.mubr.msk.f32.gmra.mrb[6].mxu1 %vm384_vm4, %v10890_v3  ;;  %v1225_v10 = vmax.f32 %v1123_v2, 0.0  ;;  %v8569_v11 = vpop.f32.mrb[66].mxu0 }
 0x17a   : > { %1726 = vst.msk [vmem:[#allocation3 + $0xa9] sm:$0xff] %vm384_vm4, %v1723_v5  ;;  %v1584_v8 = vmax.f32 %v1503_v33, %v1506_v44  ;;  %v1585_v9 = vmax.f32 %v1504_v48, %v10886_v1  ;;  %v1365_v12 = vld [vmem:[#allocation2 + $0x1e0] sm:$0xff]  ;;  %1298 = vst.msk [vmem:[#allocation2 + $0x208] sm:$0xff] %vm384_vm4, %v1226_v6  ;;  %v1138_v15 = vadd.f32 %v10836_v25, %v8569_v11  ;;  %v1132_v18 = vpop.f32.mrb[67].mxu0  ;;  %v1366_v28 = vld [vmem:[#allocation2 + $0x1e8] sm:$0xff] }
 0x17b   : > { %v1436_v13 = vld [vmem:[#allocation2 + $0x1d9] sm:$0xff]  ;;  %v1437_v14 = vld [vmem:[#allocation2 + $0x1e1] sm:$0xff]  ;;  %1297 = vst.msk [vmem:[#allocation2 + $0x200] sm:$0xff] %vm384_vm4, %v1225_v10  ;;  %v1133_v20 = vadd.f32 %v10836_v25, %v1132_v18  ;;  %v1725_v22 = vld [vmem:[#allocation2 + $0x190] ss:$2 sm:$0xf] }
 0x17c   : > { %1656 = vst.msk [vmem:[#allocation2 + $0x1b0] sm:$0xff] %vm384_vm4, %v1584_v8  ;;  %1657 = vst.msk [vmem:[#allocation2 + $0x1b8] sm:$0xff] %vm384_vm4, %v1585_v9  ;;  %v1508_v19 = vmax.f32 %v1364_v7, %v1436_v13  ;;  %v1509_v21 = vmax.f32 %v1365_v12, %v1437_v14  ;;  %v1228_v23 = vmax.f32 %v1138_v15, 0.0  ;;  %v1523_v7 = vld [vmem:[#allocation2 + $0x250] sm:$0xff]  ;;  %v1521_v11 = vld [vmem:[#allocation2 + $0x240] sm:$0xff] }
 0x17d   : > { %1727 = vst.msk [vmem:[#allocation3 + $0xb1] sm:$0xf] %vm1678_vm5, %v1725_v22  ;;  %v1227_v26 = vmax.f32 %v1133_v20, 0.0  ;;  %v8572_v27 = vpop.f32.mrb[68].mxu0  ;;  %v1368_v45 = vld [vmem:[#allocation2 + $0x1f8] sm:$0xff]  ;;  %v1522_v12 = vld [vmem:[#allocation2 + $0x248] sm:$0xff] }
 0x17e   : > { %v1586_v24 = vmax.f32 %v1505_v49, %v1508_v19  ;;  %v1587_v29 = vmax.f32 %v1506_v44, %v1509_v21  ;;  %v1367_v30 = vld [vmem:[#allocation2 + $0x1f0] sm:$0xff]  ;;  %1300 = vst.msk [vmem:[#allocation2 + $0x218] sm:$0xff] %vm384_vm4, %v1228_v23  ;;  %v1148_v34 = vadd.f32 %v10836_v25, %v8572_v27  ;;  %v1142_v35 = vpop.f32.mrb[69].mxu0  ;;  %v1524_v15 = vld [vmem:[#allocation2 + $0x241] sm:$0xff] }
 0x17f   : > { %v1438_v31 = vld [vmem:[#allocation2 + $0x1e9] sm:$0xff]  ;;  %v1439_v33 = vld [vmem:[#allocation2 + $0x1f1] sm:$0xff]  ;;  %1299 = vst.msk [vmem:[#allocation2 + $0x210] sm:$0xff] %vm384_vm4, %v1227_v26  ;;  %v1143_v37 = vadd.f32 %v10836_v25, %v1142_v35  ;;  %v1527_v35 = vmax.f32 %v1521_v11, %v1524_v15  ;;  %v10995_v11 = vld [vmem:[#allocation3 + $0x1f] sm:$0xff] }
 0x180   : > { %1658 = vst.msk [vmem:[#allocation2 + $0x1c0] sm:$0xff] %vm384_vm4, %v1586_v24  ;;  %v1511_v36 = vmax.f32 %v1367_v30, %v1439_v33  ;;  %v1510_v39 = vmax.f32 %v1366_v28, %v1438_v31  ;;  %1659 = vst.msk [vmem:[#allocation2 + $0x1c8] sm:$0xff] %vm384_vm4, %v1587_v29  ;;  %v1230_v40 = vmax.f32 %v1148_v34, 0.0  ;;  %v1526_v10 = vld [vmem:[#allocation2 + $0x251] sm:$0xff]  ;;  %v1525_v18 = vld [vmem:[#allocation2 + $0x249] sm:$0xff] }
 0x181   : > { %v10908_v38 = vld [vmem:[#allocation3 + $0xa8] sm:$0xff]  ;;  %v1229_v42 = vmax.f32 %v1143_v37, 0.0  ;;  %v8575_v43 = vpop.f32.mrb[70].mxu0  ;;  %v1529_v29 = vmax.f32 %v1523_v7, %v1526_v10  ;;  %v10983_v7 = vld [vmem:[#allocation3 + $0x17] sm:$0xff]  ;;  %v11011_v15 = vld [vmem:[#allocation3 + $0x3f] sm:$0xff] }
 0x182   : > { %8614 = vmatprep.mubr.msk.f32.mxu1 %vm384_vm4, %v10908_v38  ;;  %v1589_v41 = vmax.f32 %v1508_v19, %v1511_v36  ;;  %v1588_v46 = vmax.f32 %v10886_v1, %v1510_v39  ;;  %1302 = vst.msk [vmem:[#allocation2 + $0x228] sm:$0xff] %vm384_vm4, %v1230_v40  ;;  %v1158_v47 = vadd.f32 %v10836_v25, %v8575_v43  ;;  %v1152_v48 = vpop.f32.mrb[71].mxu0  ;;  %v1369_v49 = vld [vmem:[#allocation2 + $0x200] sm:$0xff]  ;;  %v1370_v59 = vld [vmem:[#allocation2 + $0x208] sm:$0xff] }
 0x183   : > { %v1440_v50 = vld [vmem:[#allocation2 + $0x1f9] sm:$0xff]  ;;  %v1441_v52 = vld [vmem:[#allocation2 + $0x201] sm:$0xff]  ;;  %1301 = vst.msk [vmem:[#allocation2 + $0x220] sm:$0xff] %vm384_vm4, %v1229_v42  ;;  %v1153_v53 = vadd.f32 %v10836_v25, %v1152_v48 }
 0x184   : > { %1661 = vst.msk [vmem:[#allocation2 + $0x1d8] sm:$0xff] %vm384_vm4, %v1589_v41  ;;  %v1512_v54 = vmax.f32 %v1368_v45, %v1440_v50  ;;  %v1513_v55 = vmax.f32 %v1369_v49, %v1441_v52  ;;  %1660 = vst.msk [vmem:[#allocation2 + $0x1d0] sm:$0xff] %vm384_vm4, %v1588_v46  ;;  %v10920_v56 = vld [vmem:[#allocation3 + $0xb0] sm:$0xff]  ;;  %v1232_v58 = vmax.f32 %v1158_v47, 0.0  ;;  %v2766_v10 = vld [vmem:[%s12592_s3 + $0x68] sm:$0xff] }
 0x185   : > { %v1729_v57 = vld [vmem:[#allocation2 + $0x1b0] ss:$2 sm:$0xff]  ;;  %8615 = vmatmul.mubr.msk.f32.gmra.mrb[8].mxu1 %vm384_vm4, %v10920_v56  ;;  %v1231_v60 = vmax.f32 %v1153_v53, 0.0  ;;  %v10925_v44 = vpop.f32.mrb[72].mxu0 }
 0x186   : > { %1732 = vst.msk [vmem:[#allocation3 + $0xb9] sm:$0xff] %vm384_vm4, %v1729_v57  ;;  %v1590_v62 = vmax.f32 %v1509_v21, %v1512_v54  ;;  %v1591_v63 = vmax.f32 %v1510_v39, %v1513_v55  ;;  %12632 = vst [vmem:[#allocation11_spill] sm:$0xff] %v10925_v44  ;;  %v1442_v25 = vld [vmem:[#allocation2 + $0x209] sm:$0xff]  ;;  %v1443_v2 = vld [vmem:[#allocation2 + $0x211] sm:$0xff]  ;;  %v10928_v5 = vpop.f32.mrb[73].mxu0 }
 0x187   : > { %1304 = vst.msk [vmem:[#allocation2 + $0x238] sm:$0xff] %vm384_vm4, %v1232_v58  ;;  %v1371_v1 = vld [vmem:[#allocation2 + $0x210] sm:$0xff]  ;;  %12633 = vst [vmem:[#allocation12_spill] sm:$0xff] %v10928_v5  ;;  %v1514_v6 = vmax.f32 %v1370_v59, %v1442_v25  ;;  %v1731_v9 = vld [vmem:[#allocation2 + $0x1c0] ss:$2 sm:$0xf] }
 0x188   : > { %1303 = vst.msk [vmem:[#allocation2 + $0x230] sm:$0xff] %vm384_vm4, %v1231_v60  ;;  %v1515_v8 = vmax.f32 %v1371_v1, %v1443_v2  ;;  %1662 = vst.msk [vmem:[#allocation2 + $0x1e0] sm:$0xff] %vm384_vm4, %v1590_v62  ;;  %v1372_v14 = vld [vmem:[#allocation2 + $0x218] sm:$0xff]  ;;  %v1746_v25 = vld [vmem:[#allocation3 + $0x7] sm:$0xff] }
 0x189   : > { %1663 = vst.msk [vmem:[#allocation2 + $0x1e8] sm:$0xff] %vm384_vm4, %v1591_v63  ;;  %v1592_v13 = vmax.f32 %v1511_v36, %v1514_v6  ;;  %v10934_v20 = vpop.f32.mrb[74].mxu0  ;;  %v1374_v34 = vld [vmem:[#allocation2 + $0x228] sm:$0xff]  ;;  %v1528_v36 = vmax.f32 %v1522_v12, %v1525_v18  ;;  %v2418_v1 = vld [vmem:[%s12592_s3 + $0x50] sm:$0xff]  ;;  %v2419_v2 = vld [vmem:[%s12592_s3 + $0x58] sm:$0xff] }
 0x18a   : > { %1733 = vst.msk [vmem:[#allocation3 + $0xc1] sm:$0xf] %vm1678_vm5, %v1731_v9  ;;  %v1593_v19 = vmax.f32 %v1512_v54, %v1515_v8  ;;  %12634 = vst [vmem:[#allocation13_spill] sm:$0xff] %v10934_v20  ;;  %v1373_v21 = vld [vmem:[#allocation2 + $0x220] sm:$0xff]  ;;  %v10936_v24 = vpop.f32.mrb[75].mxu0  ;;  %v11192_v20 = vld [vmem:[#allocation3 + $0xa9] sm:$0xff] }
 0x18b   : > { %v1445_v22 = vld [vmem:[#allocation2 + $0x221] sm:$0xff]  ;;  %v1444_v23 = vld [vmem:[#allocation2 + $0x219] sm:$0xff]  ;;  %12635 = vst [vmem:[#allocation14_spill] sm:$0xff] %v10936_v24  ;;  %1664 = vst.msk [vmem:[#allocation2 + $0x1f0] sm:$0xff] %vm384_vm4, %v1592_v13 }
 0x18c   : > { %v1517_v26 = vmax.f32 %v1373_v21, %v1445_v22  ;;  %v1516_v27 = vmax.f32 %v1372_v14, %v1444_v23  ;;  %1665 = vst.msk [vmem:[#allocation2 + $0x1f8] sm:$0xff] %vm384_vm4, %v1593_v19  ;;  %v2765_v9 = vld [vmem:[%s12592_s3 + $0x60] sm:$0xff]  ;;  %v11003_v14 = vld [vmem:[#allocation3 + $0x2f] sm:$0xff]  ;;  %v11023_v21 = vld [vmem:[#allocation3 + $0x57] sm:$0xff] }
 0x18d   : > { %v10940_v28 = vld [vmem:[#allocation3 + $0xb8] sm:$0xff]  ;;  %v9518_v12 = vpack.c.bf16 %v2766_v10, %v2765_v9  ;;  %v10999_v13 = vld [vmem:[#allocation3 + $0x27] sm:$0xff]  ;;  %v11019_v19 = vld [vmem:[#allocation3 + $0x4f] sm:$0xff]  ;;  %12642 = vst [vmem:[#allocation21_spill] sm:$0xff] %v11192_v20 }
 0x18e   : > { %8617 = vmatprep.mubr.msk.f32.mxu1 %vm384_vm4, %v10940_v28  ;;  %v1595_v30 = vmax.f32 %v1514_v6, %v1517_v26  ;;  %v1376_v31 = vld [vmem:[#allocation2 + $0x238] sm:$0xff]  ;;  %v1594_v37 = vmax.f32 %v1513_v55, %v1516_v27  ;;  %v1747_v6 = vld [vmem:[#allocation3 + $0xf] sm:$0xff]  ;;  %v11015_v18 = vld [vmem:[#allocation3 + $0x47] sm:$0xff] }
 0x18f   : > { %v1448_v33 = vld [vmem:[#allocation2 + $0x239] sm:$0xff]  ;;  %v1375_v40 = vld [vmem:[#allocation2 + $0x230] sm:$0xff]  ;;  %v11031_v23 = vld [vmem:[#allocation3 + $0x67] sm:$0xff] }
 0x190   : > { %v1520_v39 = vmax.f32 %v1376_v31, %v1448_v33  ;;  %v1446_v41 = vld [vmem:[#allocation2 + $0x229] sm:$0xff]  ;;  %v1447_v42 = vld [vmem:[#allocation2 + $0x231] sm:$0xff]  ;;  %1666 = vst.msk [vmem:[#allocation2 + $0x200] sm:$0xff] %vm384_vm4, %v1594_v37  ;;  %1667 = vst.msk [vmem:[#allocation2 + $0x208] sm:$0xff] %vm384_vm4, %v1595_v30 }
 0x191   : > { %v1518_v43 = vmax.f32 %v1374_v34, %v1446_v41  ;;  %v1519_v45 = vmax.f32 %v1375_v40, %v1447_v42  ;;  %v10946_v46 = vld [vmem:[#allocation3 + $0xc0] sm:$0xff]  ;;  %v11051_v31 = vld [vmem:[#allocation3 + $0x8f] sm:$0xff]  ;;  %v11055_v33 = vld [vmem:[#allocation3 + $0x97] sm:$0xff] }
 0x192   : > { %v1735_v47 = vld [vmem:[#allocation2 + $0x1e0] ss:$2 sm:$0xff]  ;;  %v1598_v48 = vmax.f32 %v1517_v26, %v1520_v39  ;;  %v1601_v49 = vmax.f32 %v1520_v39, %v1529_v29  ;;  %8618 = vmatmul.mubr.msk.f32.gmra.mrb[10].mxu1 %vm384_vm4, %v10946_v46  ;;  %v1737_v55 = vld [vmem:[#allocation2 + $0x1f0] ss:$2 sm:$0xf]  ;;  %v11071_v37 = vld [vmem:[#allocation3 + $0xb7] sm:$0xff] }
 0x193   : > { %1738 = vst.msk [vmem:[#allocation3 + $0xc9] sm:$0xff] %vm384_vm4, %v1735_v47  ;;  %v1596_v50 = vmax.f32 %v1515_v8, %v1518_v43  ;;  %v1597_v52 = vmax.f32 %v1516_v27, %v1519_v45  ;;  %v1599_v53 = vmax.f32 %v1518_v43, %v1527_v35  ;;  %v1600_v54 = vmax.f32 %v1519_v45, %v1528_v36  ;;  %v11027_v22 = vld [vmem:[#allocation3 + $0x5f] sm:$0xff]  ;;  %v11035_v26 = vld [vmem:[#allocation3 + $0x6f] sm:$0xff]  ;;  %v11039_v27 = vld [vmem:[#allocation3 + $0x77] sm:$0xff] }
 0x194   : > { %1670 = vst.msk [vmem:[#allocation2 + $0x220] sm:$0xff] %vm384_vm4, %v1598_v48  ;;  %1673 = vst.msk [vmem:[#allocation2 + $0x238] sm:$0xff] %vm384_vm4, %v1601_v49  ;;  %v9514_v8 = vpack.c.bf16 %v2419_v2, %v2418_v1  ;;  %v11043_v29 = vld [vmem:[#allocation3 + $0x7f] sm:$0xff]  ;;  %v11047_v30 = vld [vmem:[#allocation3 + $0x87] sm:$0xff] }
 0x195   : > { %1668 = vst.msk [vmem:[#allocation2 + $0x210] sm:$0xff] %vm384_vm4, %v1596_v50  ;;  %1669 = vst.msk [vmem:[#allocation2 + $0x218] sm:$0xff] %vm384_vm4, %v1597_v52  ;;  %v11059_v34 = vld [vmem:[#allocation3 + $0x9f] sm:$0xff]  ;;  %v11063_v35 = vld [vmem:[#allocation3 + $0xa7] sm:$0xff] }
 0x196   : > { %1671 = vst.msk [vmem:[#allocation2 + $0x228] sm:$0xff] %vm384_vm4, %v1599_v53  ;;  %1672 = vst.msk [vmem:[#allocation2 + $0x230] sm:$0xff] %vm384_vm4, %v1600_v54  ;;  %v11067_v36 = vld [vmem:[#allocation3 + $0xaf] sm:$0xff]  ;;  %v11075_v39 = vld [vmem:[#allocation3 + $0xbf] sm:$0xff] }
 0x197   : > { %1739 = vst.msk [vmem:[#allocation3 + $0xd1] sm:$0xf] %vm1678_vm5, %v1737_v55  ;;  %v2388_v43 = vld [vmem:[#allocation3 + $0x9] sm:$0xff]  ;;  %v2768_v48 = vld [vmem:[%s12592_s3 + $0x78] sm:$0xff]  ;;  %v3114_v53 = vld [vmem:[%s12592_s3 + $0x80] sm:$0xff] }
 0x198   : > { %v2767_v47 = vld [vmem:[%s12592_s3 + $0x70] sm:$0xff]  ;;  %v11102_v50 = vld [vmem:[#allocation3 + $0x19] sm:$0xff]  ;;  %v3115_v54 = vld [vmem:[%s12592_s3 + $0x88] sm:$0xff] }
 0x199   : > { %v2389_v49 = vld [vmem:[#allocation3 + $0x11] sm:$0xff]  ;;  %v9522_v52 = vpack.c.bf16 %v2768_v48, %v2767_v47  ;;  %v11113_v55 = vld [vmem:[#allocation3 + $0x21] sm:$0xff]  ;;  %v11128_v1 = vld [vmem:[#allocation3 + $0x39] sm:$0xff] }
 0x19a   : > { %v10958_v57 = vld [vmem:[#allocation3 + $0xc8] sm:$0xff]  ;;  %v11144_v9 = vld [vmem:[#allocation3 + $0x59] sm:$0xff]  ;;  %v11158_v47 = vld [vmem:[#allocation3 + $0x71] sm:$0xff] }
 0x19b   : > { %8620 = vmatprep.mubr.msk.f32.mxu1 %vm384_vm4, %v10958_v57  ;;  %v1743_v58 = vld [vmem:[#allocation2 + $0x220] ss:$2 sm:$0xf]  ;;  %v11079_v40 = vld [vmem:[#allocation3 + $0xc7] sm:$0xff]  ;;  %v11196_v5 = vld [vmem:[#allocation3 + $0xb1] sm:$0xff] }
 0x19c   : > { %v1741_v60 = vld [vmem:[#allocation2 + $0x210] ss:$2 sm:$0xff]  ;;  %1745 = vst.msk [vmem:[#allocation3 + $0xe1] sm:$0xf] %vm1678_vm5, %v1743_v58  ;;  %v11115_v58 = vpack.c.bf16 %v3115_v54, %v3114_v53  ;;  %v11132_v2 = vld [vmem:[#allocation3 + $0x41] sm:$0xff]  ;;  %12643 = vst [vmem:[#allocation22_spill] sm:$0xff] %v11196_v5 }
 0x19d   : > { %1744 = vst.msk [vmem:[#allocation3 + $0xd9] sm:$0xff] %vm384_vm4, %v1741_v60  ;;  %v11119_v60 = vld [vmem:[#allocation3 + $0x29] sm:$0xff]  ;;  %v11148_v10 = vld [vmem:[#allocation3 + $0x61] sm:$0xff]  ;;  %v11176_v54 = vld [vmem:[#allocation3 + $0x91] sm:$0xff] }
 0x19e   : > { %v10962_v59 = vld [vmem:[#allocation3 + $0xd0] sm:$0xff]  ;;  %v11200_v44 = vld [vmem:[#allocation3 + $0xb9] sm:$0xff] }
 0x19f   : > { %8621 = vmatmul.mubr.msk.f32.gmra.mrb[12].mxu1 %vm384_vm4, %v10962_v59  ;;  %v11083_v41 = vld [vmem:[#allocation3 + $0xcf] sm:$0xff]  ;;  %12644 = vst [vmem:[#allocation23_spill] sm:$0xff] %v11200_v44 }
 0x1a0   : > { %v11172_v53 = vld [vmem:[#allocation3 + $0x89] sm:$0xff] }
 0x1a4   : > { %v10968_v62 = vld [vmem:[#allocation3 + $0xd8] sm:$0xff]  ;;  %v10970_v63 = vld [vmem:[#allocation3 + $0xe0] sm:$0xff] }
 0x1a5   : > { %8623 = vmatprep.mubr.msk.f32.mxu1 %vm384_vm4, %v10968_v62  ;;  %v11087_v42 = vld [vmem:[#allocation3 + $0xd7] sm:$0xff]  ;;  %v11091_v45 = vld [vmem:[#allocation3 + $0xdf] sm:$0xff] }
 0x1a6   : > { %8624 = vmatmul.mubr.msk.f32.gmra.mrb[14].mxu1 %vm384_vm4, %v10970_v63  ;;  %12636 = vst [vmem:[#allocation15_spill] sm:$0xff] %v11091_v45 }
 0x1a7   : > { %8634 = vmatprep.mubr.msk.f32.mxu1 %vm384_vm4, %v1746_v25  ;;  %v11124_v25 = vld [vmem:[#allocation3 + $0x31] sm:$0xff] }
 0x1aa   : > { %8635 = vmatmul.mubr.msk.f32.vlgmr.msra.gmra.mrb[16].mxu1 %vm384_vm4, %v1747_v6  ;;  %v11136_v6 = vld [vmem:[#allocation3 + $0x49] sm:$0xff] }
 0x1ab   : > { %9513 = vmatpush3.bf16.msra.mxu1 %v10797_v61  ;;  %8637 = vmatprep.mubr.msk.f32.mxu1 %vm384_vm4, %v10983_v7  ;;  %v11007_v61 = vld [vmem:[#allocation3 + $0x37] sm:$0xff] }
 0x1ac   : > { %9515 = vmatprep.subr.bf16.mxu1 %v9514_v8 }
 0x1ae   : > { %8638 = vmatmul.mubr.msk.f32.gmra.mrb[18].mxu1 %vm384_vm4, %v10995_v11 }
 0x1af   : > { %8640 = vmatprep.mubr.msk.f32.mxu1 %vm384_vm4, %v10999_v13  ;;  %9517 = vmatpush3.bf16.msra.mxu1 %v9514_v8  ;;  %v11140_v8 = vld [vmem:[#allocation3 + $0x51] sm:$0xff] }
 0x1b0   : > { %9519 = vmatprep.subr.bf16.mxu1 %v9518_v12 }
 0x1b2   : > { %8641 = vmatmul.mubr.msk.f32.gmra.mrb[20].mxu1 %vm384_vm4, %v11003_v14 }
 0x1b3   : > { %8643 = vmatprep.mubr.msk.f32.mxu1 %vm384_vm4, %v11007_v61 }
 0x1b6   : > { %8644 = vmatmul.mubr.msk.f32.gmra.mrb[22].mxu1 %vm384_vm4, %v11011_v15 }
 0x1b7   : > { %8646 = vmatprep.mubr.msk.f32.mxu1 %vm384_vm4, %v11015_v18 }
 0x1ba   : > { %8647 = vmatmul.mubr.msk.f32.gmra.mrb[24].mxu1 %vm384_vm4, %v11019_v19 }
 0x1bb   : > { %8649 = vmatprep.mubr.msk.f32.mxu1 %vm384_vm4, %v11023_v21 }
 0x1be   : > { %8650 = vmatmul.mubr.msk.f32.gmra.mrb[26].mxu1 %vm384_vm4, %v11027_v22 }
 0x1bf   : > { %8652 = vmatprep.mubr.msk.f32.mxu1 %vm384_vm4, %v11031_v23 }
 0x1c2   : > { %8653 = vmatmul.mubr.msk.f32.gmra.mrb[0].mxu1 %vm384_vm4, %v11035_v26 }
 0x1c3   : > { %8655 = vmatprep.mubr.msk.f32.mxu1 %vm384_vm4, %v11039_v27 }
 0x1c6   : > { %8656 = vmatmul.mubr.msk.f32.gmra.mrb[2].mxu1 %vm384_vm4, %v11043_v29 }
 0x1c7   : > { %8658 = vmatprep.mubr.msk.f32.mxu1 %vm384_vm4, %v11047_v30 }
 0x1ca   : > { %8659 = vmatmul.mubr.msk.f32.gmra.mrb[4].mxu1 %vm384_vm4, %v11051_v31 }
 0x1cb   : > { %8661 = vmatprep.mubr.msk.f32.mxu1 %vm384_vm4, %v11055_v33 }
 0x1ce   : > { %8662 = vmatmul.mubr.msk.f32.gmra.mrb[6].mxu1 %vm384_vm4, %v11059_v34 }
 0x1cf   : > { %8664 = vmatprep.mubr.msk.f32.mxu1 %vm384_vm4, %v11063_v35 }
 0x1d2   : > { %8665 = vmatmul.mubr.msk.f32.gmra.mrb[8].mxu1 %vm384_vm4, %v11067_v36 }
 0x1d3   : > { %8667 = vmatprep.mubr.msk.f32.mxu1 %vm384_vm4, %v11071_v37 }
 0x1d6   : > { %8668 = vmatmul.mubr.msk.f32.gmra.mrb[10].mxu1 %vm384_vm4, %v11075_v39 }
 0x1d7   : > { %8670 = vmatprep.mubr.msk.f32.mxu1 %vm384_vm4, %v11079_v40 }
 0x1da   : > { %8671 = vmatmul.mubr.msk.f32.gmra.mrb[12].mxu1 %vm384_vm4, %v11083_v41 }
 0x1db   : > { %8673 = vmatprep.mubr.msk.f32.mxu1 %vm384_vm4, %v11087_v42 }
 0x1de   : > { %8674 = vmatmul.mubr.msk.f32.gmra.mrb[14].mxu1 %vm384_vm4, %v11091_v45 }
 0x1df   : > { %8684 = vmatprep.mubr.msk.f32.mxu1 %vm384_vm4, %v2388_v43 }
 0x1e2   : > { %8685 = vmatmul.mubr.msk.f32.vlgmr.msra.gmra.mrb[16].mxu1 %vm384_vm4, %v2389_v49  ;;  %v11164_v49 = vld [vmem:[#allocation3 + $0x79] sm:$0xff] }
 0x1e3   : > { %9521 = vmatpush3.bf16.msra.mxu1 %v9518_v12  ;;  %8687 = vmatprep.mubr.msk.f32.mxu1 %vm384_vm4, %v11102_v50  ;;  %v11152_v12 = vld [vmem:[#allocation3 + $0x69] sm:$0xff] }
 0x1e4   : > { %9523 = vmatprep.subr.bf16.mxu1 %v9522_v52 }
 0x1e6   : > { %8688 = vmatmul.mubr.msk.f32.gmra.mrb[18].mxu1 %vm384_vm4, %v11113_v55 }
 0x1e7   : > { %8690 = vmatprep.mubr.msk.f32.mxu1 %vm384_vm4, %v11119_v60  ;;  %9525 = vmatpush3.bf16.msra.mxu1 %v9522_v52  ;;  %v11168_v52 = vld [vmem:[#allocation3 + $0x81] sm:$0xff] }
 0x1e8   : > { %9527 = vmatprep.subr.bf16.mxu1 %v11115_v58 }
 0x1ea   : > { %8691 = vmatmul.mubr.msk.f32.gmra.mrb[20].mxu1 %vm384_vm4, %v11124_v25 }
 0x1eb   : > { %8693 = vmatprep.mubr.msk.f32.mxu1 %vm384_vm4, %v11128_v1 }
 0x1ee   : > { %8694 = vmatmul.mubr.msk.f32.gmra.mrb[22].mxu1 %vm384_vm4, %v11132_v2 }
 0x1ef   : > { %8696 = vmatprep.mubr.msk.f32.mxu1 %vm384_vm4, %v11136_v6 }
 0x1f2   : > { %8697 = vmatmul.mubr.msk.f32.gmra.mrb[24].mxu1 %vm384_vm4, %v11140_v8 }
 0x1f3   : > { %8699 = vmatprep.mubr.msk.f32.mxu1 %vm384_vm4, %v11144_v9 }
 0x1f6   : > { %8700 = vmatmul.mubr.msk.f32.gmra.mrb[26].mxu1 %vm384_vm4, %v11148_v10 }
 0x1f7   : > { %8702 = vmatprep.mubr.msk.f32.mxu1 %vm384_vm4, %v11152_v12 }
 0x1f8   : > { %v11156_v43 = vpop.f32.mrb[76].mxu0 }
 0x1f9   : > { %12637 = vst [vmem:[#allocation16_spill] sm:$0xff] %v11156_v43  ;;  %v11160_v48 = vpop.f32.mrb[77].mxu0  ;;  %v11186_v43 = vld [vmem:[#allocation3 + $0xa1] sm:$0xff] }
 0x1fa   : > { %12638 = vst [vmem:[#allocation17_spill] sm:$0xff] %v11160_v48  ;;  %8703 = vmatmul.mubr.msk.f32.gmra.mrb[0].mxu1 %vm384_vm4, %v11158_v47  ;;  %12640 = vst [vmem:[#allocation19_spill] sm:$0xff] %v11186_v43 }
 0x1fb   : > { %8705 = vmatprep.mubr.msk.f32.mxu1 %vm384_vm4, %v11164_v49 }
 0x1fe   : > { %8706 = vmatmul.mubr.msk.f32.gmra.mrb[2].mxu1 %vm384_vm4, %v11168_v52 }
 0x1ff   : > { %8708 = vmatprep.mubr.msk.f32.mxu1 %vm384_vm4, %v11172_v53 }
 0x202   : > { %8709 = vmatmul.mubr.msk.f32.gmra.mrb[4].mxu1 %vm384_vm4, %v11176_v54 }
 0x203   : > { %8711 = vmatprep.mubr.msk.f32.mxu1 %vm384_vm4, %v11180_v4 }
 0x204   : > { %v11184_v48 = vpop.f32.mrb[78].mxu0 }
 0x205   : > { %12639 = vst [vmem:[#allocation18_spill] sm:$0xff] %v11184_v48  ;;  %v11188_v24 = vpop.f32.mrb[79].mxu0  ;;  %v11204_v48 = vld [vmem:[#allocation3 + $0xc1] sm:$0xff] }
 0x206   : > { %12641 = vst [vmem:[#allocation20_spill] sm:$0xff] %v11188_v24  ;;  %8712 = vmatmul.mubr.msk.f32.gmra.mrb[6].mxu1 %vm384_vm4, %v11186_v43  ;;  %12645 = vst [vmem:[#allocation24_spill] sm:$0xff] %v11204_v48  ;;  %v11208_v24 = vld [vmem:[#allocation3 + $0xc9] sm:$0xff]  ;;  %v11214_v43 = vld [vmem:[#allocation3 + $0xd1] sm:$0xff] }
 0x207   : > { %8714 = vmatprep.mubr.msk.f32.mxu1 %vm384_vm4, %v11192_v20  ;;  %12646 = vst [vmem:[#allocation25_spill] sm:$0xff] %v11208_v24  ;;  %12648 = vst [vmem:[#allocation27_spill] sm:$0xff] %v11214_v43 }
 0x20a   : > { %8715 = vmatmul.mubr.msk.f32.gmra.mrb[8].mxu1 %vm384_vm4, %v11196_v5 }
 0x20b   : > { %8717 = vmatprep.mubr.msk.f32.mxu1 %vm384_vm4, %v11200_v44  ;;  %v11220_v44 = vld [vmem:[#allocation3 + $0xd9] sm:$0xff] }
 0x20c   : > { %12650 = vst [vmem:[#allocation29_spill] sm:$0xff] %v11220_v44 }
 0x20e   : > { %8718 = vmatmul.mubr.msk.f32.gmra.mrb[10].mxu1 %vm384_vm4, %v11204_v48  ;;  %v11224_v48 = vld [vmem:[#allocation3 + $0xe1] sm:$0xff] }
 0x20f   : > { %8720 = vmatprep.mubr.msk.f32.mxu1 %vm384_vm4, %v11208_v24  ;;  %12651 = vst [vmem:[#allocation30_spill] sm:$0xff] %v11224_v48  ;;  %v3116_v24 = vld [vmem:[%s12592_s3 + $0x90] sm:$0xff] }
 0x210   : > { %v11212_v20 = vpop.f32.mrb[80].mxu0 }
 0x211   : > { %12647 = vst [vmem:[#allocation26_spill] sm:$0xff] %v11212_v20  ;;  %v11216_v5 = vpop.f32.mrb[81].mxu0  ;;  %v3117_v20 = vld [vmem:[%s12592_s3 + $0x98] sm:$0xff] }
 0x212   : > { %12649 = vst [vmem:[#allocation28_spill] sm:$0xff] %v11216_v5  ;;  %8721 = vmatmul.mubr.msk.f32.gmra.mrb[12].mxu1 %vm384_vm4, %v11214_v43  ;;  %v9530_v5 = vpack.c.bf16 %v3117_v20, %v3116_v24  ;;  %v3464_v43 = vld [vmem:[%s12592_s3 + $0xa8] sm:$0xff]  ;;  %v3086_v24 = vld [vmem:[#allocation3 + $0x18] sm:$0xff] }
 0x213   : > { %8723 = vmatprep.mubr.msk.f32.mxu1 %vm384_vm4, %v11220_v44  ;;  %v3463_v44 = vld [vmem:[%s12592_s3 + $0xa0] sm:$0xff] }
 0x216   : > { %8724 = vmatmul.mubr.msk.f32.gmra.mrb[14].mxu1 %vm384_vm4, %v11224_v48  ;;  %v9534_v48 = vpack.c.bf16 %v3464_v43, %v3463_v44  ;;  %v11295_v44 = vld [vmem:[#allocation3 + $0xe7] sm:$0xff] }
 0x217   : > { %8734 = vmatprep.mubr.msk.f32.mxu1 %vm384_vm4, %v10983_v7  ;;  %12654 = vst [vmem:[#allocation33_spill] sm:$0xff] %v11295_v44  ;;  %v3087_v43 = vld [vmem:[#allocation3 + $0x20] sm:$0xff] }
 0x21a   : > { %8735 = vmatmul.mubr.msk.f32.vlgmr.msra.gmra.mrb[16].mxu1 %vm384_vm4, %v10995_v11  ;;  %v3465_v11 = vld [vmem:[%s12592_s3 + $0xb0] sm:$0xff] }
 0x21b   : > { %9529 = vmatpush3.bf16.msra.mxu1 %v11115_v58  ;;  %8737 = vmatprep.mubr.msk.f32.mxu1 %vm384_vm4, %v10999_v13  ;;  %v3466_v58 = vld [vmem:[%s12592_s3 + $0xb8] sm:$0xff] }
 0x21c   : > { %9531 = vmatprep.subr.bf16.mxu1 %v9530_v5  ;;  %v11247_v7 = vpop.f32.mrb[82].mxu0 }
 0x21d   : > { %12652 = vst [vmem:[#allocation31_spill] sm:$0xff] %v11247_v7  ;;  %v11249_v20 = vpop.f32.mrb[83].mxu0  ;;  %v3812_v7 = vld [vmem:[%s12592_s3 + $0xc0] sm:$0xff] }
 0x21e   : > { %12653 = vst [vmem:[#allocation32_spill] sm:$0xff] %v11249_v20  ;;  %8738 = vmatmul.mubr.msk.f32.gmra.mrb[18].mxu1 %vm384_vm4, %v11003_v14  ;;  %v9538_v20 = vpack.c.bf16 %v3466_v58, %v3465_v11  ;;  %v11327_v11 = vld [vmem:[#allocation3 + $0x38] sm:$0xff]  ;;  %v11331_v58 = vld [vmem:[#allocation3 + $0x40] sm:$0xff] }
 0x21f   : > { %8740 = vmatprep.mubr.msk.f32.mxu1 %vm384_vm4, %v11007_v61  ;;  %9533 = vmatpush3.bf16.msra.mxu1 %v9530_v5  ;;  %v11301_v5 = vld [vmem:[#allocation3 + $0xef] sm:$0xff] }
 0x220   : > { %9535 = vmatprep.subr.bf16.mxu1 %v9534_v48  ;;  %12655 = vst [vmem:[#allocation34_spill] sm:$0xff] %v11301_v5 }
 0x222   : > { %8741 = vmatmul.mubr.msk.f32.gmra.mrb[20].mxu1 %vm384_vm4, %v11011_v15 }
 0x223   : > { %8743 = vmatprep.mubr.msk.f32.mxu1 %vm384_vm4, %v11015_v18 }
 0x226   : > { %8744 = vmatmul.mubr.msk.f32.gmra.mrb[22].mxu1 %vm384_vm4, %v11019_v19 }
 0x227   : > { %8746 = vmatprep.mubr.msk.f32.mxu1 %vm384_vm4, %v11023_v21 }
 0x22a   : > { %8747 = vmatmul.mubr.msk.f32.gmra.mrb[24].mxu1 %vm384_vm4, %v11027_v22 }
 0x22b   : > { %8749 = vmatprep.mubr.msk.f32.mxu1 %vm384_vm4, %v11031_v23 }
 0x22e   : > { %8750 = vmatmul.mubr.msk.f32.gmra.mrb[26].mxu1 %vm384_vm4, %v11035_v26 }
 0x22f   : > { %8752 = vmatprep.mubr.msk.f32.mxu1 %vm384_vm4, %v11039_v27 }
 0x232   : > { %8753 = vmatmul.mubr.msk.f32.gmra.mrb[0].mxu1 %vm384_vm4, %v11043_v29 }
 0x233   : > { %8755 = vmatprep.mubr.msk.f32.mxu1 %vm384_vm4, %v11047_v30 }
 0x236   : > { %8756 = vmatmul.mubr.msk.f32.gmra.mrb[2].mxu1 %vm384_vm4, %v11051_v31 }
 0x237   : > { %8758 = vmatprep.mubr.msk.f32.mxu1 %vm384_vm4, %v11055_v33 }
 0x23a   : > { %8759 = vmatmul.mubr.msk.f32.gmra.mrb[4].mxu1 %vm384_vm4, %v11059_v34 }
 0x23b   : > { %8761 = vmatprep.mubr.msk.f32.mxu1 %vm384_vm4, %v11063_v35 }
 0x23e   : > { %8762 = vmatmul.mubr.msk.f32.gmra.mrb[6].mxu1 %vm384_vm4, %v11067_v36 }
 0x23f   : > { %8764 = vmatprep.mubr.msk.f32.mxu1 %vm384_vm4, %v11071_v37 }
 0x242   : > { %8765 = vmatmul.mubr.msk.f32.gmra.mrb[8].mxu1 %vm384_vm4, %v11075_v39 }
 0x243   : > { %8767 = vmatprep.mubr.msk.f32.mxu1 %vm384_vm4, %v11079_v40 }
 0x246   : > { %8768 = vmatmul.mubr.msk.f32.gmra.mrb[10].mxu1 %vm384_vm4, %v11083_v41 }
 0x247   : > { %8770 = vmatprep.mubr.msk.f32.mxu1 %vm384_vm4, %v11087_v42 }
 0x24a   : > { %8771 = vmatmul.mubr.msk.f32.gmra.mrb[12].mxu1 %vm384_vm4, %v11091_v45  ;;  %v11319_v45 = vld [vmem:[#allocation3 + $0x28] sm:$0xff] }
 0x24b   : > { %8773 = vmatprep.mubr.msk.f32.mxu1 %vm384_vm4, %v11295_v44  ;;  %v3813_v44 = vld [vmem:[%s12592_s3 + $0xc8] sm:$0xff] }
 0x24e   : > { %8774 = vmatmul.mubr.msk.f32.gmra.mrb[14].mxu1 %vm384_vm4, %v11301_v5  ;;  %v11323_v5 = vld [vmem:[#allocation3 + $0x30] sm:$0xff] }
 0x24f   : > { %8784 = vmatprep.mubr.msk.f32.mxu1 %vm384_vm4, %v3086_v24  ;;  %v9542_v24 = vpack.c.bf16 %v3813_v44, %v3812_v7  ;;  %v11339_v7 = vld [vmem:[#allocation3 + $0x50] sm:$0xff]  ;;  %v11343_v44 = vld [vmem:[#allocation3 + $0x58] sm:$0xff] }
 0x252   : > { %8785 = vmatmul.mubr.msk.f32.vlgmr.msra.gmra.mrb[16].mxu1 %vm384_vm4, %v3087_v43  ;;  %v11351_v43 = vld [vmem:[#allocation3 + $0x68] sm:$0xff] }
 0x253   : > { %9537 = vmatpush3.bf16.msra.mxu1 %v9534_v48  ;;  %8787 = vmatprep.mubr.msk.f32.mxu1 %vm384_vm4, %v11319_v45  ;;  %v11335_v48 = vld [vmem:[#allocation3 + $0x48] sm:$0xff] }
 0x254   : > { %9539 = vmatprep.subr.bf16.mxu1 %v9538_v20  ;;  %12656 = vst [vmem:[#allocation35_spill] sm:$0xff] %v11335_v48 }
 0x256   : > { %8788 = vmatmul.mubr.msk.f32.gmra.mrb[18].mxu1 %vm384_vm4, %v11323_v5 }
 0x257   : > { %8790 = vmatprep.mubr.msk.f32.mxu1 %vm384_vm4, %v11327_v11  ;;  %9541 = vmatpush3.bf16.msra.mxu1 %v9538_v20  ;;  %v11347_v20 = vld [vmem:[#allocation3 + $0x60] sm:$0xff] }
 0x258   : > { %9543 = vmatprep.subr.bf16.mxu1 %v9542_v24 }
 0x25a   : > { %8791 = vmatmul.mubr.msk.f32.gmra.mrb[20].mxu1 %vm384_vm4, %v11331_v58 }
 0x25b   : > { %8793 = vmatprep.mubr.msk.f32.mxu1 %vm384_vm4, %v11335_v48  ;;  %v11355_v48 = vld [vmem:[#allocation3 + $0x70] sm:$0xff] }
 0x25e   : > { %8794 = vmatmul.mubr.msk.f32.gmra.mrb[22].mxu1 %vm384_vm4, %v11339_v7 }
 0x25f   : > { %8796 = vmatprep.mubr.msk.f32.mxu1 %vm384_vm4, %v11343_v44 }
 0x262   : > { %8797 = vmatmul.mubr.msk.f32.gmra.mrb[24].mxu1 %vm384_vm4, %v11347_v20 }
 0x263   : > { %8799 = vmatprep.mubr.msk.f32.mxu1 %vm384_vm4, %v11351_v43 }
 0x266   : > { %8800 = vmatmul.mubr.msk.f32.gmra.mrb[26].mxu1 %vm384_vm4, %v11355_v48 }
 0x267   : > { %8802 = vmatprep.mubr.msk.f32.mxu1 %vm384_vm4, %v10815_v16  ;;  %v11385_v16 = vld [vmem:[#allocation3 + $0xe8] sm:$0xff] }
 0x26a   : > { %8803 = vmatmul.mubr.msk.f32.gmra.mrb[0].mxu1 %vm384_vm4, %v10826_v32  ;;  %v11391_v32 = vld [vmem:[#allocation3 + $0xf0] sm:$0xff] }
 0x26b   : > { %8805 = vmatprep.mubr.msk.f32.mxu1 %vm384_vm4, %v10850_v0  ;;  %12657 = vst [vmem:[#allocation36_spill] sm:$0xff] %v11391_v32  ;;  %v3814_v0 = vld [vmem:[%s12592_s3 + $0xd0] sm:$0xff] }
 0x26e   : > { %8806 = vmatmul.mubr.msk.f32.gmra.mrb[2].mxu1 %vm384_vm4, %v10860_v17  ;;  %v3815_v17 = vld [vmem:[%s12592_s3 + $0xd8] sm:$0xff] }
 0x26f   : > { %8808 = vmatprep.mubr.msk.f32.mxu1 %vm384_vm4, %v10878_v51  ;;  %v9546_v51 = vpack.c.bf16 %v3815_v17, %v3814_v0  ;;  %v12661_v0 = vld [vmem:[#allocation23_spill] sm:$0xff]  ;;  %v12662_v17 = vld [vmem:[#allocation24_spill] sm:$0xff] }
 0x272   : > { %8809 = vmatmul.mubr.msk.f32.gmra.mrb[4].mxu1 %vm384_vm4, %v10890_v3  ;;  %v4161_v3 = vld [vmem:[%s12592_s3 + $0xe0] sm:$0xff] }
 0x273   : > { %8811 = vmatprep.mubr.msk.f32.mxu1 %vm384_vm4, %v10908_v38  ;;  %v4162_v38 = vld [vmem:[%s12592_s3 + $0xe8] sm:$0xff] }
 0x276   : > { %8812 = vmatmul.mubr.msk.f32.gmra.mrb[6].mxu1 %vm384_vm4, %v10920_v56 }
 0x277   : > { %8814 = vmatprep.mubr.msk.f32.mxu1 %vm384_vm4, %v10940_v28 }
 0x27a   : > { %8815 = vmatmul.mubr.msk.f32.gmra.mrb[8].mxu1 %vm384_vm4, %v10946_v46 }
 0x27b   : > { %8817 = vmatprep.mubr.msk.f32.mxu1 %vm384_vm4, %v10958_v57 }
 0x27e   : > { %8818 = vmatmul.mubr.msk.f32.gmra.mrb[10].mxu1 %vm384_vm4, %v10962_v59 }
 0x27f   : > { %8820 = vmatprep.mubr.msk.f32.mxu1 %vm384_vm4, %v10968_v62 }
 0x282   : > { %8821 = vmatmul.mubr.msk.f32.gmra.mrb[12].mxu1 %vm384_vm4, %v10970_v63 }
 0x283   : > { %8823 = vmatprep.mubr.msk.f32.mxu1 %vm384_vm4, %v11385_v16 }
 0x286   : > { %8824 = vmatmul.mubr.msk.f32.gmra.mrb[14].mxu1 %vm384_vm4, %v11391_v32  ;;  %v9550_v32 = vpack.c.bf16 %v4162_v38, %v4161_v3  ;;  %v12664_v3 = vld [vmem:[#allocation27_spill] sm:$0xff]  ;;  %v12665_v38 = vld [vmem:[#allocation29_spill] sm:$0xff] }
 0x287   : > { %8834 = vmatprep.mubr.msk.f32.mxu1 %vm384_vm4, %v11102_v50  ;;  %v12658_v50 = vld [vmem:[#allocation19_spill] sm:$0xff] }
 0x28a   : > { %8835 = vmatmul.mubr.msk.f32.vlgmr.msra.gmra.mrb[16].mxu1 %vm384_vm4, %v11113_v55  ;;  %v12659_v55 = vld [vmem:[#allocation21_spill] sm:$0xff] }
 0x28b   : > { %9545 = vmatpush3.bf16.msra.mxu1 %v9542_v24  ;;  %8837 = vmatprep.mubr.msk.f32.mxu1 %vm384_vm4, %v11119_v60  ;;  %v12660_v24 = vld [vmem:[#allocation22_spill] sm:$0xff] }
 0x28c   : > { %9547 = vmatprep.subr.bf16.mxu1 %v9546_v51 }
 0x28e   : > { %8838 = vmatmul.mubr.msk.f32.gmra.mrb[18].mxu1 %vm384_vm4, %v11124_v25 }
 0x28f   : > { %8840 = vmatprep.mubr.msk.f32.mxu1 %vm384_vm4, %v11128_v1  ;;  %9549 = vmatpush3.bf16.msra.mxu1 %v9546_v51  ;;  %v12663_v51 = vld [vmem:[#allocation25_spill] sm:$0xff] }
 0x290   : > { %9551 = vmatprep.subr.bf16.mxu1 %v9550_v32 }
 0x292   : > { %8841 = vmatmul.mubr.msk.f32.gmra.mrb[20].mxu1 %vm384_vm4, %v11132_v2 }
 0x293   : > { %8843 = vmatprep.mubr.msk.f32.mxu1 %vm384_vm4, %v11136_v6 }
 0x296   : > { %8844 = vmatmul.mubr.msk.f32.gmra.mrb[22].mxu1 %vm384_vm4, %v11140_v8 }
 0x297   : > { %8846 = vmatprep.mubr.msk.f32.mxu1 %vm384_vm4, %v11144_v9 }
 0x29a   : > { %8847 = vmatmul.mubr.msk.f32.gmra.mrb[24].mxu1 %vm384_vm4, %v11148_v10 }
 0x29b   : > { %8849 = vmatprep.mubr.msk.f32.mxu1 %vm384_vm4, %v11152_v12 }
 0x29e   : > { %8850 = vmatmul.mubr.msk.f32.gmra.mrb[26].mxu1 %vm384_vm4, %v11158_v47 }
 0x29f   : > { %8852 = vmatprep.mubr.msk.f32.mxu1 %vm384_vm4, %v11164_v49 }
 0x2a2   : > { %8853 = vmatmul.mubr.msk.f32.gmra.mrb[0].mxu1 %vm384_vm4, %v11168_v52 }
 0x2a3   : > { %8855 = vmatprep.mubr.msk.f32.mxu1 %vm384_vm4, %v11172_v53 }
 0x2a6   : > { %8856 = vmatmul.mubr.msk.f32.gmra.mrb[2].mxu1 %vm384_vm4, %v11176_v54 }
 0x2a7   : > { %8858 = vmatprep.mubr.msk.f32.mxu1 %vm384_vm4, %v11180_v4 }
 0x2aa   : > { %8859 = vmatmul.mubr.msk.f32.gmra.mrb[4].mxu1 %vm384_vm4, %v12658_v50  ;;  %v11457_v50 = vld [vmem:[#allocation3 + $0xe9] sm:$0xff] }
 0x2ab   : > { %8861 = vmatprep.mubr.msk.f32.mxu1 %vm384_vm4, %v12659_v55  ;;  %12666 = vst [vmem:[#allocation22_spill] sm:$0xff] %v11457_v50  ;;  %v12667_v55 = vld [vmem:[#allocation30_spill] sm:$0xff] }
 0x2ae   : > { %8862 = vmatmul.mubr.msk.f32.gmra.mrb[6].mxu1 %vm384_vm4, %v12660_v24 }
 0x2af   : > { %8864 = vmatprep.mubr.msk.f32.mxu1 %vm384_vm4, %v12661_v0  ;;  %v11463_v0 = vld [vmem:[#allocation3 + $0xf1] sm:$0xff] }
 0x2b0   : > { %12668 = vst [vmem:[#allocation24_spill] sm:$0xff] %v11463_v0 }
 0x2b2   : > { %8865 = vmatmul.mubr.msk.f32.gmra.mrb[8].mxu1 %vm384_vm4, %v12662_v17 }
 0x2b3   : > { %8867 = vmatprep.mubr.msk.f32.mxu1 %vm384_vm4, %v12663_v51  ;;  %v4163_v51 = vld [vmem:[%s12592_s3 + $0xf0] sm:$0xff] }
 0x2b6   : > { %8868 = vmatmul.mubr.msk.f32.gmra.mrb[10].mxu1 %vm384_vm4, %v12664_v3  ;;  %v4164_v3 = vld [vmem:[%s12592_s3 + $0xf8] sm:$0xff] }
 0x2b7   : > { %8870 = vmatprep.mubr.msk.f32.mxu1 %vm384_vm4, %v12665_v38  ;;  %v4511_v38 = vld [vmem:[%s12592_s3 + $0x108] sm:$0xff] }
 0x2ba   : > { %8871 = vmatmul.mubr.msk.f32.gmra.mrb[12].mxu1 %vm384_vm4, %v12667_v55  ;;  %v9554_v55 = vpack.c.bf16 %v4164_v3, %v4163_v51  ;;  %v11729_v51 = vld [vmem:[%s12593_s4] ss:$0 sm:$0xff]  ;;  %v12684_v3 = vld [vmem:[#allocation11_spill] sm:$0xff] }
 0x2bb   : > { %8873 = vmatprep.mubr.msk.f32.mxu1 %vm384_vm4, %v11457_v50  ;;  %v4510_v50 = vld [vmem:[%s12592_s3 + $0x100] sm:$0xff] }
 0x2be   : > { %8874 = vmatmul.mubr.msk.f32.gmra.mrb[14].mxu1 %vm384_vm4, %v11463_v0  ;;  %v9558_v0 = vpack.c.bf16 %v4511_v38, %v4510_v50 }
 0x2bf   : > { %8884 = vmatprep.mubr.msk.f32.mxu1 %vm384_vm4, %v10999_v13  ;;  %v12669_v13 = vmov 0.0  }
 0x2c0   : > { %420 = vst.msk [vmem:[#allocation5] sm:$0xff] %vm419_vm6, %v12669_v13  ;;  %421 = vst.msk [vmem:[#allocation5 + $0x8] sm:$0xff] %vm419_vm6, %v12669_v13 }
 0x2c1   : > { %422 = vst.msk [vmem:[#allocation5 + $0x10] sm:$0xff] %vm419_vm6, %v12669_v13  ;;  %423 = vst.msk [vmem:[#allocation5 + $0x18] sm:$0xff] %vm419_vm6, %v12669_v13 }
 0x2c2   : > { %8885 = vmatmul.mubr.msk.f32.vlgmr.msra.gmra.mrb[16].mxu1 %vm384_vm4, %v11003_v14  ;;  %424 = vst.msk [vmem:[#allocation5 + $0x20] sm:$0xff] %vm419_vm6, %v12669_v13  ;;  %425 = vst.msk [vmem:[#allocation5 + $0x28] sm:$0xff] %vm419_vm6, %v12669_v13  ;;  %v12670_v14 = vld [vmem:[#allocation15_spill] sm:$0xff] }
 0x2c3   : > { %9553 = vmatpush3.bf16.msra.mxu1 %v9550_v32  ;;  %8887 = vmatprep.mubr.msk.f32.mxu1 %vm384_vm4, %v11007_v61  ;;  %426 = vst.msk [vmem:[#allocation5 + $0x30] sm:$0xff] %vm419_vm6, %v12669_v13  ;;  %427 = vst.msk [vmem:[#allocation5 + $0x38] sm:$0xff] %vm419_vm6, %v12669_v13  ;;  %v12671_v61 = vld [vmem:[#allocation33_spill] sm:$0xff] }
 0x2c4   : > { %9555 = vmatprep.subr.bf16.mxu1 %v9554_v55  ;;  %428 = vst.msk [vmem:[#allocation5 + $0x40] sm:$0xff] %vm419_vm6, %v12669_v13  ;;  %429 = vst.msk [vmem:[#allocation5 + $0x48] sm:$0xff] %vm419_vm6, %v12669_v13  ;;  %v5102_v32 = vld [vmem:[%s12594_s5 + $0x38] sm:$0xff] }
 0x2c5   : > { %430 = vst.msk [vmem:[#allocation5 + $0x50] sm:$0xff] %vm419_vm6, %v12669_v13  ;;  %431 = vst.msk [vmem:[#allocation5 + $0x58] sm:$0xff] %vm419_vm6, %v12669_v13 }
 0x2c6   : > { %8888 = vmatmul.mubr.msk.f32.gmra.mrb[18].mxu1 %vm384_vm4, %v11011_v15  ;;  %v3810_v15 = vld [vmem:[#allocation3 + $0xf7] sm:$0xff] }
 0x2c7   : > { %8890 = vmatprep.mubr.msk.f32.mxu1 %vm384_vm4, %v11015_v18  ;;  %9557 = vmatpush3.bf16.msra.mxu1 %v9554_v55  ;;  %v12672_v18 = vld [vmem:[#allocation34_spill] sm:$0xff] }
 0x2c8   : > { %9559 = vmatprep.subr.bf16.mxu1 %v9558_v0  ;;  %v5385_v55 = vld [vmem:[%s12594_s5 + $0x80] sm:$0xff] }
 0x2ca   : > { %8891 = vmatmul.mubr.msk.f32.gmra.mrb[20].mxu1 %vm384_vm4, %v11019_v19  ;;  %v3811_v19 = vld [vmem:[#allocation3 + $0xff] sm:$0xff] }
 0x2cb   : > { %8893 = vmatprep.mubr.msk.f32.mxu1 %vm384_vm4, %v11023_v21  ;;  %v4512_v21 = vld [vmem:[%s12592_s3 + $0x110] sm:$0xff] }
 0x2ce   : > { %8894 = vmatmul.mubr.msk.f32.gmra.mrb[22].mxu1 %vm384_vm4, %v11027_v22  ;;  %v4513_v22 = vld [vmem:[%s12592_s3 + $0x118] sm:$0xff] }
 0x2cf   : > { %8896 = vmatprep.mubr.msk.f32.mxu1 %vm384_vm4, %v11031_v23  ;;  %v9562_v23 = vpack.c.bf16 %v4513_v22, %v4512_v21 }
 0x2d2   : > { %8897 = vmatmul.mubr.msk.f32.gmra.mrb[24].mxu1 %vm384_vm4, %v11035_v26  ;;  %v12673_v26 = vld [vmem:[#allocation35_spill] sm:$0xff] }
 0x2d3   : > { %8899 = vmatprep.mubr.msk.f32.mxu1 %vm384_vm4, %v11039_v27  ;;  %v4143_v27 = vld [vmem:[#allocation3 + $0x78] sm:$0xff] }
 0x2d6   : > { %8900 = vmatmul.mubr.msk.f32.gmra.mrb[26].mxu1 %vm384_vm4, %v11043_v29  ;;  %v4144_v29 = vld [vmem:[#allocation3 + $0x80] sm:$0xff] }
 0x2d7   : > { %8902 = vmatprep.mubr.msk.f32.mxu1 %vm384_vm4, %v11047_v30  ;;  %v4145_v30 = vld [vmem:[#allocation3 + $0x88] sm:$0xff] }
 0x2da   : > { %8903 = vmatmul.mubr.msk.f32.gmra.mrb[0].mxu1 %vm384_vm4, %v11051_v31  ;;  %v4146_v31 = vld [vmem:[#allocation3 + $0x90] sm:$0xff] }
 0x2db   : > { %8905 = vmatprep.mubr.msk.f32.mxu1 %vm384_vm4, %v11055_v33  ;;  %v4147_v33 = vld [vmem:[#allocation3 + $0x98] sm:$0xff] }
 0x2de   : > { %8906 = vmatmul.mubr.msk.f32.gmra.mrb[2].mxu1 %vm384_vm4, %v11059_v34  ;;  %v4148_v34 = vld [vmem:[#allocation3 + $0xa0] sm:$0xff] }
 0x2df   : > { %8908 = vmatprep.mubr.msk.f32.mxu1 %vm384_vm4, %v11063_v35  ;;  %v4149_v35 = vld [vmem:[#allocation3 + $0xa8] sm:$0xff] }
 0x2e2   : > { %8909 = vmatmul.mubr.msk.f32.gmra.mrb[4].mxu1 %vm384_vm4, %v11067_v36  ;;  %v12679_v36 = vld [vmem:[#allocation27_spill] sm:$0xff] }
 0x2e3   : > { %8911 = vmatprep.mubr.msk.f32.mxu1 %vm384_vm4, %v11071_v37  ;;  %v12681_v37 = vld [vmem:[#allocation30_spill] sm:$0xff] }
 0x2e6   : > { %8912 = vmatmul.mubr.msk.f32.gmra.mrb[6].mxu1 %vm384_vm4, %v11075_v39  ;;  %v12682_v39 = vld [vmem:[#allocation22_spill] sm:$0xff] }
 0x2e7   : > { %8914 = vmatprep.mubr.msk.f32.mxu1 %vm384_vm4, %v11079_v40  ;;  %v4508_v40 = vld [vmem:[#allocation3 + $0xf9] sm:$0xff] }
 0x2ea   : > { %8915 = vmatmul.mubr.msk.f32.gmra.mrb[8].mxu1 %vm384_vm4, %v11083_v41  ;;  %v12683_v41 = vld [vmem:[#allocation24_spill] sm:$0xff] }
 0x2eb   : > { %8917 = vmatprep.mubr.msk.f32.mxu1 %vm384_vm4, %v11087_v42  ;;  %v4509_v42 = vld [vmem:[#allocation3 + $0x101] sm:$0xff] }
 0x2ee   : > { %8918 = vmatmul.mubr.msk.f32.gmra.mrb[10].mxu1 %vm384_vm4, %v12670_v14 }
 0x2ef   : > { %8920 = vmatprep.mubr.msk.f32.mxu1 %vm384_vm4, %v12671_v61  ;;  %v12685_v61 = vld [vmem:[#allocation12_spill] sm:$0xff] }
 0x2f2   : > { %8921 = vmatmul.mubr.msk.f32.gmra.mrb[12].mxu1 %vm384_vm4, %v12672_v18 }
 0x2f3   : > { %8923 = vmatprep.mubr.msk.f32.mxu1 %vm384_vm4, %v3810_v15 }
 0x2f6   : > { %8924 = vmatmul.mubr.msk.f32.gmra.mrb[14].mxu1 %vm384_vm4, %v3811_v19 }
 0x2f7   : > { %8934 = vmatprep.mubr.msk.f32.mxu1 %vm384_vm4, %v11319_v45  ;;  %v5111_v45 = vld [vmem:[%s12594_s5 + $0x40] sm:$0xff] }
 0x2fa   : > { %8935 = vmatmul.mubr.msk.f32.vlgmr.msra.gmra.mrb[16].mxu1 %vm384_vm4, %v11323_v5  ;;  %v5096_v5 = vld [vmem:[%s12594_s5 + $0x8] sm:$0xff] }
 0x2fb   : > { %9561 = vmatpush3.bf16.msra.mxu1 %v9558_v0  ;;  %8937 = vmatprep.mubr.msk.f32.mxu1 %vm384_vm4, %v11327_v11  ;;  %v5097_v11 = vld [vmem:[%s12594_s5 + $0x10] sm:$0xff] }
 0x2fc   : > { %9563 = vmatprep.subr.bf16.mxu1 %v9562_v23 }
 0x2fe   : > { %8938 = vmatmul.mubr.msk.f32.gmra.mrb[18].mxu1 %vm384_vm4, %v11331_v58 }
 0x2ff   : > { %8940 = vmatprep.mubr.msk.f32.mxu1 %vm384_vm4, %v12673_v26  ;;  %9565 = vmatpush3.bf16.msra.mxu1 %v9562_v23  ;;  %v12686_v23 = vld [vmem:[#allocation13_spill] sm:$0xff] }
 0x302   : > { %8941 = vmatmul.mubr.msk.f32.gmra.mrb[20].mxu1 %vm384_vm4, %v11339_v7 }
 0x303   : > { %8943 = vmatprep.mubr.msk.f32.mxu1 %vm384_vm4, %v11343_v44  ;;  %v5099_v44 = vld [vmem:[%s12594_s5 + $0x20] sm:$0xff] }
 0x306   : > { %8944 = vmatmul.mubr.msk.f32.gmra.mrb[22].mxu1 %vm384_vm4, %v11347_v20  ;;  %v5100_v20 = vld [vmem:[%s12594_s5 + $0x28] sm:$0xff] }
 0x307   : > { %8946 = vmatprep.mubr.msk.f32.mxu1 %vm384_vm4, %v11351_v43  ;;  %v5101_v43 = vld [vmem:[%s12594_s5 + $0x30] sm:$0xff] }
 0x308   : > { %v9594_v50 = vpack.c.bf16 %v5102_v32, %v5101_v43 }
 0x30a   : > { %8947 = vmatmul.mubr.msk.f32.gmra.mrb[24].mxu1 %vm384_vm4, %v11355_v48  ;;  %v5098_v48 = vld [vmem:[%s12594_s5 + $0x18] sm:$0xff] }
 0x30b   : > { %8949 = vmatprep.mubr.msk.f32.mxu1 %vm384_vm4, %v4143_v27  ;;  %v9586_v7 = vpack.c.bf16 %v5098_v48, %v5097_v11 }
 0x30e   : > { %8950 = vmatmul.mubr.msk.f32.gmra.mrb[26].mxu1 %vm384_vm4, %v4144_v29 }
 0x30f   : > { %8952 = vmatprep.mubr.msk.f32.mxu1 %vm384_vm4, %v4145_v30  ;;  %v12687_v30 = vld [vmem:[#allocation14_spill] sm:$0xff] }
 0x312   : > { %8953 = vmatmul.mubr.msk.f32.gmra.mrb[0].mxu1 %vm384_vm4, %v4146_v31 }
 0x313   : > { %8955 = vmatprep.mubr.msk.f32.mxu1 %vm384_vm4, %v4147_v33 }
 0x316   : > { %8956 = vmatmul.mubr.msk.f32.gmra.mrb[2].mxu1 %vm384_vm4, %v4148_v34 }
 0x317   : > { %8958 = vmatprep.mubr.msk.f32.mxu1 %vm384_vm4, %v4149_v35 }
 0x31a   : > { %8959 = vmatmul.mubr.msk.f32.gmra.mrb[4].mxu1 %vm384_vm4, %v10920_v56  ;;  %v4159_v56 = vld [vmem:[#allocation3 + $0xf8] sm:$0xff] }
 0x31b   : > { %8961 = vmatprep.mubr.msk.f32.mxu1 %vm384_vm4, %v10940_v28  ;;  %v12674_v28 = vld [vmem:[#allocation36_spill] sm:$0xff] }
 0x31e   : > { %8962 = vmatmul.mubr.msk.f32.gmra.mrb[6].mxu1 %vm384_vm4, %v10946_v46  ;;  %v4160_v46 = vld [vmem:[#allocation3 + $0x100] sm:$0xff] }
 0x31f   : > { %8964 = vmatprep.mubr.msk.f32.mxu1 %vm384_vm4, %v10958_v57  ;;  %v12675_v57 = vld [vmem:[#allocation19_spill] sm:$0xff] }
 0x322   : > { %8965 = vmatmul.mubr.msk.f32.gmra.mrb[8].mxu1 %vm384_vm4, %v10962_v59  ;;  %v12676_v59 = vld [vmem:[#allocation21_spill] sm:$0xff] }
 0x323   : > { %8967 = vmatprep.mubr.msk.f32.mxu1 %vm384_vm4, %v10968_v62  ;;  %v12677_v62 = vld [vmem:[#allocation23_spill] sm:$0xff] }
 0x326   : > { %8968 = vmatmul.mubr.msk.f32.gmra.mrb[10].mxu1 %vm384_vm4, %v10970_v63  ;;  %v12678_v63 = vld [vmem:[#allocation25_spill] sm:$0xff] }
 0x327   : > { %8970 = vmatprep.mubr.msk.f32.mxu1 %vm384_vm4, %v11385_v16  ;;  %v9590_v16 = vpack.c.bf16 %v5100_v20, %v5099_v44 }
 0x32a   : > { %8971 = vmatmul.mubr.msk.f32.gmra.mrb[12].mxu1 %vm384_vm4, %v12674_v28  ;;  %v12688_v28 = vld [vmem:[#allocation16_spill] sm:$0xff] }
 0x32b   : > { %8973 = vmatprep.mubr.msk.f32.mxu1 %vm384_vm4, %v4159_v56 }
 0x32e   : > { %8974 = vmatmul.mubr.msk.f32.gmra.mrb[14].mxu1 %vm384_vm4, %v4160_v46 }
 0x32f   : > { %8984 = vmatprep.mubr.msk.f32.mxu1 %vm384_vm4, %v11119_v60  ;;  %v5112_v60 = vld [vmem:[%s12594_s5 + $0x48] sm:$0xff] }
 0x332   : > { %8985 = vmatmul.mubr.msk.f32.vlgmr.msra.gmra.mrb[16].mxu1 %vm384_vm4, %v11124_v25  ;;  %v9566_v25 = vpack.c.bf16 %v5112_v60, %v5111_v45  ;;  %v12691_v60 = vld [vmem:[#allocation20_spill] sm:$0xff] }
 0x333   : > { %8987 = vmatprep.mubr.msk.f32.mxu1 %vm384_vm4, %v11128_v1  ;;  %v5113_v1 = vld [vmem:[%s12594_s5 + $0x50] sm:$0xff] }
 0x334   : > { %9567 = vmatprep.subr.bf16.mxu0 %v9566_v25 }
 0x335   : > { %9569 = vmatpush3.bf16.msra.mxu0 %v9566_v25 }
 0x336   : > { %8988 = vmatmul.mubr.msk.f32.gmra.mrb[18].mxu1 %vm384_vm4, %v11132_v2  ;;  %v5114_v2 = vld [vmem:[%s12594_s5 + $0x58] sm:$0xff] }
 0x337   : > { %8990 = vmatprep.mubr.msk.f32.mxu1 %vm384_vm4, %v11136_v6  ;;  %v9570_v6 = vpack.c.bf16 %v5114_v2, %v5113_v1 }
 0x339   : > { %9571 = vmatprep.subr.bf16.mxu0 %v9570_v6 }
 0x33a   : > { %8991 = vmatmul.mubr.msk.f32.gmra.mrb[20].mxu1 %vm384_vm4, %v11140_v8  ;;  %9573 = vmatpush3.bf16.msra.mxu0 %v9570_v6  ;;  %v5115_v8 = vld [vmem:[%s12594_s5 + $0x60] sm:$0xff] }
 0x33b   : > { %8993 = vmatprep.mubr.msk.f32.mxu1 %vm384_vm4, %v11144_v9  ;;  %v5116_v9 = vld [vmem:[%s12594_s5 + $0x68] sm:$0xff] }
 0x33e   : > { %8994 = vmatmul.mubr.msk.f32.gmra.mrb[22].mxu1 %vm384_vm4, %v11148_v10  ;;  %v9574_v10 = vpack.c.bf16 %v5116_v9, %v5115_v8 }
 0x33f   : > { %8996 = vmatprep.mubr.msk.f32.mxu1 %vm384_vm4, %v11152_v12  ;;  %v5117_v12 = vld [vmem:[%s12594_s5 + $0x70] sm:$0xff] }
 0x340   : > { %9575 = vmatprep.subr.bf16.mxu0 %v9574_v10 }
 0x341   : > { %9577 = vmatpush3.bf16.msra.mxu0 %v9574_v10 }
 0x342   : > { %8997 = vmatmul.mubr.msk.f32.gmra.mrb[24].mxu1 %vm384_vm4, %v11158_v47  ;;  %v5118_v47 = vld [vmem:[%s12594_s5 + $0x78] sm:$0xff] }
 0x343   : > { %8999 = vmatprep.mubr.msk.f32.mxu1 %vm384_vm4, %v11164_v49  ;;  %v9578_v49 = vpack.c.bf16 %v5118_v47, %v5117_v12  ;;  %v12692_v12 = vld [vmem:[#allocation26_spill] sm:$0xff] }
 0x345   : > { %9579 = vmatprep.subr.bf16.mxu0 %v9578_v49 }
 0x346   : > { %9000 = vmatmul.mubr.msk.f32.gmra.mrb[26].mxu1 %vm384_vm4, %v11168_v52  ;;  %9581 = vmatpush3.bf16.msra.mxu0 %v9578_v49  ;;  %v5103_v52 = vld [vmem:[#allocation5 + $0x8] sm:$0xff] }
 0x347   : > { %9002 = vmatprep.mubr.msk.f32.mxu1 %vm384_vm4, %v11172_v53  ;;  %9042 = vmatprep.mubr.msk.f32.mxu0 %vm419_vm6, %v5103_v52  ;;  %v11689_v53 = vld [vmem:[#allocation5 + $0x10] sm:$0xff] }
 0x349   : > { %9043 = vmatmul.mubr.msk.f32.vlgmr.msra.gmra.mrb[84].mxu0 %vm419_vm6, %v11689_v53 }
 0x34a   : > { %9003 = vmatmul.mubr.msk.f32.gmra.mrb[0].mxu1 %vm384_vm4, %v11176_v54  ;;  %v5095_v54 = vld [vmem:[%s12594_s5] sm:$0xff] }
 0x34b   : > { %9005 = vmatprep.mubr.msk.f32.mxu1 %vm384_vm4, %v11180_v4  ;;  %v12680_v4 = vld [vmem:[#allocation29_spill] sm:$0xff]  ;;  %v9582_v58 = vpack.c.bf16 %v5096_v5, %v5095_v54  ;;  %v12693_v54 = vld [vmem:[#allocation28_spill] sm:$0xff] }
 0x34d   : > { %9583 = vmatprep.subr.bf16.mxu0 %v9582_v58 }
 0x34e   : > { %9006 = vmatmul.mubr.msk.f32.gmra.mrb[2].mxu1 %vm384_vm4, %v12675_v57  ;;  %9585 = vmatpush3.bf16.msra.mxu0 %v9582_v58 }
 0x34f   : > { %9008 = vmatprep.mubr.msk.f32.mxu1 %vm384_vm4, %v12676_v59  ;;  %9587 = vmatprep.subr.bf16.mxu0 %v9586_v7 }
 0x352   : > { %9009 = vmatmul.mubr.msk.f32.gmra.mrb[4].mxu1 %vm384_vm4, %v12660_v24  ;;  %9589 = vmatpush3.bf16.msra.mxu0 %v9586_v7  ;;  %v5386_v24 = vld [vmem:[%s12594_s5 + $0x88] sm:$0xff] }
 0x353   : > { %9011 = vmatprep.mubr.msk.f32.mxu1 %vm384_vm4, %v12677_v62  ;;  %9591 = vmatprep.subr.bf16.mxu0 %v9590_v16  ;;  %v11723_v0 = vpack.c.bf16 %v5386_v24, %v5385_v55  ;;  %v12689_v62 = vld [vmem:[#allocation17_spill] sm:$0xff] }
 0x356   : > { %9012 = vmatmul.mubr.msk.f32.gmra.mrb[6].mxu1 %vm384_vm4, %v12662_v17  ;;  %9593 = vmatpush3.bf16.msra.mxu0 %v9590_v16 }
 0x357   : > { %9014 = vmatprep.mubr.msk.f32.mxu1 %vm384_vm4, %v12678_v63  ;;  %9595 = vmatprep.subr.bf16.mxu0 %v9594_v50 }
 0x35a   : > { %9015 = vmatmul.mubr.msk.f32.gmra.mrb[8].mxu1 %vm384_vm4, %v12679_v36  ;;  %9597 = vmatpush3.bf16.msra.mxu0 %v9594_v50  ;;  %v12694_v50 = vld [vmem:[#allocation31_spill] sm:$0xff] }
 0x35b   : > { %9017 = vmatprep.mubr.msk.f32.mxu1 %vm384_vm4, %v12680_v4  ;;  %9599 = vmatprep.subr.bf16.mxu0 %v11723_v0 }
 0x35e   : > { %9018 = vmatmul.mubr.msk.f32.gmra.mrb[10].mxu1 %vm384_vm4, %v12681_v37 }
 0x35f   : > { %9020 = vmatprep.mubr.msk.f32.mxu1 %vm384_vm4, %v12682_v39 }
 0x362   : > { %9021 = vmatmul.mubr.msk.f32.gmra.mrb[12].mxu1 %vm384_vm4, %v12683_v41 }
 0x363   : > { %9023 = vmatprep.mubr.msk.f32.mxu1 %vm384_vm4, %v4508_v40  ;;  %v12690_v40 = vld [vmem:[#allocation18_spill] sm:$0xff] }
 0x366   : > { %9024 = vmatmul.mubr.msk.f32.gmra.mrb[14].mxu1 %vm384_vm4, %v4509_v42 }
 0x405   : > { %v8986_v17 = vpop.f32.mrb[16].mxu1 }
 0x406   : > { %v9846_v38 = vadd.f32 %v8986_v17, %v12684_v3  ;;  %v4664_v14 = vpop.f32.mrb[17].mxu1 }
 0x407   : > { %v9847_v15 = vadd.f32 %v4664_v14, %v12685_v61  ;;  %v12695_v61 = vld [vmem:[#allocation32_spill] sm:$0xff] }
 0x408   : > { %v4839_v18 = vadd.f32 %v9846_v38, %v11729_v51 }
 0x409   : > { %v4838_v19 = vadd.f32 %v9847_v15, %v11729_v51  ;;  %v8989_v21 = vpop.f32.mrb[18].mxu1 }
 0x40a   : > { %v4867_v22 = vmax.f32 %v4839_v18, 0.0  ;;  %v9848_v26 = vadd.f32 %v8989_v21, %v12686_v23  ;;  %v4674_v27 = vpop.f32.mrb[19].mxu1 }
 0x40b   : > { %v4866_v29 = vmax.f32 %v4838_v19, 0.0  ;;  %v9849_v31 = vadd.f32 %v4674_v27, %v12687_v30 }
 0x40c   : > { %4895 = vst.msk [vmem:[#allocation4 + $0x8] sm:$0xff] %vm419_vm6, %v4867_v22  ;;  %v4841_v33 = vadd.f32 %v9848_v26, %v11729_v51 }
 0x40d   : > { %4894 = vst.msk [vmem:[#allocation4] sm:$0xff] %vm419_vm6, %v4866_v29  ;;  %v4840_v34 = vadd.f32 %v9849_v31, %v11729_v51  ;;  %v8992_v35 = vpop.f32.mrb[20].mxu1 }
 0x40e   : > { %v4869_v56 = vmax.f32 %v4841_v33, 0.0  ;;  %v9850_v46 = vadd.f32 %v8992_v35, %v12688_v28  ;;  %v4684_v57 = vpop.f32.mrb[21].mxu1 }
 0x40f   : > { %v4868_v59 = vmax.f32 %v4840_v34, 0.0  ;;  %v9851_v63 = vadd.f32 %v4684_v57, %v12689_v62 }
 0x410   : > { %4897 = vst.msk [vmem:[#allocation4 + $0x18] sm:$0xff] %vm419_vm6, %v4869_v56  ;;  %v4843_v36 = vadd.f32 %v9850_v46, %v11729_v51 }
 0x411   : > { %4896 = vst.msk [vmem:[#allocation4 + $0x10] sm:$0xff] %vm419_vm6, %v4868_v59  ;;  %v4842_v4 = vadd.f32 %v9851_v63, %v11729_v51  ;;  %v8995_v37 = vpop.f32.mrb[22].mxu1 }
 0x412   : > { %v4871_v39 = vmax.f32 %v4843_v36, 0.0  ;;  %v9852_v41 = vadd.f32 %v8995_v37, %v12690_v40  ;;  %v4694_v42 = vpop.f32.mrb[23].mxu1 }
 0x413   : > { %v4870_v45 = vmax.f32 %v4842_v4, 0.0  ;;  %v9853_v25 = vadd.f32 %v4694_v42, %v12691_v60  ;;  %v4923_v17 = vld [vmem:[#allocation4 + $0x8] sm:$0xff] }
 0x414   : > { %4899 = vst.msk [vmem:[#allocation4 + $0x28] sm:$0xff] %vm419_vm6, %v4871_v39  ;;  %v4845_v1 = vadd.f32 %v9852_v41, %v11729_v51  ;;  %v4922_v8 = vld [vmem:[#allocation4] sm:$0xff] }
 0x415   : > { %4898 = vst.msk [vmem:[#allocation4 + $0x20] sm:$0xff] %vm419_vm6, %v4870_v45  ;;  %v4844_v2 = vadd.f32 %v9853_v25, %v11729_v51  ;;  %v8998_v6 = vpop.f32.mrb[24].mxu1  ;;  %v4950_v9 = vld [vmem:[#allocation4 + $0x1] sm:$0xff] }
 0x416   : > { %v4873_v10 = vmax.f32 %v4845_v1, 0.0  ;;  %v9854_v47 = vadd.f32 %v8998_v6, %v12692_v12  ;;  %v4704_v49 = vpop.f32.mrb[25].mxu1  ;;  %v4978_v7 = vmax.f32 %v4922_v8, %v4950_v9 }
 0x417   : > { %v4872_v52 = vmax.f32 %v4844_v2, 0.0  ;;  %v9855_v5 = vadd.f32 %v4704_v49, %v12693_v54  ;;  %v4925_v3 = vld [vmem:[#allocation4 + $0x18] sm:$0xff] }
 0x418   : > { %v4924_v11 = vld [vmem:[#allocation4 + $0x10] sm:$0xff]  ;;  %4901 = vst.msk [vmem:[#allocation4 + $0x38] sm:$0xff] %vm419_vm6, %v4873_v10  ;;  %v4847_v48 = vadd.f32 %v9854_v47, %v11729_v51 }
 0x419   : > { %v4952_v58 = vld [vmem:[#allocation4 + $0x11] sm:$0xff]  ;;  %4900 = vst.msk [vmem:[#allocation4 + $0x30] sm:$0xff] %vm419_vm6, %v4872_v52  ;;  %v4846_v20 = vadd.f32 %v9855_v5, %v11729_v51  ;;  %v9001_v43 = vpop.f32.mrb[26].mxu1  ;;  %v4951_v16 = vld [vmem:[#allocation4 + $0x9] sm:$0xff] }
 0x41a   : > { %v4980_v44 = vmax.f32 %v4924_v11, %v4952_v58  ;;  %v4875_v32 = vmax.f32 %v4847_v48, 0.0  ;;  %v9856_v55 = vadd.f32 %v9001_v43, %v12694_v50  ;;  %v4714_v24 = vpop.f32.mrb[27].mxu1  ;;  %v4979_v23 = vmax.f32 %v4923_v17, %v4951_v16 }
 0x41b   : > { %v4874_v14 = vmax.f32 %v4846_v20, 0.0  ;;  %v9857_v15 = vadd.f32 %v4714_v24, %v12695_v61  ;;  %v4927_v35 = vld [vmem:[#allocation4 + $0x28] sm:$0xff] }
 0x41c   : > { %v5012_v38 = vmax.f32 %v4978_v7, %v4980_v44  ;;  %v4926_v18 = vld [vmem:[#allocation4 + $0x20] sm:$0xff]  ;;  %4903 = vst.msk [vmem:[#allocation4 + $0x48] sm:$0xff] %vm419_vm6, %v4875_v32  ;;  %v4849_v22 = vadd.f32 %v9856_v55, %v11729_v51 }
 0x41d   : > { %v4953_v19 = vld [vmem:[#allocation4 + $0x19] sm:$0xff]  ;;  %v4954_v21 = vld [vmem:[#allocation4 + $0x21] sm:$0xff]  ;;  %4902 = vst.msk [vmem:[#allocation4 + $0x40] sm:$0xff] %vm419_vm6, %v4874_v14  ;;  %v4848_v29 = vadd.f32 %v9857_v15, %v11729_v51  ;;  %v9004_v30 = vpop.f32.mrb[0].mxu1 }
 0x41e   : > { %5040 = vst.msk [vmem:[#allocation4] sm:$0xff] %vm419_vm6, %v5012_v38  ;;  %v4981_v26 = vmax.f32 %v4925_v3, %v4953_v19  ;;  %v4982_v27 = vmax.f32 %v4926_v18, %v4954_v21  ;;  %v4877_v31 = vmax.f32 %v4849_v22, 0.0  ;;  %v4851_v33 = vadd.f32 %v9004_v30, %v11729_v51  ;;  %v4724_v34 = vpop.f32.mrb[1].mxu1 }
 0x41f   : > { %v4876_v46 = vmax.f32 %v4848_v29, 0.0  ;;  %v4850_v57 = vadd.f32 %v11729_v51, %v4724_v34  ;;  %v4929_v45 = vld [vmem:[#allocation4 + $0x38] sm:$0xff] }
 0x420   : > { %v5013_v56 = vmax.f32 %v4979_v23, %v4981_v26  ;;  %v5014_v28 = vmax.f32 %v4980_v44, %v4982_v27  ;;  %v4928_v59 = vld [vmem:[#allocation4 + $0x30] sm:$0xff]  ;;  %4905 = vst.msk [vmem:[#allocation4 + $0x58] sm:$0xff] %vm419_vm6, %v4877_v31  ;;  %v4879_v36 = vmax.f32 %v4851_v33, 0.0 }
 0x421   : > { %v4955_v62 = vld [vmem:[#allocation4 + $0x29] sm:$0xff]  ;;  %v4956_v63 = vld [vmem:[#allocation4 + $0x31] sm:$0xff]  ;;  %4904 = vst.msk [vmem:[#allocation4 + $0x50] sm:$0xff] %vm419_vm6, %v4876_v46  ;;  %v4878_v39 = vmax.f32 %v4850_v57, 0.0  ;;  %v9007_v40 = vpop.f32.mrb[2].mxu1 }
 0x422   : > { %5041 = vst.msk [vmem:[#allocation4 + $0x8] sm:$0xff] %vm419_vm6, %v5013_v56  ;;  %5042 = vst.msk [vmem:[#allocation4 + $0x10] sm:$0xff] %vm419_vm6, %v5014_v28  ;;  %v4983_v4 = vmax.f32 %v4927_v35, %v4955_v62  ;;  %v4984_v37 = vmax.f32 %v4928_v59, %v4956_v63  ;;  %v4853_v41 = vadd.f32 %v9007_v40, %v11729_v51  ;;  %v4734_v42 = vpop.f32.mrb[3].mxu1 }
 0x423   : > { %4907 = vst.msk [vmem:[#allocation4 + $0x68] sm:$0xff] %vm419_vm6, %v4879_v36  ;;  %4906 = vst.msk [vmem:[#allocation4 + $0x60] sm:$0xff] %vm419_vm6, %v4878_v39  ;;  %v4852_v1 = vadd.f32 %v11729_v51, %v4734_v42  ;;  %v4931_v5 = vld [vmem:[#allocation4 + $0x48] sm:$0xff] }
 0x424   : > { %v5015_v60 = vmax.f32 %v4981_v26, %v4983_v4  ;;  %v5016_v25 = vmax.f32 %v4982_v27, %v4984_v37  ;;  %v4930_v2 = vld [vmem:[#allocation4 + $0x40] sm:$0xff]  ;;  %v4881_v9 = vmax.f32 %v4853_v41, 0.0 }
 0x425   : > { %v4957_v6 = vld [vmem:[#allocation4 + $0x39] sm:$0xff]  ;;  %v4958_v8 = vld [vmem:[#allocation4 + $0x41] sm:$0xff]  ;;  %v4880_v47 = vmax.f32 %v4852_v1, 0.0  ;;  %v9010_v49 = vpop.f32.mrb[4].mxu1 }
 0x426   : > { %5043 = vst.msk [vmem:[#allocation4 + $0x18] sm:$0xff] %vm419_vm6, %v5015_v60  ;;  %5044 = vst.msk [vmem:[#allocation4 + $0x20] sm:$0xff] %vm419_vm6, %v5016_v25  ;;  %v4985_v10 = vmax.f32 %v4929_v45, %v4957_v6  ;;  %v4986_v12 = vmax.f32 %v4930_v2, %v4958_v8  ;;  %v4855_v52 = vadd.f32 %v9010_v49, %v11729_v51  ;;  %v4744_v54 = vpop.f32.mrb[5].mxu1 }
 0x427   : > { %4909 = vst.msk [vmem:[#allocation4 + $0x78] sm:$0xff] %vm419_vm6, %v4881_v9  ;;  %4908 = vst.msk [vmem:[#allocation4 + $0x70] sm:$0xff] %vm419_vm6, %v4880_v47  ;;  %v4854_v48 = vadd.f32 %v11729_v51, %v4744_v54  ;;  %v4933_v16 = vld [vmem:[#allocation4 + $0x58] sm:$0xff] }
 0x428   : > { %v5017_v11 = vmax.f32 %v4983_v4, %v4985_v10  ;;  %v5018_v58 = vmax.f32 %v4984_v37, %v4986_v12  ;;  %v4932_v7 = vld [vmem:[#allocation4 + $0x50] sm:$0xff]  ;;  %v4883_v43 = vmax.f32 %v4855_v52, 0.0 }
 0x429   : > { %v4959_v44 = vld [vmem:[#allocation4 + $0x49] sm:$0xff]  ;;  %v4960_v20 = vld [vmem:[#allocation4 + $0x51] sm:$0xff]  ;;  %v4882_v55 = vmax.f32 %v4854_v48, 0.0  ;;  %v9013_v24 = vpop.f32.mrb[6].mxu1 }
 0x42a   : > { %5045 = vst.msk [vmem:[#allocation4 + $0x28] sm:$0xff] %vm419_vm6, %v5017_v11  ;;  %5046 = vst.msk [vmem:[#allocation4 + $0x30] sm:$0xff] %vm419_vm6, %v5018_v58  ;;  %v4987_v32 = vmax.f32 %v4931_v5, %v4959_v44  ;;  %v4988_v50 = vmax.f32 %v4932_v7, %v4960_v20  ;;  %v4934_v17 = vld [vmem:[#allocation4 + $0x60] sm:$0xff]  ;;  %v4857_v14 = vadd.f32 %v9013_v24, %v11729_v51  ;;  %v4754_v61 = vpop.f32.mrb[7].mxu1  ;;  %v4935_v27 = vld [vmem:[#allocation4 + $0x68] sm:$0xff] }
 0x42b   : > { %v4961_v3 = vld [vmem:[#allocation4 + $0x59] sm:$0xff]  ;;  %v4962_v38 = vld [vmem:[#allocation4 + $0x61] sm:$0xff]  ;;  %4911 = vst.msk [vmem:[#allocation4 + $0x88] sm:$0xff] %vm419_vm6, %v4883_v43  ;;  %4910 = vst.msk [vmem:[#allocation4 + $0x80] sm:$0xff] %vm419_vm6, %v4882_v55  ;;  %v4856_v23 = vadd.f32 %v11729_v51, %v4754_v61 }
 0x42c   : > { %v5019_v15 = vmax.f32 %v4985_v10, %v4987_v32  ;;  %v5020_v18 = vmax.f32 %v4986_v12, %v4988_v50  ;;  %v4989_v19 = vmax.f32 %v4933_v16, %v4961_v3  ;;  %v4990_v21 = vmax.f32 %v4934_v17, %v4962_v38 }
 0x42d   : > { %v4885_v22 = vmax.f32 %v4857_v14, 0.0  ;;  %v5069_v26 = vld [vmem:[#allocation4 + $0x11] ss:$2 sm:$0x3f]  ;;  %v9016_v31 = vpop.f32.mrb[8].mxu1  ;;  %v4884_v56 = vmax.f32 %v4856_v23, 0.0 }
 0x42e   : > { %5047 = vst.msk [vmem:[#allocation4 + $0x38] sm:$0xff] %vm419_vm6, %v5019_v15  ;;  %5048 = vst.msk [vmem:[#allocation4 + $0x40] sm:$0xff] %vm419_vm6, %v5020_v18  ;;  %v5021_v29 = vmax.f32 %v4987_v32, %v4989_v19  ;;  %v5022_v30 = vmax.f32 %v4988_v50, %v4990_v21  ;;  %v4936_v33 = vld [vmem:[#allocation4 + $0x70] sm:$0xff]  ;;  %v4859_v28 = vadd.f32 %v9016_v31, %v11729_v51  ;;  %v4764_v46 = vpop.f32.mrb[9].mxu1  ;;  %v4937_v36 = vld [vmem:[#allocation4 + $0x78] sm:$0xff] }
 0x42f   : > { %5071 = vst.msk [vmem:[#allocation5 + $0x19] sm:$0x3f] %vm5070_vm7, %v5069_v26  ;;  %v4963_v34 = vld [vmem:[#allocation4 + $0x69] sm:$0xff]  ;;  %v4964_v35 = vld [vmem:[#allocation4 + $0x71] sm:$0xff]  ;;  %v4858_v62 = vadd.f32 %v11729_v51, %v4764_v46 }
 0x430   : > { %4913 = vst.msk [vmem:[#allocation4 + $0x98] sm:$0xff] %vm419_vm6, %v4885_v22  ;;  %5049 = vst.msk [vmem:[#allocation4 + $0x48] sm:$0xff] %vm419_vm6, %v5021_v29  ;;  %v4991_v57 = vmax.f32 %v4935_v27, %v4963_v34  ;;  %v4992_v59 = vmax.f32 %v4936_v33, %v4964_v35  ;;  %v4887_v63 = vmax.f32 %v4859_v28, 0.0  ;;  %v5006_v28 = vld [vmem:[#allocation4 + $0xe0] sm:$0xff]  ;;  %v5007_v46 = vld [vmem:[#allocation4 + $0xe8] sm:$0xff] }
 0x431   : > { %5050 = vst.msk [vmem:[#allocation4 + $0x50] sm:$0xff] %vm419_vm6, %v5022_v30  ;;  %4912 = vst.msk [vmem:[#allocation4 + $0x90] sm:$0xff] %vm419_vm6, %v4884_v56  ;;  %v4886_v39 = vmax.f32 %v4858_v62, 0.0  ;;  %v9019_v40 = vpop.f32.mrb[10].mxu1  ;;  %v5009_v62 = vld [vmem:[#allocation4 + $0xe9] sm:$0xff] }
 0x432   : > { %v5023_v4 = vmax.f32 %v4989_v19, %v4991_v57  ;;  %v5024_v37 = vmax.f32 %v4990_v21, %v4992_v59  ;;  %v4938_v41 = vld [vmem:[#allocation4 + $0x80] sm:$0xff]  ;;  %4915 = vst.msk [vmem:[#allocation4 + $0xa8] sm:$0xff] %vm419_vm6, %v4887_v63  ;;  %v4861_v60 = vadd.f32 %v9019_v40, %v11729_v51  ;;  %v4774_v25 = vpop.f32.mrb[11].mxu1  ;;  %v4939_v54 = vld [vmem:[#allocation4 + $0x88] sm:$0xff] }
 0x433   : > { %v4965_v42 = vld [vmem:[#allocation4 + $0x79] sm:$0xff]  ;;  %v4966_v45 = vld [vmem:[#allocation4 + $0x81] sm:$0xff]  ;;  %4914 = vst.msk [vmem:[#allocation4 + $0xa0] sm:$0xff] %vm419_vm6, %v4886_v39  ;;  %v4860_v6 = vadd.f32 %v11729_v51, %v4774_v25 }
 0x434   : > { %5051 = vst.msk [vmem:[#allocation4 + $0x58] sm:$0xff] %vm419_vm6, %v5023_v4  ;;  %5052 = vst.msk [vmem:[#allocation4 + $0x60] sm:$0xff] %vm419_vm6, %v5024_v37  ;;  %v4993_v1 = vmax.f32 %v4937_v36, %v4965_v42  ;;  %v4994_v2 = vmax.f32 %v4938_v41, %v4966_v45  ;;  %v4889_v8 = vmax.f32 %v4861_v60, 0.0  ;;  %v5011_v60 = vmax.f32 %v5007_v46, %v5009_v62 }
 0x435   : > { %v5073_v10 = vld [vmem:[#allocation4 + $0x31] ss:$2 sm:$0x3f]  ;;  %v4888_v49 = vmax.f32 %v4860_v6, 0.0  ;;  %v9022_v52 = vpop.f32.mrb[12].mxu1 }
 0x436   : > { %v11803_v9 = vld [vmem:[#allocation5 + $0x18] sm:$0xff]  ;;  %v5025_v12 = vmax.f32 %v4991_v57, %v4993_v1  ;;  %v5026_v47 = vmax.f32 %v4992_v59, %v4994_v2  ;;  %5074 = vst.msk [vmem:[#allocation5 + $0x21] sm:$0x3f] %vm5070_vm7, %v5073_v10  ;;  %v4863_v5 = vadd.f32 %v9022_v52, %v11729_v51  ;;  %v4784_v11 = vpop.f32.mrb[13].mxu1  ;;  %v5008_v59 = vld [vmem:[#allocation4 + $0xe1] sm:$0xff] }
 0x437   : > { %9045 = vmatprep.mubr.msk.f32.mxu0 %vm419_vm6, %v11803_v9  ;;  %4917 = vst.msk [vmem:[#allocation4 + $0xb8] sm:$0xff] %vm419_vm6, %v4889_v8  ;;  %4916 = vst.msk [vmem:[#allocation4 + $0xb0] sm:$0xff] %vm419_vm6, %v4888_v49  ;;  %v4862_v44 = vadd.f32 %v11729_v51, %v4784_v11  ;;  %v4941_v32 = vld [vmem:[#allocation4 + $0x98] sm:$0xff]  ;;  %v5010_v6 = vmax.f32 %v5006_v28, %v5008_v59  ;;  %v11918_v28 = vld [vmem:[#allocation5 + $0x11] sm:$0xff] }
 0x438   : > { %5053 = vst.msk [vmem:[#allocation4 + $0x68] sm:$0xff] %vm419_vm6, %v5025_v12  ;;  %5054 = vst.msk [vmem:[#allocation4 + $0x70] sm:$0xff] %vm419_vm6, %v5026_v47  ;;  %v4940_v58 = vld [vmem:[#allocation4 + $0x90] sm:$0xff]  ;;  %v4891_v16 = vmax.f32 %v4863_v5, 0.0  ;;  %v5543_v59 = vld [vmem:[%s12594_s5 + $0xe8] sm:$0xff] }
 0x439   : > { %v4967_v48 = vld [vmem:[#allocation4 + $0x89] sm:$0xff]  ;;  %v4968_v7 = vld [vmem:[#allocation4 + $0x91] sm:$0xff]  ;;  %v4890_v50 = vmax.f32 %v4862_v44, 0.0  ;;  %v9025_v55 = vpop.f32.mrb[14].mxu1 }
 0x43a   : > { %v4995_v20 = vmax.f32 %v4939_v54, %v4967_v48  ;;  %v4996_v43 = vmax.f32 %v4940_v58, %v4968_v7  ;;  %v4969_v3 = vld [vmem:[#allocation4 + $0x99] sm:$0xff]  ;;  %v4970_v38 = vld [vmem:[#allocation4 + $0xa1] sm:$0xff]  ;;  %4919 = vst.msk [vmem:[#allocation4 + $0xc8] sm:$0xff] %vm419_vm6, %v4891_v16  ;;  %v4865_v14 = vadd.f32 %v9025_v55, %v11729_v51  ;;  %v4794_v61 = vpop.f32.mrb[15].mxu1  ;;  %v11928_v62 = vld [vmem:[#allocation5 + $0x19] sm:$0xff] }
 0x43b   : > { %v4942_v15 = vld [vmem:[#allocation4 + $0xa0] sm:$0xff]  ;;  %4918 = vst.msk [vmem:[#allocation4 + $0xc0] sm:$0xff] %vm419_vm6, %v4890_v50  ;;  %v4864_v18 = vadd.f32 %v11729_v51, %v4794_v61  ;;  %v4997_v19 = vmax.f32 %v4941_v32, %v4969_v3  ;;  %v5076_v22 = vld [vmem:[#allocation4 + $0x51] ss:$2 sm:$0x3f]  ;;  %v4943_v29 = vld [vmem:[#allocation4 + $0xa8] sm:$0xff] }
 0x43c   : > { %v5027_v24 = vmax.f32 %v4993_v1, %v4995_v20  ;;  %v5028_v17 = vmax.f32 %v4994_v2, %v4996_v43  ;;  %v4998_v21 = vmax.f32 %v4942_v15, %v4970_v38  ;;  %v4893_v23 = vmax.f32 %v4865_v14, 0.0  ;;  %5077 = vst.msk [vmem:[#allocation5 + $0x29] sm:$0x3f] %vm5070_vm7, %v5076_v22  ;;  %v5087_v50 = vld [vmem:[#allocation5 + $0x7] sm:$0xff]  ;;  %v11864_v3 = vld [vmem:[#allocation5 + $0xf] sm:$0xff]  ;;  %v5389_v14 = vld [vmem:[%s12594_s5 + $0xa0] sm:$0xff] }
 0x43d   : > { %v11820_v26 = vld [vmem:[#allocation5 + $0x20] sm:$0xff]  ;;  %v4892_v27 = vmax.f32 %v4864_v18, 0.0  ;;  %v5029_v30 = vmax.f32 %v4995_v20, %v4997_v19  ;;  %v11874_v15 = vld [vmem:[#allocation5 + $0x17] sm:$0xff] }
 0x43e   : > { %5055 = vst.msk [vmem:[#allocation4 + $0x78] sm:$0xff] %vm419_vm6, %v5027_v24  ;;  %5056 = vst.msk [vmem:[#allocation4 + $0x80] sm:$0xff] %vm419_vm6, %v5028_v17  ;;  %v5030_v31 = vmax.f32 %v4996_v43, %v4998_v21  ;;  %9046 = vmatmul.mubr.msk.f32.gmra.mrb[86].mxu0 %vm419_vm6, %v11820_v26  ;;  %v4944_v51 = vld [vmem:[#allocation4 + $0xb0] sm:$0xff]  ;;  %v4945_v57 = vld [vmem:[#allocation4 + $0xb8] sm:$0xff] }
 0x43f   : > { %4921 = vst.msk [vmem:[#allocation4 + $0xd8] sm:$0xff] %vm419_vm6, %v4893_v23  ;;  %v4971_v33 = vld [vmem:[#allocation4 + $0xa9] sm:$0xff]  ;;  %v4972_v34 = vld [vmem:[#allocation4 + $0xb1] sm:$0xff]  ;;  %4920 = vst.msk [vmem:[#allocation4 + $0xd0] sm:$0xff] %vm419_vm6, %v4892_v27 }
 0x440   : > { %v4999_v35 = vmax.f32 %v4943_v29, %v4971_v33  ;;  %v5000_v56 = vmax.f32 %v4944_v51, %v4972_v34  ;;  %5057 = vst.msk [vmem:[#allocation4 + $0x88] sm:$0xff] %vm419_vm6, %v5029_v30  ;;  %5058 = vst.msk [vmem:[#allocation4 + $0x90] sm:$0xff] %vm419_vm6, %v5030_v31  ;;  %v5387_v24 = vld [vmem:[%s12594_s5 + $0x90] sm:$0xff]  ;;  %v5388_v17 = vld [vmem:[%s12594_s5 + $0x98] sm:$0xff] }
 0x441   : > { %v4947_v25 = vld [vmem:[#allocation4 + $0xc8] sm:$0xff]  ;;  %v9602_v38 = vpack.c.bf16 %v5388_v17, %v5387_v24  ;;  %v5390_v61 = vld [vmem:[%s12594_s5 + $0xa8] sm:$0xff]  ;;  %v5538_v29 = vld [vmem:[%s12594_s5 + $0xc0] sm:$0xff] }
 0x442   : > { %v5031_v63 = vmax.f32 %v4997_v19, %v4999_v35  ;;  %v5032_v36 = vmax.f32 %v4998_v21, %v5000_v56  ;;  %v4946_v4 = vld [vmem:[#allocation4 + $0xc0] sm:$0xff]  ;;  %v9606_v18 = vpack.c.bf16 %v5390_v61, %v5389_v14  ;;  %v11879_v19 = vld [vmem:[#allocation5 + $0x1f] sm:$0xff]  ;;  %v5392_v22 = vld [vmem:[%s12594_s5 + $0xb8] sm:$0xff] }
 0x443   : > { %v4973_v37 = vld [vmem:[#allocation4 + $0xb9] sm:$0xff]  ;;  %v4974_v39 = vld [vmem:[#allocation4 + $0xc1] sm:$0xff]  ;;  %v5997_v14 = vld [vmem:[%s12594_s5 + $0x180] sm:$0xff] }
 0x444   : > { %v5001_v40 = vmax.f32 %v4945_v57, %v4973_v37  ;;  %v5002_v41 = vmax.f32 %v4946_v4, %v4974_v39  ;;  %5059 = vst.msk [vmem:[#allocation4 + $0x98] sm:$0xff] %vm419_vm6, %v5031_v63  ;;  %5060 = vst.msk [vmem:[#allocation4 + $0xa0] sm:$0xff] %vm419_vm6, %v5032_v36  ;;  %v11831_v42 = vld [vmem:[#allocation5 + $0x28] sm:$0xff]  ;;  %v5539_v30 = vld [vmem:[%s12594_s5 + $0xc8] sm:$0xff] }
 0x445   : > { %v5079_v45 = vld [vmem:[#allocation4 + $0x71] ss:$2 sm:$0x3f]  ;;  %9048 = vmatprep.mubr.msk.f32.mxu0 %vm419_vm6, %v11831_v42  ;;  %v5391_v21 = vld [vmem:[%s12594_s5 + $0xb0] sm:$0xff]  ;;  %v9614_v33 = vpack.c.bf16 %v5539_v30, %v5538_v29  ;;  %v5545_v37 = vld [vmem:[%s12594_s5 + $0xf8] sm:$0xff] }
 0x446   : > { %5080 = vst.msk [vmem:[#allocation5 + $0x31] sm:$0x3f] %vm5070_vm7, %v5079_v45  ;;  %v4949_v1 = vld [vmem:[#allocation4 + $0xd8] sm:$0xff]  ;;  %v5033_v8 = vmax.f32 %v4999_v35, %v5001_v40  ;;  %v5034_v10 = vmax.f32 %v5000_v56, %v5002_v41  ;;  %v4948_v12 = vld [vmem:[#allocation4 + $0xd0] sm:$0xff]  ;;  %v5377_v51 = vld [vmem:[#allocation5 + $0x9] sm:$0xff] }
 0x447   : > { %v4977_v2 = vld [vmem:[#allocation4 + $0xd9] sm:$0xff]  ;;  %v4975_v47 = vld [vmem:[#allocation4 + $0xc9] sm:$0xff]  ;;  %v4976_v49 = vld [vmem:[#allocation4 + $0xd1] sm:$0xff] }
 0x448   : > { %v5005_v52 = vmax.f32 %v4949_v1, %v4977_v2  ;;  %v5003_v54 = vmax.f32 %v4947_v25, %v4975_v47  ;;  %v5004_v5 = vmax.f32 %v4948_v12, %v4976_v49  ;;  %5061 = vst.msk [vmem:[#allocation4 + $0xa8] sm:$0xff] %vm419_vm6, %v5033_v8  ;;  %5062 = vst.msk [vmem:[#allocation4 + $0xb0] sm:$0xff] %vm419_vm6, %v5034_v10  ;;  %v11889_v23 = vld [vmem:[#allocation5 + $0x27] sm:$0xff]  ;;  %v5541_v56 = vld [vmem:[%s12594_s5 + $0xd8] sm:$0xff] }
 0x449   : > { %v5540_v35 = vld [vmem:[%s12594_s5 + $0xd0] sm:$0xff]  ;;  %v5542_v57 = vld [vmem:[%s12594_s5 + $0xe0] sm:$0xff]  ;;  %v5694_v8 = vld [vmem:[%s12594_s5 + $0x118] sm:$0xff] }
 0x44a   : > { %v5039_v11 = vmax.f32 %v5005_v52, %v5011_v60  ;;  %v5035_v58 = vmax.f32 %v5001_v40, %v5003_v54  ;;  %v5036_v48 = vmax.f32 %v5002_v41, %v5004_v5  ;;  %v5037_v7 = vmax.f32 %v5003_v54, %v5005_v52  ;;  %v11932_v36 = vld [vmem:[#allocation5 + $0x21] sm:$0xff]  ;;  %v11942_v39 = vld [vmem:[#allocation5 + $0x29] sm:$0xff]  ;;  %v5691_v45 = vld [vmem:[%s12594_s5 + $0x100] sm:$0xff] }
 0x44b   : > { %v5038_v44 = vmax.f32 %v5004_v5, %v5010_v6  ;;  %v5082_v20 = vld [vmem:[#allocation4 + $0x91] ss:$2 sm:$0x3f]  ;;  %v9618_v46 = vpack.c.bf16 %v5541_v56, %v5540_v35  ;;  %v9622_v63 = vpack.c.bf16 %v5543_v59, %v5542_v57  ;;  %v5544_v4 = vld [vmem:[%s12594_s5 + $0xf0] sm:$0xff]  ;;  %v5698_v54 = vld [vmem:[%s12594_s5 + $0x138] sm:$0xff] }
 0x44c   : > { %5067 = vst.msk [vmem:[#allocation4 + $0xd8] sm:$0xff] %vm419_vm6, %v5039_v11  ;;  %5063 = vst.msk [vmem:[#allocation4 + $0xb8] sm:$0xff] %vm419_vm6, %v5035_v58  ;;  %v9626_v40 = vpack.c.bf16 %v5545_v37, %v5544_v4  ;;  %v5692_v60 = vld [vmem:[%s12594_s5 + $0x108] sm:$0xff]  ;;  %v5693_v6 = vld [vmem:[%s12594_s5 + $0x110] sm:$0xff] }
 0x44d   : > { %5064 = vst.msk [vmem:[#allocation4 + $0xc0] sm:$0xff] %vm419_vm6, %v5036_v48  ;;  %5065 = vst.msk [vmem:[#allocation4 + $0xc8] sm:$0xff] %vm419_vm6, %v5037_v7  ;;  %v11843_v43 = vld [vmem:[#allocation5 + $0x30] sm:$0xff]  ;;  %v9630_v1 = vpack.c.bf16 %v5692_v60, %v5691_v45  ;;  %v9634_v10 = vpack.c.bf16 %v5694_v8, %v5693_v6  ;;  %v5695_v12 = vld [vmem:[%s12594_s5 + $0x120] sm:$0xff] }
 0x44e   : > { %5066 = vst.msk [vmem:[#allocation4 + $0xd0] sm:$0xff] %vm419_vm6, %v5038_v44  ;;  %9049 = vmatmul.mubr.msk.f32.gmra.mrb[88].mxu0 %vm419_vm6, %v11843_v43  ;;  %v11893_v27 = vld [vmem:[#allocation5 + $0x2f] sm:$0xff]  ;;  %v5696_v47 = vld [vmem:[%s12594_s5 + $0x128] sm:$0xff]  ;;  %v5844_v11 = vld [vmem:[%s12594_s5 + $0x140] sm:$0xff] }
 0x44f   : > { %5083 = vst.msk [vmem:[#allocation5 + $0x39] sm:$0x3f] %vm5070_vm7, %v5082_v20  ;;  %v11946_v41 = vld [vmem:[#allocation5 + $0x31] sm:$0xff]  ;;  %v9638_v49 = vpack.c.bf16 %v5696_v47, %v5695_v12  ;;  %v5697_v52 = vld [vmem:[%s12594_s5 + $0x130] sm:$0xff]  ;;  %v5845_v58 = vld [vmem:[%s12594_s5 + $0x148] sm:$0xff] }
 0x450   : > { %v9642_v5 = vpack.c.bf16 %v5698_v54, %v5697_v52  ;;  %v12002_v48 = vld [vmem:[#allocation5 + $0x47] sm:$0xff]  ;;  %v9646_v7 = vpack.c.bf16 %v5845_v58, %v5844_v11  ;;  %v5847_v20 = vld [vmem:[%s12594_s5 + $0x158] sm:$0xff]  ;;  %v6001_v30 = vld [vmem:[%s12594_s5 + $0x1a0] sm:$0xff] }
 0x451   : > { %v5846_v44 = vld [vmem:[%s12594_s5 + $0x150] sm:$0xff]  ;;  %v5849_v24 = vld [vmem:[%s12594_s5 + $0x168] sm:$0xff]  ;;  %v6004_v56 = vld [vmem:[%s12594_s5 + $0x1b8] sm:$0xff] }
 0x452   : > { %v5998_v61 = vld [vmem:[%s12594_s5 + $0x188] sm:$0xff]  ;;  %v6003_v35 = vld [vmem:[%s12594_s5 + $0x1b0] sm:$0xff]  ;;  %v6153_v37 = vld [vmem:[%s12594_s5 + $0x1d8] sm:$0xff] }
 0x453   : > { %v5085_v32 = vld [vmem:[#allocation4 + $0xb1] ss:$2 sm:$0x3f]  ;;  %v12086_v59 = vld [vmem:[#allocation5 + $0x49] sm:$0xff] }
 0x454   : > { %5086 = vst.msk [vmem:[#allocation5 + $0x41] sm:$0x3f] %vm5070_vm7, %v5085_v32  ;;  %v9650_v32 = vpack.c.bf16 %v5847_v20, %v5846_v44  ;;  %v6151_v57 = vld [vmem:[%s12594_s5 + $0x1c8] sm:$0xff]  ;;  %v6152_v4 = vld [vmem:[%s12594_s5 + $0x1d0] sm:$0xff]  ;;  %v6154_v45 = vld [vmem:[%s12594_s5 + $0x1e0] sm:$0xff] }
 0x455   : > { %v6155_v60 = vld [vmem:[%s12594_s5 + $0x1e8] sm:$0xff]  ;;  %v6157_v6 = vld [vmem:[%s12594_s5 + $0x1f8] sm:$0xff]  ;;  %v6307_v47 = vld [vmem:[%s12594_s5 + $0x220] sm:$0xff] }
 0x456   : > { %v11848_v16 = vld [vmem:[#allocation5 + $0x38] sm:$0xff]  ;;  %v6304_v8 = vld [vmem:[%s12594_s5 + $0x208] sm:$0xff]  ;;  %v6306_v12 = vld [vmem:[%s12594_s5 + $0x218] sm:$0xff] }
 0x457   : > { %9051 = vmatprep.mubr.msk.f32.mxu0 %vm419_vm6, %v11848_v16  ;;  %v11903_v31 = vld [vmem:[#allocation5 + $0x37] sm:$0xff]  ;;  %v6548_v58 = vld [vmem:[%s12596_s7 + $0x70] sm:$0xff] }
 0x458   : > { %v11956_v25 = vld [vmem:[#allocation5 + $0x39] sm:$0xff]  ;;  %v6310_v54 = vld [vmem:[%s12594_s5 + $0x238] sm:$0xff]  ;;  %v7841_v44 = vld [vmem:[%s12595_s6] ss:$0 sm:$0xff] }
 0x45b   : > { %v11853_v55 = vld [vmem:[#allocation5 + $0x40] sm:$0xff] }
 0x45c   : > { %9052 = vmatmul.mubr.msk.f32.gmra.mrb[90].mxu0 %vm419_vm6, %v11853_v55  ;;  %v11907_v34 = vld [vmem:[#allocation5 + $0x3f] sm:$0xff] }
 0x45d   : > { %9070 = vmatprep.mubr.msk.f32.mxu0 %vm419_vm6, %v5087_v50  ;;  %v11960_v2 = vld [vmem:[#allocation5 + $0x41] sm:$0xff]  ;;  %v5848_v50 = vld [vmem:[%s12594_s5 + $0x160] sm:$0xff] }
 0x45e   : > { %v9654_v17 = vpack.c.bf16 %v5849_v24, %v5848_v50 }
 0x460   : > { %9071 = vmatmul.mubr.msk.f32.vlgmr.msra.gmra.mrb[84].mxu0 %vm419_vm6, %v11864_v3 }
 0x461   : > { %9601 = vmatpush3.bf16.msra.mxu0 %v11723_v0  ;;  %9073 = vmatprep.mubr.msk.f32.mxu0 %vm419_vm6, %v11874_v15  ;;  %v9610_v0 = vpack.c.bf16 %v5392_v22, %v5391_v21  ;;  %v9662_v21 = vpack.c.bf16 %v5998_v61, %v5997_v14  ;;  %v5999_v22 = vld [vmem:[%s12594_s5 + $0x190] sm:$0xff] }
 0x462   : > { %9603 = vmatprep.subr.bf16.mxu0 %v9602_v38 }
 0x464   : > { %9074 = vmatmul.mubr.msk.f32.gmra.mrb[86].mxu0 %vm419_vm6, %v11879_v19 }
 0x465   : > { %9605 = vmatpush3.bf16.msra.mxu0 %v9602_v38  ;;  %9076 = vmatprep.mubr.msk.f32.mxu0 %vm419_vm6, %v11889_v23 }
 0x466   : > { %9607 = vmatprep.subr.bf16.mxu0 %v9606_v18 }
 0x468   : > { %9077 = vmatmul.mubr.msk.f32.gmra.mrb[88].mxu0 %vm419_vm6, %v11893_v27 }
 0x469   : > { %9609 = vmatpush3.bf16.msra.mxu0 %v9606_v18  ;;  %9079 = vmatprep.mubr.msk.f32.mxu0 %vm419_vm6, %v11903_v31  ;;  %v12044_v18 = vld [vmem:[#allocation5 + $0x48] sm:$0xff] }
 0x46a   : > { %9611 = vmatprep.subr.bf16.mxu0 %v9610_v0 }
 0x46c   : > { %9080 = vmatmul.mubr.msk.f32.gmra.mrb[90].mxu0 %vm419_vm6, %v11907_v34 }
 0x46d   : > { %9613 = vmatpush3.bf16.msra.mxu0 %v9610_v0  ;;  %9098 = vmatprep.mubr.msk.f32.mxu0 %vm419_vm6, %v5377_v51  ;;  %v6000_v0 = vld [vmem:[%s12594_s5 + $0x198] sm:$0xff]  ;;  %v6002_v51 = vld [vmem:[%s12594_s5 + $0x1a8] sm:$0xff] }
 0x46e   : > { %9615 = vmatprep.subr.bf16.mxu0 %v9614_v33  ;;  %v9666_v29 = vpack.c.bf16 %v6000_v0, %v5999_v22 }
 0x470   : > { %9099 = vmatmul.mubr.msk.f32.vlgmr.msra.gmra.mrb[84].mxu0 %vm419_vm6, %v11918_v28 }
 0x471   : > { %9617 = vmatpush3.bf16.msra.mxu0 %v9614_v33  ;;  %9101 = vmatprep.mubr.msk.f32.mxu0 %vm419_vm6, %v11928_v62  ;;  %v9670_v33 = vpack.c.bf16 %v6002_v51, %v6001_v30 }
 0x472   : > { %9619 = vmatprep.subr.bf16.mxu0 %v9618_v46 }
 0x474   : > { %9102 = vmatmul.mubr.msk.f32.gmra.mrb[86].mxu0 %vm419_vm6, %v11932_v36 }
 0x475   : > { %9621 = vmatpush3.bf16.msra.mxu0 %v9618_v46  ;;  %9104 = vmatprep.mubr.msk.f32.mxu0 %vm419_vm6, %v11942_v39  ;;  %v6150_v46 = vld [vmem:[%s12594_s5 + $0x1c0] sm:$0xff] }
 0x476   : > { %9623 = vmatprep.subr.bf16.mxu0 %v9622_v63 }
 0x478   : > { %9105 = vmatmul.mubr.msk.f32.gmra.mrb[88].mxu0 %vm419_vm6, %v11946_v41 }
 0x479   : > { %9625 = vmatpush3.bf16.msra.mxu0 %v9622_v63  ;;  %9107 = vmatprep.mubr.msk.f32.mxu0 %vm419_vm6, %v11956_v25  ;;  %v9678_v63 = vpack.c.bf16 %v6151_v57, %v6150_v46 }
 0x47a   : > { %9627 = vmatprep.subr.bf16.mxu0 %v9626_v40 }
 0x47c   : > { %9108 = vmatmul.mubr.msk.f32.gmra.mrb[90].mxu0 %vm419_vm6, %v11960_v2 }
 0x47d   : > { %9629 = vmatpush3.bf16.msra.mxu0 %v9626_v40  ;;  %9126 = vmatprep.mubr.msk.f32.mxu0 %vm419_vm6, %v11864_v3  ;;  %v5851_v3 = vld [vmem:[%s12594_s5 + $0x178] sm:$0xff]  ;;  %v9682_v40 = vpack.c.bf16 %v6153_v37, %v6152_v4 }
 0x47e   : > { %9631 = vmatprep.subr.bf16.mxu0 %v9630_v1 }
 0x480   : > { %9127 = vmatmul.mubr.msk.f32.vlgmr.msra.gmra.mrb[84].mxu0 %vm419_vm6, %v11874_v15 }
 0x481   : > { %9633 = vmatpush3.bf16.msra.mxu0 %v9630_v1  ;;  %9129 = vmatprep.mubr.msk.f32.mxu0 %vm419_vm6, %v11879_v19  ;;  %v9686_v1 = vpack.c.bf16 %v6155_v60, %v6154_v45 }
 0x482   : > { %9635 = vmatprep.subr.bf16.mxu0 %v9634_v10 }
 0x484   : > { %9130 = vmatmul.mubr.msk.f32.gmra.mrb[86].mxu0 %vm419_vm6, %v11889_v23 }
 0x485   : > { %9637 = vmatpush3.bf16.msra.mxu0 %v9634_v10  ;;  %9132 = vmatprep.mubr.msk.f32.mxu0 %vm419_vm6, %v11893_v27  ;;  %v6305_v10 = vld [vmem:[%s12594_s5 + $0x210] sm:$0xff] }
 0x486   : > { %9639 = vmatprep.subr.bf16.mxu0 %v9638_v49 }
 0x488   : > { %9133 = vmatmul.mubr.msk.f32.gmra.mrb[88].mxu0 %vm419_vm6, %v11903_v31 }
 0x489   : > { %9641 = vmatpush3.bf16.msra.mxu0 %v9638_v49  ;;  %9135 = vmatprep.mubr.msk.f32.mxu0 %vm419_vm6, %v11907_v34  ;;  %v6308_v49 = vld [vmem:[%s12594_s5 + $0x228] sm:$0xff] }
 0x48a   : > { %9643 = vmatprep.subr.bf16.mxu0 %v9642_v5  ;;  %v9702_v52 = vpack.c.bf16 %v6308_v49, %v6307_v47 }
 0x48c   : > { %9136 = vmatmul.mubr.msk.f32.gmra.mrb[90].mxu0 %vm419_vm6, %v12002_v48 }
 0x48d   : > { %9645 = vmatpush3.bf16.msra.mxu0 %v9642_v5  ;;  %9154 = vmatprep.mubr.msk.f32.mxu0 %vm419_vm6, %v11689_v53  ;;  %v5850_v53 = vld [vmem:[%s12594_s5 + $0x170] sm:$0xff]  ;;  %v6547_v5 = vld [vmem:[%s12596_s7 + $0x68] sm:$0xff] }
 0x48e   : > { %9647 = vmatprep.subr.bf16.mxu0 %v9646_v7  ;;  %v9658_v38 = vpack.c.bf16 %v5851_v3, %v5850_v53 }
 0x490   : > { %9155 = vmatmul.mubr.msk.f32.vlgmr.msra.gmra.mrb[84].mxu0 %vm419_vm6, %v11803_v9 }
 0x491   : > { %9649 = vmatpush3.bf16.msra.mxu0 %v9646_v7  ;;  %9157 = vmatprep.mubr.msk.f32.mxu0 %vm419_vm6, %v11820_v26 }
 0x492   : > { %9651 = vmatprep.subr.bf16.mxu0 %v9650_v32 }
 0x494   : > { %9158 = vmatmul.mubr.msk.f32.gmra.mrb[86].mxu0 %vm419_vm6, %v11831_v42 }
 0x495   : > { %9653 = vmatpush3.bf16.msra.mxu0 %v9650_v32  ;;  %9160 = vmatprep.mubr.msk.f32.mxu0 %vm419_vm6, %v11843_v43 }
 0x496   : > { %9655 = vmatprep.subr.bf16.mxu0 %v9654_v17 }
 0x498   : > { %9161 = vmatmul.mubr.msk.f32.gmra.mrb[88].mxu0 %vm419_vm6, %v11848_v16 }
 0x499   : > { %9657 = vmatpush3.bf16.msra.mxu0 %v9654_v17  ;;  %9163 = vmatprep.mubr.msk.f32.mxu0 %vm419_vm6, %v11853_v55 }
 0x49a   : > { %9659 = vmatprep.subr.bf16.mxu0 %v9658_v38 }
 0x49c   : > { %9164 = vmatmul.mubr.msk.f32.gmra.mrb[90].mxu0 %vm419_vm6, %v12044_v18 }
 0x49d   : > { %9661 = vmatpush3.bf16.msra.mxu0 %v9658_v38  ;;  %9182 = vmatprep.mubr.msk.f32.mxu0 %vm419_vm6, %v11918_v28  ;;  %v9674_v28 = vpack.c.bf16 %v6004_v56, %v6003_v35 }
 0x49e   : > { %9663 = vmatprep.subr.bf16.mxu0 %v9662_v21 }
 0x4a0   : > { %9183 = vmatmul.mubr.msk.f32.vlgmr.msra.gmra.mrb[84].mxu0 %vm419_vm6, %v11928_v62 }
 0x4a1   : > { %9665 = vmatpush3.bf16.msra.mxu0 %v9662_v21  ;;  %9185 = vmatprep.mubr.msk.f32.mxu0 %vm419_vm6, %v11932_v36 }
 0x4a2   : > { %9667 = vmatprep.subr.bf16.mxu0 %v9666_v29 }
 0x4a4   : > { %9186 = vmatmul.mubr.msk.f32.gmra.mrb[86].mxu0 %vm419_vm6, %v11942_v39 }
 0x4a5   : > { %9669 = vmatpush3.bf16.msra.mxu0 %v9666_v29  ;;  %9188 = vmatprep.mubr.msk.f32.mxu0 %vm419_vm6, %v11946_v41 }
 0x4a6   : > { %9671 = vmatprep.subr.bf16.mxu0 %v9670_v33 }
 0x4a8   : > { %9189 = vmatmul.mubr.msk.f32.gmra.mrb[88].mxu0 %vm419_vm6, %v11956_v25 }
 0x4a9   : > { %9673 = vmatpush3.bf16.msra.mxu0 %v9670_v33  ;;  %9191 = vmatprep.mubr.msk.f32.mxu0 %vm419_vm6, %v11960_v2 }
 0x4aa   : > { %9675 = vmatprep.subr.bf16.mxu0 %v9674_v28 }
 0x4ac   : > { %9192 = vmatmul.mubr.msk.f32.gmra.mrb[90].mxu0 %vm419_vm6, %v12086_v59 }
 0x4ad   : > { %9677 = vmatpush3.bf16.msra.mxu0 %v9674_v28  ;;  %9210 = vmatprep.mubr.msk.f32.mxu0 %vm419_vm6, %v11874_v15  ;;  %v6156_v15 = vld [vmem:[%s12594_s5 + $0x1f0] sm:$0xff] }
 0x4ae   : > { %9679 = vmatprep.subr.bf16.mxu0 %v9678_v63 }
 0x4b0   : > { %9211 = vmatmul.mubr.msk.f32.vlgmr.msra.gmra.mrb[84].mxu0 %vm419_vm6, %v11879_v19  ;;  %v9690_v19 = vpack.c.bf16 %v6157_v6, %v6156_v15 }
 0x4b1   : > { %9681 = vmatpush3.bf16.msra.mxu0 %v9678_v63  ;;  %9213 = vmatprep.mubr.msk.f32.mxu0 %vm419_vm6, %v11889_v23  ;;  %v6303_v23 = vld [vmem:[%s12594_s5 + $0x200] sm:$0xff] }
 0x4b2   : > { %9683 = vmatprep.subr.bf16.mxu0 %v9682_v40 }
 0x4b4   : > { %9214 = vmatmul.mubr.msk.f32.gmra.mrb[86].mxu0 %vm419_vm6, %v11893_v27  ;;  %v5996_v27 = vld [vmem:[#allocation5 + $0x4f] sm:$0xff] }
 0x4b5   : > { %9685 = vmatpush3.bf16.msra.mxu0 %v9682_v40  ;;  %9216 = vmatprep.mubr.msk.f32.mxu0 %vm419_vm6, %v11903_v31  ;;  %v9694_v31 = vpack.c.bf16 %v6304_v8, %v6303_v23  ;;  %v6503_v8 = vld [vmem:[#allocation6 + $0x40] sm:$0xff] }
 0x4b6   : > { %9687 = vmatprep.subr.bf16.mxu0 %v9686_v1 }
 0x4b8   : > { %9217 = vmatmul.mubr.msk.f32.gmra.mrb[88].mxu0 %vm419_vm6, %v11907_v34  ;;  %v9698_v34 = vpack.c.bf16 %v6306_v12, %v6305_v10 }
 0x4b9   : > { %9689 = vmatpush3.bf16.msra.mxu0 %v9686_v1  ;;  %9219 = vmatprep.mubr.msk.f32.mxu0 %vm419_vm6, %v12002_v48  ;;  %v6549_v48 = vld [vmem:[%s12596_s7 + $0x78] sm:$0xff] }
 0x4ba   : > { %9691 = vmatprep.subr.bf16.mxu0 %v9690_v19  ;;  %v9720_v7 = vpack.c.bf16 %v6549_v48, %v6548_v58 }
 0x4bc   : > { %9220 = vmatmul.mubr.msk.f32.gmra.mrb[90].mxu0 %vm419_vm6, %v5996_v27  ;;  %v6504_v27 = vld [vmem:[#allocation6 + $0x41] sm:$0xff] }
 0x4bd   : > { %9693 = vmatpush3.bf16.msra.mxu0 %v9690_v19  ;;  %9238 = vmatprep.mubr.msk.f32.mxu0 %vm419_vm6, %v11803_v9  ;;  %v6309_v9 = vld [vmem:[%s12594_s5 + $0x230] sm:$0xff] }
 0x4be   : > { %9695 = vmatprep.subr.bf16.mxu0 %v9694_v31 }
 0x4c0   : > { %9239 = vmatmul.mubr.msk.f32.vlgmr.msra.gmra.mrb[84].mxu0 %vm419_vm6, %v11820_v26  ;;  %v9706_v26 = vpack.c.bf16 %v6310_v54, %v6309_v9 }
 0x4c1   : > { %9697 = vmatpush3.bf16.msra.mxu0 %v9694_v31  ;;  %9241 = vmatprep.mubr.msk.f32.mxu0 %vm419_vm6, %v11831_v42  ;;  %v6149_v42 = vld [vmem:[#allocation5 + $0x50] sm:$0xff] }
 0x4c2   : > { %9699 = vmatprep.subr.bf16.mxu0 %v9698_v34 }
 0x4c4   : > { %9242 = vmatmul.mubr.msk.f32.gmra.mrb[86].mxu0 %vm419_vm6, %v11843_v43  ;;  %v6302_v43 = vld [vmem:[#allocation5 + $0x51] sm:$0xff] }
 0x4c5   : > { %9701 = vmatpush3.bf16.msra.mxu0 %v9698_v34  ;;  %9244 = vmatprep.mubr.msk.f32.mxu0 %vm419_vm6, %v11848_v16  ;;  %v6542_v16 = vld [vmem:[%s12596_s7 + $0x40] sm:$0xff] }
 0x4c6   : > { %9703 = vmatprep.subr.bf16.mxu0 %v9702_v52 }
 0x4c8   : > { %9245 = vmatmul.mubr.msk.f32.gmra.mrb[88].mxu0 %vm419_vm6, %v11853_v55  ;;  %v6543_v55 = vld [vmem:[%s12596_s7 + $0x48] sm:$0xff] }
 0x4c9   : > { %9705 = vmatpush3.bf16.msra.mxu0 %v9702_v52  ;;  %9247 = vmatprep.mubr.msk.f32.mxu0 %vm419_vm6, %v12044_v18  ;;  %v6505_v52 = vmax.f32 %v6503_v8, %v6504_v27  ;;  %v6786_v27 = vld [vmem:[%s12596_s7 + $0xf0] sm:$0xff] }
 0x4ca   : > { %9707 = vmatprep.subr.bf16.mxu0 %v9706_v26 }
 0x4cc   : > { %9248 = vmatmul.mubr.msk.f32.gmra.mrb[90].mxu0 %vm419_vm6, %v6149_v42 }
 0x4cd   : > { %9709 = vmatpush3.bf16.msra.mxu0 %v9706_v26  ;;  %9266 = vmatprep.mubr.msk.f32.mxu0 %vm419_vm6, %v11928_v62  ;;  %v9711_v62 = vpack.c.bf16 %v6543_v55, %v6542_v16 }
 0x4d0   : > { %9267 = vmatmul.mubr.msk.f32.vlgmr.msra.gmra.mrb[84].mxu0 %vm419_vm6, %v11932_v36  ;;  %v10245_v36 = vmov 0.0|0.0  }
 0x4d1   : > { %9269 = vmatprep.mubr.msk.f32.mxu0 %vm419_vm6, %v11942_v39  ;;  %9710 = vmatprep.subr.bf16.mxu0 %v10245_v36  ;;  %v6544_v39 = vld [vmem:[%s12596_s7 + $0x50] sm:$0xff] }
 0x4d2   : > { %9712 = vmatpush3.bf16.msra.mxu0 %v9711_v62 }
 0x4d3   : > { %9713 = vmatprep.subr.bf16.mxu0 %v10245_v36 }
 0x4d4   : > { %9270 = vmatmul.mubr.msk.f32.gmra.mrb[86].mxu0 %vm419_vm6, %v11946_v41  ;;  %v6545_v41 = vld [vmem:[%s12596_s7 + $0x58] sm:$0xff] }
 0x4d5   : > { %9272 = vmatprep.mubr.msk.f32.mxu0 %vm419_vm6, %v11956_v25  ;;  %v9714_v25 = vpack.c.bf16 %v6545_v41, %v6544_v39 }
 0x4d7   : > { %9715 = vmatpush3.bf16.msra.mxu0 %v9714_v25 }
 0x4d8   : > { %9273 = vmatmul.mubr.msk.f32.gmra.mrb[88].mxu0 %vm419_vm6, %v11960_v2  ;;  %9716 = vmatprep.subr.bf16.mxu0 %v10245_v36  ;;  %v6546_v2 = vld [vmem:[%s12596_s7 + $0x60] sm:$0xff] }
 0x4d9   : > { %9275 = vmatprep.mubr.msk.f32.mxu0 %vm419_vm6, %v12086_v59  ;;  %v9717_v11 = vpack.c.bf16 %v6547_v5, %v6546_v2 }
 0x4db   : > { %9718 = vmatpush3.bf16.msra.mxu0 %v9717_v11 }
 0x4dc   : > { %9276 = vmatmul.mubr.msk.f32.gmra.mrb[90].mxu0 %vm419_vm6, %v6302_v43  ;;  %9719 = vmatprep.subr.bf16.mxu0 %v10245_v36 }
 0x4dd   : > { %9294 = vmatprep.mubr.msk.f32.mxu0 %vm10246_vm8, %v12669_v13 }
 0x4df   : > { %9721 = vmatpush3.bf16.msra.mxu0 %v9720_v7  ;;  %v6533_v7 = vld [vmem:[%s12596_s7] sm:$0xff] }
 0x4e0   : > { %9722 = vmatprep.subr.bf16.mxu0 %v10245_v36 }
 0x5a3   : > { %v9268_v20 = vpop.f32.mrb[84].mxu0 }
 0x5a4   : > { %v6456_v32 = vadd.f32 %v9268_v20, %v7841_v44  ;;  %v6401_v50 = vpop.f32.mrb[85].mxu0 }
 0x5a5   : > { %v6455_v24 = vadd.f32 %v7841_v44, %v6401_v50  ;;  %v6535_v50 = vld [vmem:[%s12596_s7 + $0x10] sm:$0xff] }
 0x5a6   : > { %v6464_v17 = vmax.f32 %v6456_v32, 0.0 }
 0x5a7   : > { %v6463_v53 = vmax.f32 %v6455_v24, 0.0  ;;  %v9271_v3 = vpop.f32.mrb[86].mxu0  ;;  %v6536_v24 = vld [vmem:[%s12596_s7 + $0x18] sm:$0xff] }
 0x5a8   : > { %6472 = vst.msk [vmem:[#allocation6 + $0x8] sm:$0xff] %vm419_vm6, %v6464_v17  ;;  %v6458_v38 = vadd.f32 %v9271_v3, %v7841_v44  ;;  %v6411_v14 = vpop.f32.mrb[87].mxu0  ;;  %v9726_v3 = vpack.c.bf16 %v6536_v24, %v6535_v50  ;;  %v7029_v24 = vld [vmem:[%s12596_s7 + $0x180] sm:$0xff] }
 0x5a9   : > { %6471 = vst.msk [vmem:[#allocation6] sm:$0xff] %vm419_vm6, %v6463_v53  ;;  %v6457_v61 = vadd.f32 %v7841_v44, %v6411_v14  ;;  %v6538_v14 = vld [vmem:[%s12596_s7 + $0x28] sm:$0xff] }
 0x5aa   : > { %v6466_v18 = vmax.f32 %v6458_v38, 0.0  ;;  %v6537_v38 = vld [vmem:[%s12596_s7 + $0x20] sm:$0xff] }
 0x5ab   : > { %v6465_v21 = vmax.f32 %v6457_v61, 0.0  ;;  %v9274_v22 = vpop.f32.mrb[88].mxu0  ;;  %v9729_v61 = vpack.c.bf16 %v6538_v14, %v6537_v38  ;;  %v7032_v38 = vld [vmem:[%s12596_s7 + $0x198] sm:$0xff] }
 0x5ac   : > { %6474 = vst.msk [vmem:[#allocation6 + $0x18] sm:$0xff] %vm419_vm6, %v6466_v18  ;;  %v6460_v0 = vadd.f32 %v9274_v22, %v7841_v44  ;;  %v6421_v29 = vpop.f32.mrb[89].mxu0  ;;  %v6539_v18 = vld [vmem:[%s12596_s7 + $0x30] sm:$0xff] }
 0x5ad   : > { %6473 = vst.msk [vmem:[#allocation6 + $0x10] sm:$0xff] %vm419_vm6, %v6465_v21  ;;  %v6459_v30 = vadd.f32 %v7841_v44, %v6421_v29  ;;  %v6540_v21 = vld [vmem:[%s12596_s7 + $0x38] sm:$0xff]  ;;  %v6698_v29 = vld [vmem:[%s12596_s7 + $0x88] sm:$0xff] }
 0x5ae   : > { %v6468_v51 = vmax.f32 %v6460_v0, 0.0  ;;  %v9732_v22 = vpack.c.bf16 %v6540_v21, %v6539_v18  ;;  %v6697_v0 = vld [vmem:[%s12596_s7 + $0x80] sm:$0xff]  ;;  %v7034_v21 = vld [vmem:[%s12596_s7 + $0x1a8] sm:$0xff] }
 0x5af   : > { %v6467_v33 = vmax.f32 %v6459_v30, 0.0  ;;  %v9277_v35 = vpop.f32.mrb[90].mxu0  ;;  %v6480_v4 = vld [vmem:[#allocation6 + $0x8] sm:$0xff]  ;;  %v9735_v30 = vpack.c.bf16 %v6698_v29, %v6697_v0  ;;  %v7033_v18 = vld [vmem:[%s12596_s7 + $0x1a0] sm:$0xff]  ;;  %v7036_v29 = vld [vmem:[%s12596_s7 + $0x1b8] sm:$0xff] }
 0x5b0   : > { %6476 = vst.msk [vmem:[#allocation6 + $0x28] sm:$0xff] %vm419_vm6, %v6468_v51  ;;  %v6462_v56 = vadd.f32 %v9277_v35, %v7841_v44  ;;  %v6431_v28 = vpop.f32.mrb[91].mxu0  ;;  %v6479_v57 = vld [vmem:[#allocation6] sm:$0xff]  ;;  %v6699_v51 = vld [vmem:[%s12596_s7 + $0x90] sm:$0xff] }
 0x5b1   : > { %6475 = vst.msk [vmem:[#allocation6 + $0x20] sm:$0xff] %vm419_vm6, %v6467_v33  ;;  %v6461_v46 = vadd.f32 %v7841_v44, %v6431_v28  ;;  %v6487_v59 = vld [vmem:[#allocation6 + $0x1] sm:$0xff]  ;;  %v6700_v33 = vld [vmem:[%s12596_s7 + $0x98] sm:$0xff]  ;;  %v6701_v28 = vld [vmem:[%s12596_s7 + $0xa0] sm:$0xff] }
 0x5b2   : > { %v6470_v63 = vmax.f32 %v6462_v56, 0.0  ;;  %v6495_v1 = vmax.f32 %v6479_v57, %v6487_v59  ;;  %v6534_v44 = vld [vmem:[%s12596_s7 + $0x8] sm:$0xff]  ;;  %v9738_v56 = vpack.c.bf16 %v6700_v33, %v6699_v51  ;;  %v6703_v59 = vld [vmem:[%s12596_s7 + $0xb0] sm:$0xff]  ;;  %v7112_v51 = vld [vmem:[%s12596_s7 + $0x1c0] sm:$0xff] }
 0x5b3   : > { %v6469_v37 = vmax.f32 %v6461_v46, 0.0  ;;  %v6482_v23 = vld [vmem:[#allocation6 + $0x18] sm:$0xff]  ;;  %v9723_v32 = vpack.c.bf16 %v6534_v44, %v6533_v7  ;;  %v6702_v46 = vld [vmem:[%s12596_s7 + $0xa8] sm:$0xff]  ;;  %v7035_v0 = vld [vmem:[%s12596_s7 + $0x1b0] sm:$0xff] }
 0x5b4   : > { %v6481_v40 = vld [vmem:[#allocation6 + $0x10] sm:$0xff]  ;;  %6478 = vst.msk [vmem:[#allocation6 + $0x38] sm:$0xff] %vm419_vm6, %v6470_v63  ;;  %v9741_v57 = vpack.c.bf16 %v6702_v46, %v6701_v28  ;;  %v6951_v7 = vld [vmem:[%s12596_s7 + $0x168] sm:$0xff] }
 0x5b5   : > { %v6488_v45 = vld [vmem:[#allocation6 + $0x9] sm:$0xff]  ;;  %v6489_v60 = vld [vmem:[#allocation6 + $0x11] sm:$0xff]  ;;  %6477 = vst.msk [vmem:[#allocation6 + $0x30] sm:$0xff] %vm419_vm6, %v6469_v37  ;;  %v7113_v33 = vld [vmem:[%s12596_s7 + $0x1c8] sm:$0xff] }
 0x5b6   : > { %v6496_v15 = vmax.f32 %v6480_v4, %v6488_v45  ;;  %v6497_v6 = vmax.f32 %v6481_v40, %v6489_v60  ;;  %v6704_v63 = vld [vmem:[%s12596_s7 + $0xb8] sm:$0xff]  ;;  %v6780_v37 = vld [vmem:[%s12596_s7 + $0xc0] sm:$0xff]  ;;  %v6781_v40 = vld [vmem:[%s12596_s7 + $0xc8] sm:$0xff] }
 0x5b7   : > { %v6484_v9 = vld [vmem:[#allocation6 + $0x28] sm:$0xff]  ;;  %v9744_v4 = vpack.c.bf16 %v6704_v63, %v6703_v59  ;;  %v9747_v45 = vpack.c.bf16 %v6781_v40, %v6780_v37  ;;  %v7115_v28 = vld [vmem:[%s12596_s7 + $0x1d8] sm:$0xff]  ;;  %v7116_v59 = vld [vmem:[%s12596_s7 + $0x1e0] sm:$0xff] }
 0x5b8   : > { %v6506_v19 = vmax.f32 %v6495_v1, %v6496_v15  ;;  %v6507_v31 = vmax.f32 %v6496_v15, %v6497_v6  ;;  %v6483_v10 = vld [vmem:[#allocation6 + $0x20] sm:$0xff]  ;;  %v6782_v60 = vld [vmem:[%s12596_s7 + $0xd0] sm:$0xff]  ;;  %v6783_v1 = vld [vmem:[%s12596_s7 + $0xd8] sm:$0xff] }
 0x5b9   : > { %v6490_v12 = vld [vmem:[#allocation6 + $0x19] sm:$0xff]  ;;  %v6491_v34 = vld [vmem:[#allocation6 + $0x21] sm:$0xff]  ;;  %v7119_v40 = vld [vmem:[%s12596_s7 + $0x1f8] sm:$0xff] }
 0x5ba   : > { %6514 = vst.msk [vmem:[#allocation6] sm:$0xff] %vm419_vm6, %v6506_v19  ;;  %v6498_v47 = vmax.f32 %v6482_v23, %v6490_v12  ;;  %v6499_v49 = vmax.f32 %v6483_v10, %v6491_v34  ;;  %6515 = vst.msk [vmem:[#allocation6 + $0x8] sm:$0xff] %vm419_vm6, %v6507_v31  ;;  %v6784_v19 = vld [vmem:[%s12596_s7 + $0xe0] sm:$0xff]  ;;  %v6785_v23 = vld [vmem:[%s12596_s7 + $0xe8] sm:$0xff] }
 0x5bb   : > { %v6486_v54 = vld [vmem:[#allocation6 + $0x38] sm:$0xff]  ;;  %v9753_v8 = vpack.c.bf16 %v6785_v23, %v6784_v19  ;;  %v6787_v31 = vld [vmem:[%s12596_s7 + $0xf8] sm:$0xff]  ;;  %v6864_v34 = vld [vmem:[%s12596_s7 + $0x108] sm:$0xff] }
 0x5bc   : > { %v6494_v26 = vld [vmem:[#allocation6 + $0x39] sm:$0xff]  ;;  %v6508_v42 = vmax.f32 %v6497_v6, %v6498_v47  ;;  %v6509_v43 = vmax.f32 %v6498_v47, %v6499_v49  ;;  %v6485_v16 = vld [vmem:[#allocation6 + $0x30] sm:$0xff]  ;;  %v9750_v6 = vpack.c.bf16 %v6783_v1, %v6782_v60  ;;  %v9756_v10 = vpack.c.bf16 %v6787_v31, %v6786_v27  ;;  %v7118_v37 = vld [vmem:[%s12596_s7 + $0x1f0] sm:$0xff] }
 0x5bd   : > { %v6492_v55 = vld [vmem:[#allocation6 + $0x29] sm:$0xff]  ;;  %v6493_v62 = vld [vmem:[#allocation6 + $0x31] sm:$0xff]  ;;  %v6502_v39 = vmax.f32 %v6486_v54, %v6494_v26  ;;  %v7117_v63 = vld [vmem:[%s12596_s7 + $0x1e8] sm:$0xff] }
 0x5be   : > { %v6500_v41 = vmax.f32 %v6484_v9, %v6492_v55  ;;  %v6501_v25 = vmax.f32 %v6485_v16, %v6493_v62  ;;  %6516 = vst.msk [vmem:[#allocation6 + $0x10] sm:$0xff] %vm419_vm6, %v6508_v42  ;;  %6517 = vst.msk [vmem:[#allocation6 + $0x18] sm:$0xff] %vm419_vm6, %v6509_v43  ;;  %v6863_v12 = vld [vmem:[%s12596_s7 + $0x100] sm:$0xff]  ;;  %v6868_v42 = vld [vmem:[%s12596_s7 + $0x128] sm:$0xff] }
 0x5bf   : > { %v6513_v2 = vmax.f32 %v6502_v39, %v6505_v52  ;;  %v9759_v47 = vpack.c.bf16 %v6864_v34, %v6863_v12  ;;  %v6866_v52 = vld [vmem:[%s12596_s7 + $0x118] sm:$0xff]  ;;  %v6867_v26 = vld [vmem:[%s12596_s7 + $0x120] sm:$0xff]  ;;  %v6869_v16 = vld [vmem:[%s12596_s7 + $0x130] sm:$0xff] }
 0x5c0   : > { %v6510_v5 = vmax.f32 %v6499_v49, %v6500_v41  ;;  %v6511_v11 = vmax.f32 %v6500_v41, %v6501_v25  ;;  %v6512_v58 = vmax.f32 %v6501_v25, %v6502_v39  ;;  %v6865_v49 = vld [vmem:[%s12596_s7 + $0x110] sm:$0xff]  ;;  %v9765_v43 = vpack.c.bf16 %v6868_v42, %v6867_v26  ;;  %v6870_v55 = vld [vmem:[%s12596_s7 + $0x138] sm:$0xff]  ;;  %v6946_v39 = vld [vmem:[%s12596_s7 + $0x140] sm:$0xff] }
 0x5c1   : > { %6521 = vst.msk [vmem:[#allocation6 + $0x38] sm:$0xff] %vm419_vm6, %v6513_v2  ;;  %v6523_v48 = vld [vmem:[#allocation6 + $0x9] ss:$2 sm:$0x7]  ;;  %v9762_v54 = vpack.c.bf16 %v6866_v52, %v6865_v49  ;;  %v9768_v62 = vpack.c.bf16 %v6870_v55, %v6869_v16  ;;  %v6947_v41 = vld [vmem:[%s12596_s7 + $0x148] sm:$0xff]  ;;  %v7195_v60 = vld [vmem:[%s12596_s7 + $0x200] sm:$0xff] }
 0x5c2   : > { %6518 = vst.msk [vmem:[#allocation6 + $0x20] sm:$0xff] %vm419_vm6, %v6510_v5  ;;  %6519 = vst.msk [vmem:[#allocation6 + $0x28] sm:$0xff] %vm419_vm6, %v6511_v11  ;;  %v9771_v25 = vpack.c.bf16 %v6947_v41, %v6946_v39  ;;  %v6948_v2 = vld [vmem:[%s12596_s7 + $0x150] sm:$0xff]  ;;  %v6949_v5 = vld [vmem:[%s12596_s7 + $0x158] sm:$0xff] }
 0x5c3   : > { %6520 = vst.msk [vmem:[#allocation6 + $0x30] sm:$0xff] %vm419_vm6, %v6512_v58  ;;  %v9774_v58 = vpack.c.bf16 %v6949_v5, %v6948_v2  ;;  %v7196_v1 = vld [vmem:[%s12596_s7 + $0x208] sm:$0xff]  ;;  %v7198_v19 = vld [vmem:[%s12596_s7 + $0x218] sm:$0xff]  ;;  %v7199_v27 = vld [vmem:[%s12596_s7 + $0x220] sm:$0xff] }
 0x5c4   : > { %6525 = vst.msk [vmem:[#allocation7] sm:$0x7] %vm6524_vm9, %v6523_v48  ;;  %v6950_v48 = vld [vmem:[%s12596_s7 + $0x160] sm:$0xff]  ;;  %v7200_v31 = vld [vmem:[%s12596_s7 + $0x228] sm:$0xff]  ;;  %v7201_v12 = vld [vmem:[%s12596_s7 + $0x230] sm:$0xff] }
 0x5c5   : > { %v6527_v20 = vld [vmem:[#allocation6 + $0x19] ss:$2 sm:$0x7]  ;;  %v9777_v44 = vpack.c.bf16 %v6951_v7, %v6950_v48  ;;  %v7202_v34 = vld [vmem:[%s12596_s7 + $0x238] sm:$0xff]  ;;  %v7285_v16 = vld [vmem:[%s12598_s9 + $0x28] sm:$0xff] }
 0x5c6   : > { %6528 = vst.msk [vmem:[#allocation7 + $0x3] sm:$0x7] %vm6524_vm9, %v6527_v20  ;;  %v6952_v20 = vld [vmem:[%s12596_s7 + $0x170] sm:$0xff]  ;;  %v7280_v52 = vld [vmem:[%s12598_s9] sm:$0xff]  ;;  %v7283_v42 = vld [vmem:[%s12598_s9 + $0x18] sm:$0xff] }
 0x5c7   : > { %v7287_v39 = vld [vmem:[%s12598_s9 + $0x38] sm:$0xff]  ;;  %v7289_v2 = vld [vmem:[%s12598_s9 + $0x48] sm:$0xff]  ;;  %v7292_v7 = vld [vmem:[%s12598_s9 + $0x60] sm:$0xff] }
 0x5c9   : > { %v6530_v53 = vld [vmem:[#allocation6 + $0x29] ss:$2 sm:$0x7] }
 0x5ca   : > { %6531 = vst.msk [vmem:[#allocation7 + $0x6] sm:$0x7] %vm6524_vm9, %v6530_v53 }
 0x5cb   : > { %v6541_v17 = vld [vmem:[#allocation7 + $0x1] sm:$0x1]  ;;  %v6532_v35 = vld [vmem:[#allocation7] sm:$0x1]  ;;  %v6696_v15 = vld [vmem:[#allocation7 + $0x2] sm:$0x1] }
 0x5cc   : > { %9295 = vmatmul.mubr.msk.f32.vlgmr.msra.gmra.mrb[92].mxu0 %vm419_vm6, %v6541_v17  ;;  %v7030_v17 = vld [vmem:[%s12596_s7 + $0x188] sm:$0xff] }
 0x5cd   : > { %9724 = vmatpush3.bf16.msra.mxu0 %v9723_v32  ;;  %9313 = vmatprep.mubr.msk.f32.mxu0 %vm10246_vm8, %v12669_v13  ;;  %v6779_v9 = vld [vmem:[#allocation7 + $0x3] sm:$0x1]  ;;  %v6862_v11 = vld [vmem:[#allocation7 + $0x4] sm:$0x1]  ;;  %v9783_v53 = vpack.c.bf16 %v7030_v17, %v7029_v24  ;;  %v6945_v14 = vld [vmem:[#allocation7 + $0x5] sm:$0x1] }
 0x5ce   : > { %9725 = vmatprep.subr.bf16.mxu0 %v10245_v36  ;;  %v6953_v32 = vld [vmem:[%s12596_s7 + $0x178] sm:$0xff]  ;;  %v7294_v24 = vld [vmem:[%s12598_s9 + $0x70] sm:$0xff] }
 0x5cf   : > { %v9780_v50 = vpack.c.bf16 %v6953_v32, %v6952_v20  ;;  %v7295_v17 = vld [vmem:[%s12598_s9 + $0x78] sm:$0xff] }
 0x5d1   : > { %9727 = vmatpush3.bf16.msra.mxu0 %v9726_v3  ;;  %v7031_v3 = vld [vmem:[%s12596_s7 + $0x190] sm:$0xff]  ;;  %v7028_v46 = vld [vmem:[#allocation7 + $0x6] sm:$0x1]  ;;  %v7111_v23 = vld [vmem:[#allocation7 + $0x7] sm:$0x1] }
 0x5d2   : > { %9728 = vmatprep.subr.bf16.mxu0 %v10245_v36  ;;  %v7194_v49 = vld [vmem:[#allocation7 + $0x8] sm:$0x1] }
 0x5d5   : > { %9730 = vmatpush3.bf16.msra.mxu0 %v9729_v61  ;;  %v9786_v61 = vpack.c.bf16 %v7032_v38, %v7031_v3 }
 0x5d6   : > { %9731 = vmatprep.subr.bf16.mxu0 %v10245_v36 }
 0x5d9   : > { %9733 = vmatpush3.bf16.msra.mxu0 %v9732_v22  ;;  %v9789_v22 = vpack.c.bf16 %v7034_v21, %v7033_v18 }
 0x5da   : > { %9734 = vmatprep.subr.bf16.mxu0 %v10245_v36 }
 0x5dc   : > { %9314 = vmatmul.mubr.msk.f32.vlgmr.msra.gmra.mrb[94].mxu0 %vm419_vm6, %v6532_v35  ;;  %v9795_v35 = vpack.c.bf16 %v7113_v33, %v7112_v51 }
 0x5dd   : > { %9736 = vmatpush3.bf16.msra.mxu0 %v9735_v30  ;;  %9332 = vmatprep.mubr.msk.f32.mxu0 %vm10246_vm8, %v12669_v13  ;;  %v9792_v30 = vpack.c.bf16 %v7036_v29, %v7035_v0 }
 0x5de   : > { %9737 = vmatprep.subr.bf16.mxu0 %v10245_v36 }
 0x5e1   : > { %9739 = vmatpush3.bf16.msra.mxu0 %v9738_v56  ;;  %v7114_v56 = vld [vmem:[%s12596_s7 + $0x1d0] sm:$0xff] }
 0x5e2   : > { %9740 = vmatprep.subr.bf16.mxu0 %v10245_v36 }
 0x5e5   : > { %9742 = vmatpush3.bf16.msra.mxu0 %v9741_v57  ;;  %v9798_v57 = vpack.c.bf16 %v7115_v28, %v7114_v56 }
 0x5e6   : > { %9743 = vmatprep.subr.bf16.mxu0 %v10245_v36 }
 0x5e9   : > { %9745 = vmatpush3.bf16.msra.mxu0 %v9744_v4  ;;  %v9801_v4 = vpack.c.bf16 %v7117_v63, %v7116_v59 }
 0x5ea   : > { %9746 = vmatprep.subr.bf16.mxu0 %v10245_v36 }
 0x5ec   : > { %9333 = vmatmul.mubr.msk.f32.vlgmr.msra.gmra.mrb[96].mxu0 %vm419_vm6, %v6696_v15  ;;  %v9807_v15 = vpack.c.bf16 %v7196_v1, %v7195_v60 }
 0x5ed   : > { %9748 = vmatpush3.bf16.msra.mxu0 %v9747_v45  ;;  %9351 = vmatprep.mubr.msk.f32.mxu0 %vm10246_vm8, %v12669_v13  ;;  %v9804_v45 = vpack.c.bf16 %v7119_v40, %v7118_v37  ;;  %v7277_v40 = vld [vmem:[%s12597_s8] sm:$0x1] }
 0x5ee   : > { %9749 = vmatprep.subr.bf16.mxu0 %v10245_v36 }
 0x5f1   : > { %9751 = vmatpush3.bf16.msra.mxu0 %v9750_v6  ;;  %v7197_v6 = vld [vmem:[%s12596_s7 + $0x210] sm:$0xff] }
 0x5f2   : > { %9752 = vmatprep.subr.bf16.mxu0 %v10245_v36 }
 0x5f5   : > { %9754 = vmatpush3.bf16.msra.mxu0 %v9753_v8  ;;  %v9810_v8 = vpack.c.bf16 %v7198_v19, %v7197_v6  ;;  %v7296_v6 = vld [vmem:[%s12599_s10] sm:$0x1] }
 0x5f6   : > { %9755 = vmatprep.subr.bf16.mxu0 %v10245_v36 }
 0x5f9   : > { %9757 = vmatpush3.bf16.msra.mxu0 %v9756_v10  ;;  %v9813_v10 = vpack.c.bf16 %v7200_v31, %v7199_v27 }
 0x5fa   : > { %9758 = vmatprep.subr.bf16.mxu0 %v10245_v36 }
 0x5fc   : > { %9352 = vmatmul.mubr.msk.f32.vlgmr.msra.gmra.mrb[98].mxu0 %vm419_vm6, %v6779_v9  ;;  %v7281_v9 = vld [vmem:[%s12598_s9 + $0x8] sm:$0xff] }
 0x5fd   : > { %9760 = vmatpush3.bf16.msra.mxu0 %v9759_v47  ;;  %9370 = vmatprep.mubr.msk.f32.mxu0 %vm10246_vm8, %v12669_v13  ;;  %v9816_v47 = vpack.c.bf16 %v7202_v34, %v7201_v12  ;;  %v9819_v26 = vpack.c.bf16 %v7281_v9, %v7280_v52 }
 0x5fe   : > { %9761 = vmatprep.subr.bf16.mxu0 %v10245_v36 }
 0x601   : > { %9763 = vmatpush3.bf16.msra.mxu0 %v9762_v54  ;;  %v7282_v54 = vld [vmem:[%s12598_s9 + $0x10] sm:$0xff] }
 0x602   : > { %9764 = vmatprep.subr.bf16.mxu0 %v10245_v36 }
 0x605   : > { %9766 = vmatpush3.bf16.msra.mxu0 %v9765_v43  ;;  %v9822_v43 = vpack.c.bf16 %v7283_v42, %v7282_v54 }
 0x606   : > { %9767 = vmatprep.subr.bf16.mxu0 %v10245_v36 }
 0x609   : > { %9769 = vmatpush3.bf16.msra.mxu0 %v9768_v62  ;;  %v7286_v62 = vld [vmem:[%s12598_s9 + $0x30] sm:$0xff] }
 0x60a   : > { %9770 = vmatprep.subr.bf16.mxu0 %v10245_v36  ;;  %v9828_v41 = vpack.c.bf16 %v7287_v39, %v7286_v62 }
 0x60c   : > { %9371 = vmatmul.mubr.msk.f32.vlgmr.msra.gmra.mrb[100].mxu0 %vm419_vm6, %v6862_v11  ;;  %v7290_v11 = vld [vmem:[%s12598_s9 + $0x50] sm:$0xff] }
 0x60d   : > { %9772 = vmatpush3.bf16.msra.mxu0 %v9771_v25  ;;  %9389 = vmatprep.mubr.msk.f32.mxu0 %vm10246_vm8, %v12669_v13  ;;  %v7288_v25 = vld [vmem:[%s12598_s9 + $0x40] sm:$0xff] }
 0x60e   : > { %9773 = vmatprep.subr.bf16.mxu0 %v10245_v36  ;;  %v9831_v5 = vpack.c.bf16 %v7289_v2, %v7288_v25 }
 0x611   : > { %9775 = vmatpush3.bf16.msra.mxu0 %v9774_v58  ;;  %v7291_v58 = vld [vmem:[%s12598_s9 + $0x58] sm:$0xff] }
 0x612   : > { %9776 = vmatprep.subr.bf16.mxu0 %v10245_v36  ;;  %v9834_v48 = vpack.c.bf16 %v7291_v58, %v7290_v11 }
 0x615   : > { %9778 = vmatpush3.bf16.msra.mxu0 %v9777_v44  ;;  %v7293_v44 = vld [vmem:[%s12598_s9 + $0x68] sm:$0xff] }
 0x616   : > { %9779 = vmatprep.subr.bf16.mxu0 %v10245_v36  ;;  %v9837_v20 = vpack.c.bf16 %v7293_v44, %v7292_v7 }
 0x619   : > { %9781 = vmatpush3.bf16.msra.mxu0 %v9780_v50 }
 0x61a   : > { %9782 = vmatprep.subr.bf16.mxu0 %v10245_v36 }
 0x61c   : > { %9390 = vmatmul.mubr.msk.f32.vlgmr.msra.gmra.mrb[102].mxu0 %vm419_vm6, %v6945_v14 }
 0x61d   : > { %9784 = vmatpush3.bf16.msra.mxu0 %v9783_v53  ;;  %9408 = vmatprep.mubr.msk.f32.mxu0 %vm10246_vm8, %v12669_v13  ;;  %v9840_v53 = vpack.c.bf16 %v7295_v17, %v7294_v24 }
 0x61e   : > { %9785 = vmatprep.subr.bf16.mxu0 %v10245_v36 }
 0x621   : > { %9787 = vmatpush3.bf16.msra.mxu0 %v9786_v61 }
 0x622   : > { %9788 = vmatprep.subr.bf16.mxu0 %v10245_v36 }
 0x625   : > { %9790 = vmatpush3.bf16.msra.mxu0 %v9789_v22 }
 0x626   : > { %9791 = vmatprep.subr.bf16.mxu0 %v10245_v36 }
 0x629   : > { %9793 = vmatpush3.bf16.msra.mxu0 %v9792_v30 }
 0x62a   : > { %9794 = vmatprep.subr.bf16.mxu0 %v10245_v36 }
 0x62c   : > { %9409 = vmatmul.mubr.msk.f32.vlgmr.msra.gmra.mrb[104].mxu0 %vm419_vm6, %v7028_v46 }
 0x62d   : > { %9796 = vmatpush3.bf16.msra.mxu0 %v9795_v35  ;;  %9427 = vmatprep.mubr.msk.f32.mxu0 %vm10246_vm8, %v12669_v13 }
 0x62e   : > { %9797 = vmatprep.subr.bf16.mxu0 %v10245_v36 }
 0x631   : > { %9799 = vmatpush3.bf16.msra.mxu0 %v9798_v57 }
 0x632   : > { %9800 = vmatprep.subr.bf16.mxu0 %v10245_v36 }
 0x635   : > { %9802 = vmatpush3.bf16.msra.mxu0 %v9801_v4 }
 0x636   : > { %9803 = vmatprep.subr.bf16.mxu0 %v10245_v36 }
 0x639   : > { %9805 = vmatpush3.bf16.msra.mxu0 %v9804_v45 }
 0x63a   : > { %9806 = vmatprep.subr.bf16.mxu0 %v10245_v36 }
 0x63c   : > { %9428 = vmatmul.mubr.msk.f32.vlgmr.msra.gmra.mrb[106].mxu0 %vm419_vm6, %v7111_v23 }
 0x63d   : > { %9808 = vmatpush3.bf16.msra.mxu0 %v9807_v15  ;;  %9446 = vmatprep.mubr.msk.f32.mxu0 %vm10246_vm8, %v12669_v13 }
 0x63e   : > { %9809 = vmatprep.subr.bf16.mxu0 %v10245_v36 }
 0x641   : > { %9811 = vmatpush3.bf16.msra.mxu0 %v9810_v8 }
 0x642   : > { %9812 = vmatprep.subr.bf16.mxu0 %v10245_v36 }
 0x645   : > { %9814 = vmatpush3.bf16.msra.mxu0 %v9813_v10 }
 0x646   : > { %9815 = vmatprep.subr.bf16.mxu0 %v10245_v36 }
 0x649   : > { %9817 = vmatpush3.bf16.msra.mxu0 %v9816_v47 }
 0x64a   : > { %9818 = vmatprep.subr.bf16.mxu0 %v10245_v36 }
 0x64c   : > { %9447 = vmatmul.mubr.msk.f32.vlgmr.msra.gmra.mrb[108].mxu0 %vm419_vm6, %v7194_v49 }
 0x64d   : > { %9481 = vmatprep.mubr.msk.f32.mxu0 %vm10246_vm8, %v12669_v13  ;;  %9820 = vmatpush3.bf16.msra.mxu0 %v9819_v26  ;;  %v7284_v13 = vld [vmem:[%s12598_s9 + $0x20] sm:$0xff] }
 0x64e   : > { %9821 = vmatprep.subr.bf16.mxu0 %v10245_v36  ;;  %v9825_v55 = vpack.c.bf16 %v7285_v16, %v7284_v13 }
 0x651   : > { %9823 = vmatpush3.bf16.msra.mxu0 %v9822_v43 }
 0x652   : > { %9824 = vmatprep.subr.bf16.mxu0 %v10245_v36 }
 0x655   : > { %9826 = vmatpush3.bf16.msra.mxu0 %v9825_v55 }
 0x656   : > { %9827 = vmatprep.subr.bf16.mxu0 %v10245_v36 }
 0x659   : > { %9829 = vmatpush3.bf16.msra.mxu0 %v9828_v41 }
 0x65a   : > { %9830 = vmatprep.subr.bf16.mxu0 %v10245_v36 }
 0x65d   : > { %9832 = vmatpush3.bf16.msra.mxu0 %v9831_v5 }
 0x65e   : > { %9833 = vmatprep.subr.bf16.mxu0 %v10245_v36 }
 0x661   : > { %9835 = vmatpush3.bf16.msra.mxu0 %v9834_v48 }
 0x662   : > { %9836 = vmatprep.subr.bf16.mxu0 %v10245_v36 }
 0x665   : > { %9838 = vmatpush3.bf16.msra.mxu0 %v9837_v20 }
 0x666   : > { %9839 = vmatprep.subr.bf16.mxu0 %v10245_v36 }
 0x669   : > { %9841 = vmatpush3.bf16.msra.mxu0 %v9840_v53 }
 0x69f   : > { %v6619_v32 = vpop.f32.mrb[92].mxu0 }
 0x6a0   : > { %v9296_v50 = vpop.f32.mrb[93].mxu0 }
 0x6af   : > { %v6692_v3 = vpop.f32.mrb[94].mxu0 }
 0x6b0   : > { %v6693_v38 = vadd.f32 %v6692_v3, %v6619_v32  ;;  %v9315_v14 = vpop.f32.mrb[95].mxu0 }
 0x6bf   : > { %v6774_v61 = vpop.f32.mrb[96].mxu0 }
 0x6c0   : > { %v6778_v18 = vadd.f32 %v6774_v61, %v6693_v38  ;;  %v9334_v21 = vpop.f32.mrb[97].mxu0 }
 0x6cf   : > { %v6857_v22 = vpop.f32.mrb[98].mxu0 }
 0x6d0   : > { %v6861_v0 = vadd.f32 %v6857_v22, %v6778_v18  ;;  %v9353_v29 = vpop.f32.mrb[99].mxu0 }
 0x6df   : > { %v6940_v36 = vpop.f32.mrb[100].mxu0 }
 0x6e0   : > { %v6944_v30 = vadd.f32 %v6940_v36, %v6861_v0  ;;  %v9372_v51 = vpop.f32.mrb[101].mxu0 }
 0x6ef   : > { %v7023_v33 = vpop.f32.mrb[102].mxu0 }
 0x6f0   : > { %v7027_v35 = vadd.f32 %v7023_v33, %v6944_v30  ;;  %v9391_v56 = vpop.f32.mrb[103].mxu0 }
 0x6ff   : > { %v7106_v28 = vpop.f32.mrb[104].mxu0 }
 0x700   : > { %v7110_v46 = vadd.f32 %v7106_v28, %v7027_v35  ;;  %v9410_v57 = vpop.f32.mrb[105].mxu0 }
 0x70f   : > { %v7189_v59 = vpop.f32.mrb[106].mxu0 }
 0x710   : > { %v7193_v63 = vadd.f32 %v7189_v59, %v7110_v46  ;;  %v9429_v4 = vpop.f32.mrb[107].mxu0 }
 0x71f   : > { %v7272_v37 = vpop.f32.mrb[108].mxu0 }
 0x720   : > { %v7276_v45 = vadd.f32 %v7272_v37, %v7193_v63  ;;  %v9448_v60 = vpop.f32.mrb[109].mxu0 }
 0x722   : > { %v7278_v1 = vadd.f32 %v7277_v40, %v7276_v45 }
 0x724   : > { %v7279_v15 = vmax.f32 %v7278_v1, 0.0 }
 0x726   : > { %9482 = vmatmul.mubr.f32.vlgmr.msra.gmra.mrb[110].mxu0 %v7279_v15 }
 0x7f9   : > { %v7363_v19 = vpop.f32.mrb[110].mxu0 }
 0x7fa   : > { %v7364_v23 = vadd.f32 %v7363_v19, %v7296_v6  ;;  %v9483_v8 = vpop.f32.mrb[111].mxu0 }
 0x7fc   : > { %7368 = vst.msk [vmem:[%s378_s25] sm:$0x1] %vm7367_vm10, %v7364_v23 }
 0x7fd   : > { %10192 = shalt.err (!%p10189_p3)
}
 0x7fe   : > { %s10193_s15 = scalar_lea.hbm %s12547_s12, 16  ;;  %s10197_s30 = scalar_lea.hbm %s12600_s11, 32 }
 0x7ff   : > { %p10194_p4 = scmp.ne.s32.totalorder %s12547_s12, %s10193_s15  ;;  %p10198_p9 = scmp.lt.u32.totalorder %s12547_s12, %s12600_s11 }
 0x800   : > { %p10199_p10 = scmp.lt.u32.totalorder %s10197_s30, %s10193_s15  ;;  %p10201_p12 = scmp.lt.u32.totalorder %s10193_s15, %s12547_s12 }
 0x801   : > { %p10195_p7 = pnand %p10194_p4, %p10346_p5 }
 0x802   : > { %p10200_p11 = por %p10199_p10, %p10198_p9 }
 0x803   : > { %p10196_p8 = pneg %p10195_p7 }
 0x804   : > { %p10202_p13 = por %p10201_p12, %p10200_p11 }
 0x806   : > { %p10203_p0 = pnand %p10202_p13, %p10196_p8 }
 0x808   : > { %10206 = shalt.err (!%p10203_p0)
}
 0x809   : > { %10135 = dma.vmem_to_hbm [thread:$0]  (%p10346_p5), %s12549_s29, 16, %s12547_s12, %s7370_s14  }
 0x80a PF: > { %p10141_p1 = scmp.ge.s32.totalorder %s10241_s20, 2  ;;  %s7394_s0 = sand.u32 1, %s10229_s17  }
 0x80b   : > { %s7395_s16 = scalar_lea.sflag [#allocation9], %s7394_s0 }
 0x80c   : > { %p10138_p2 = pnand %p10141_p1, %p10350_p6 }
 0x80e   : > { %10224 = dma.done.wait (!%p10138_p2), %s7395_s16, 16  }
 0x80f   : > { %10226 = vsyncadd (!%p10138_p2), %s7395_s16, 4294967280  ;;  %p21_p3 = scmp.ge.s32.totalorder %s10333_s23, 4   ;;  %s12696_s17 = smov %s10233_s18 }
 0x810   : > { %s12697_s18 = smov %s10237_s19  ;;  %s12698_s19 = smov %s10344_s26 }
 0x811   : > { %s12699_s20 = smov %s10333_s23  ;;  %23 = sbr.rel (!%p21_p3) target bundleno = 5 (0x5), region = 131 }
 0x818   :  { %7399 = vsyncpa [#allocation9], 1 }
 0x819   :  { %7401 = vsyncpa [#allocation9 + $0x1], 1 }

</bundles_post_ra>
